<compile_context>
chip_gen: v7x
topology: tpu7x:2x2x1
jax: 0.10.0
libtpu: 0.0.40
codegen_flags: <defaults>
</compile_context>

<pallas_src>
import functools

import jax
import jax.numpy as jnp
from jax import lax
from jax.experimental import pallas as pl
from jax.experimental.pallas import tpu as pltpu

IN_FEATURES = 196608   # fixed by the module: Linear(196608, 10)
OUT_FEATURES = 10


def _default_n_split():
    """2-way K split only on chips with >1 TensorCore per chip (v7x/v4/v5p).
    On single-TC chips (v5e/v6e) a 'parallel' axis is just a serial loop."""
    try:
        kind = jax.devices()[0].device_kind.lower()
    except Exception:
        return 1
    return 2 if any(tag in kind for tag in ("v7", "v4", "v5p")) else 1


def linear_kernel(x_ref, w_ref, b_ref, o_ref):
    """Grid = (core_split, k_steps).  Each step consumes a (B, tk) slab of x
    and the matching lane-dense (N, tk) slab of W, accumulating a partial
    (B, N) product into the resident f32 output block.  The bias is added on
    the last reduction step of core-half 0 only."""
    c = pl.program_id(0)
    k = pl.program_id(1)

    @pl.when(k == 0)
    def _():
        o_ref[...] = jnp.zeros_like(o_ref)

    # (B, tk) x (N, tk) contracted over the shared K (lane) axis -> (B, N),
    # i.e. x @ W.T, accumulated in f32 on the MXU (no W transpose needed in
    # VMEM: contraction is expressed over dim 1 of both operands).
    o_ref[...] += lax.dot_general(
        x_ref[...],
        w_ref[...],
        dimension_numbers=(((1,), (1,)), ((), ())),
        preferred_element_type=jnp.float32,
    )

    @pl.when((k == pl.num_programs(1) - 1) & (c == 0))
    def _():
        o_ref[...] += b_ref[...]


@functools.partial(jax.jit, static_argnames=("n_split", "tk", "stream_dtype"))
def tudui_forward(x, w, b, *, n_split=1, tk=49152, stream_dtype=None):
    """x: (B, K) f32, w: (N, K) f32 (PyTorch layout), b: (1, N) f32 -> (B, N) f32.

    n_split: K-reduction split across TensorCores (1 on v5e/v6e, 2 on v7x).
    tk:      K elements streamed per grid step (per core-half).
    stream_dtype: optional narrower streaming dtype for x/w (e.g. bf16);
                  accumulation stays f32.  Default None == exact f32 forward.
    """
    B, K = x.shape
    N, K2 = w.shape
    assert K == K2 == IN_FEATURES and N == OUT_FEATURES
    assert K % (n_split * tk) == 0, "reduction tile must divide K / n_split"
    nkk = K // (n_split * tk)  # reduction steps per core-half

    if stream_dtype is not None:
        x = x.astype(stream_dtype)
        w = w.astype(stream_dtype)

    if n_split == 1:
        # Single resident (B, N) output block; bias already folded -> no
        # wrapper epilogue at all.
        out_shape = jax.ShapeDtypeStruct((B, N), jnp.float32)
        out_spec = pl.BlockSpec((B, N), lambda c, k: (0, 0))
    else:
        # One resident (B, N) partial-sum block per core-half.
        out_shape = jax.ShapeDtypeStruct((n_split, B, N), jnp.float32)
        out_spec = pl.BlockSpec((None, B, N), lambda c, k: (c, 0, 0))

    bytes_accessed = (
        x.size * x.dtype.itemsize
        + w.size * w.dtype.itemsize
        + b.size * b.dtype.itemsize
        + n_split * B * N * 4
    )

    out = pl.pallas_call(
        linear_kernel,
        out_shape=out_shape,
        grid_spec=pltpu.PrefetchScalarGridSpec(
            num_scalar_prefetch=0,
            grid=(n_split, nkk),
            in_specs=[
                # x slab along K: core-half c covers K-blocks [c*nkk, (c+1)*nkk)
                pl.BlockSpec((B, tk), lambda c, k: (0, c * nkk + k)),
                # W slab along K, lane-dense (N on sublanes, K on lanes)
                pl.BlockSpec((N, tk), lambda c, k: (0, c * nkk + k)),
                # bias, same tiny block every step
                pl.BlockSpec((1, N), lambda c, k: (0, 0)),
            ],
            out_specs=out_spec,
        ),
        compiler_params=pltpu.CompilerParams(
            # core-split axis is independent (megacore); K is a reduction and
            # stays innermost so the resident accumulator pattern is valid.
            dimension_semantics=("parallel", "arbitrary"),
        ),
        cost_estimate=pl.CostEstimate(
            flops=2 * B * K * N,
            transcendentals=0,
            bytes_accessed=bytes_accessed,
        ),
    )(x, w, b)

    if n_split == 1:
        return out
    # Combine the per-core partial sums (bias was added in core-half 0 only).
    return out.sum(axis=0)


def init_params(key):
    """Deterministic init mimicking torch.nn.Linear default U(-1/sqrt(K), 1/sqrt(K)).
    Weight is stored in PyTorch's native (out_features, in_features) layout."""
    kw, kb = jax.random.split(key)
    bound = 1.0 / (IN_FEATURES ** 0.5)
    w = jax.random.uniform(
        kw, (OUT_FEATURES, IN_FEATURES), jnp.float32, minval=-bound, maxval=bound
    )
    b = jax.random.uniform(
        kb, (1, OUT_FEATURES), jnp.float32, minval=-bound, maxval=bound
    )
    return w, b


if __name__ == "__main__":
    key = jax.random.PRNGKey(0)
    k_in, k_par = jax.random.split(key)

    batch = 2  # small batch; in_features is fixed at 196608 by the module
    x = jax.random.normal(k_in, (batch, IN_FEATURES), jnp.float32)
    w, b = init_params(k_par)

    n_split = _default_n_split()   # 1 on v5e/v6e, 2 on v7x/v4/v5p
    out = tudui_forward(x, w, b, n_split=n_split)
    out = jax.block_until_ready(out)

    # Sanity check against plain-JAX reference of the same math (x @ W.T + b).
    ref = x @ w.T + b
    assert out.shape == (batch, OUT_FEATURES)
    assert jnp.allclose(out, ref, atol=1e-3, rtol=1e-3)

    print("KERNEL_OK")
</pallas_src>

<mosaic_0001>
module attributes {stable_mosaic.version = 11 : i64} {
  func.func @linear_kernel(%arg0: i32, %arg1: i32, %arg2: memref<2x49152xf32, #tpu.memory_space<vmem>>, %arg3: memref<10x49152xf32, #tpu.memory_space<vmem>>, %arg4: memref<1x10xf32, #tpu.memory_space<vmem>>, %arg5: memref<2x10xf32, #tpu.memory_space<vmem>>) attributes {dimension_semantics = [#tpu.dimension_semantics<parallel>, #tpu.dimension_semantics<arbitrary>], iteration_bounds = array<i64: 1, 4>, scalar_prefetch = 0 : i64, scratch_operands = 0 : i64, tpu.core_type = #tpu.core_type<tc>, window_params = [{transform_indices = @transform_0, window_bounds = array<i64: 2, 49152>}, {transform_indices = @transform_1, window_bounds = array<i64: 10, 49152>}, {pipeline_mode = #tpu.pipeline_mode<synchronous>, transform_indices = @transform_2, window_bounds = array<i64: 1, 10>}, {pipeline_mode = #tpu.pipeline_mode<synchronous>, transform_indices = @transform_3, window_bounds = array<i64: 2, 10>}]} {
    %c0_i32 = arith.constant 0 : i32
    %0 = arith.cmpi eq, %arg1, %c0_i32 : i32
    %1 = arith.extui %0 : i1 to i32
    %c0_i32_0 = arith.constant 0 : i32
    %2 = arith.cmpi ne, %1, %c0_i32_0 : i32
    scf.if %2 {
      %cst_10 = arith.constant 0.000000e+00 : f32
      %14 = vector.broadcast %cst_10 : f32 to vector<2x10xf32>
      %c0_11 = arith.constant 0 : index
      %c0_12 = arith.constant 0 : index
      %15 = vector.load %arg5[%c0_11, %c0_12] : memref<2x10xf32, #tpu.memory_space<vmem>>, vector<2x10xf32>
      tpu.vector_store %arg5[%c0_11, %c0_12], %14 {strides = array<i32>} : memref<2x10xf32, #tpu.memory_space<vmem>>, vector<2x10xf32>,
    } else {
    }
    %c0 = arith.constant 0 : index
    %c0_1 = arith.constant 0 : index
    %3 = vector.load %arg5[%c0, %c0_1] : memref<2x10xf32, #tpu.memory_space<vmem>>, vector<2x10xf32>
    %c0_2 = arith.constant 0 : index
    %c0_3 = arith.constant 0 : index
    %4 = vector.load %arg2[%c0_2, %c0_3] : memref<2x49152xf32, #tpu.memory_space<vmem>>, vector<2x49152xf32>
    %c0_4 = arith.constant 0 : index
    %c0_5 = arith.constant 0 : index
    %5 = vector.load %arg3[%c0_4, %c0_5] : memref<10x49152xf32, #tpu.memory_space<vmem>>, vector<10x49152xf32>
    %cst = arith.constant dense<0.000000e+00> : vector<2x10xf32>
    %6 = tpu.matmul %4, %5, %cst {dimension_numbers = #tpu.dot_dimension_numbers<[1], [1], [0], [0], [0, 0, 1, 0], [], []>} : vector<2x49152xf32>, vector<10x49152xf32>, vector<2x10xf32> -> vector<2x10xf32>
    %7 = arith.addf %3, %6 : vector<2x10xf32>
    %c0_6 = arith.constant 0 : index
    %c0_7 = arith.constant 0 : index
    %8 = vector.load %arg5[%c0_6, %c0_7] : memref<2x10xf32, #tpu.memory_space<vmem>>, vector<2x10xf32>
    tpu.vector_store %arg5[%c0_6, %c0_7], %7 {strides = array<i32>} : memref<2x10xf32, #tpu.memory_space<vmem>>, vector<2x10xf32>,
    %c3_i32 = arith.constant 3 : i32
    %9 = arith.cmpi eq, %arg1, %c3_i32 : i32
    %c0_i32_8 = arith.constant 0 : i32
    %10 = arith.cmpi eq, %arg0, %c0_i32_8 : i32
    %11 = arith.andi %9, %10 : i1
    %12 = arith.extui %11 : i1 to i32
    %c0_i32_9 = arith.constant 0 : i32
    %13 = arith.cmpi ne, %12, %c0_i32_9 : i32
    scf.if %13 {
      %c0_10 = arith.constant 0 : index
      %c0_11 = arith.constant 0 : index
      %14 = vector.load %arg5[%c0_10, %c0_11] : memref<2x10xf32, #tpu.memory_space<vmem>>, vector<2x10xf32>
      %c0_12 = arith.constant 0 : index
      %c0_13 = arith.constant 0 : index
      %15 = vector.load %arg4[%c0_12, %c0_13] : memref<1x10xf32, #tpu.memory_space<vmem>>, vector<1x10xf32>
      %16 = vector.broadcast %15 : vector<1x10xf32> to vector<2x10xf32>
      %17 = arith.addf %14, %16 : vector<2x10xf32>
      %c0_14 = arith.constant 0 : index
      %c0_15 = arith.constant 0 : index
      %18 = vector.load %arg5[%c0_14, %c0_15] : memref<2x10xf32, #tpu.memory_space<vmem>>, vector<2x10xf32>
      tpu.vector_store %arg5[%c0_14, %c0_15], %17 {strides = array<i32>} : memref<2x10xf32, #tpu.memory_space<vmem>>, vector<2x10xf32>,
    } else {
    }
    return
  }
  func.func @transform_0(%arg0: i32, %arg1: i32) -> (i32, i32) {
    %c4_i32 = arith.constant 4 : i32
    %0 = arith.muli %arg0, %c4_i32 : i32
    %1 = arith.addi %0, %arg1 : i32
    %c0_i32 = arith.constant 0 : i32
    %c0_i32_0 = arith.constant 0 : i32
    return %c0_i32, %1 : i32, i32
  }
  func.func @transform_1(%arg0: i32, %arg1: i32) -> (i32, i32) {
    %c4_i32 = arith.constant 4 : i32
    %0 = arith.muli %arg0, %c4_i32 : i32
    %1 = arith.addi %0, %arg1 : i32
    %c0_i32 = arith.constant 0 : i32
    %c0_i32_0 = arith.constant 0 : i32
    return %c0_i32, %1 : i32, i32
  }
  func.func @transform_2(%arg0: i32, %arg1: i32) -> (i32, i32) {
    %c0_i32 = arith.constant 0 : i32
    %c0_i32_0 = arith.constant 0 : i32
    %c0_i32_1 = arith.constant 0 : i32
    return %c0_i32, %c0_i32_0 : i32, i32
  }
  func.func @transform_3(%arg0: i32, %arg1: i32) -> (i32, i32) {
    %c0_i32 = arith.constant 0 : i32
    %c0_i32_0 = arith.constant 0 : i32
    %c0_i32_1 = arith.constant 0 : i32
    return %c0_i32, %c0_i32_0 : i32, i32
  }
}

</mosaic_0001>

<bundles_post_ra>
// kernel: tudui_forward.1
= control target key start
LH: loop header
LB: loop body
LE: loop exit
PB: predicated region body
PF: predicated region fallthrough
CT: control target
= control target key end

     0   :  { %8 = vsyncpa [#allocation3], 0  ;;  %s19283_s0 = inlined_call_operand.hbm [shape: f32[2,196608], index: 0, kind: input, shape index: {}]   ;;  %s19284_s1 = inlined_call_operand.hbm [shape: f32[10,196608], index: 1, kind: input, shape index: {}]   ;;  %s19285_s2 = inlined_call_operand.hbm [shape: f32[1,10], index: 2, kind: input, shape index: {}]   ;;  %s19286_s3 = inlined_call_operand.hbm [shape: f32[2,10], index: 3, kind: output, shape index: {}]  }
   0x1   :  { %10 = vsyncpa [#allocation3 + $0x1], 0 }
   0x2   :  { %11 = vsyncpa [#allocation6], 0 }
   0x3   :  { %13 = vsyncpa [#allocation6 + $0x1], 0 }
   0x4   :  { %14 = vsyncpa [#allocation4], 0  ;;  %s17977_s12 = smov 0   ;;  %s17979_s13 = smov 0  }
   0x5   :  { %s17981_s14 = smov 0   ;;  %s17983_s15 = smov 0  }
   0x6   :  { %s17985_s16 = smov 0   ;;  %s17987_s17 = smov 0  }
   0x7 LB: > { %s18006_s18 = sadd.s32 4294967295, %s17946_s17   ;;  %s43_s19 = sadd.s32 1, %s17934_s14  ;;  %s17946_s17 = sphi %s17987_s17, %s20_s17   ;;  %s17942_s16 = sphi %s17985_s16, %s19307_s16   ;;  %s17938_s15 = sphi %s17983_s15, %s19306_s15   ;;  %s17934_s14 = sphi %s17981_s14, %s19305_s14   ;;  %s17930_s13 = sphi %s17979_s13, %s19304_s13   ;;  %s17926_s12 = sphi %s17977_s12, %s19303_s12  }
   0x8   : > { %p50_p0 = scmp.ne.s32.totalorder %s17934_s14, %s17930_s13  ;;  %p56_p1 = scmp.ne.s32.totalorder %s17930_s13, %s17926_s12 }
   0x9   : > { %p19287_p2 = scmp.eq.s32.totalorder %s18006_s18, 0  ;;  %p16802_p3 = scmp.ge.s32.totalorder %s17946_s17, 1 }
   0xa   : > { %p139_p4 = scmp.lt.s32.totalorder %s17946_s17, 5  ;;  %s17948_s22 = smov [#allocation7]  }
   0xb   : > { %p18017_p5 = por %p19287_p2, %p56_p1  ;;  %s152_s23 = sshll.u32 %s17948_s22, 4  ;;  %s153_s23 = int_to_ptr.vmem [resolvable:$true] %s152_s23 }
   0xc   : > { %p18021_p6 = pnand %p16802_p3, %p139_p4  ;;  %p51_p8 = scmp.eq.s32.totalorder %s17946_s17, 0 }
   0xd   : > { %s19290_s20 = scalar_select %p18017_p5, 1, 0 }
   0xe   : > { %s19291_s21 = scalar_select %p18021_p6, 1, 0 }
   0xf   : > { %p17603_p7 = pneg %p18021_p6  ;;  %s29_s25 = sadd.s32 1, %s17942_s16 }
  0x10   : > { %p18035_p10 = scmp.ge.s32.totalorder %s29_s25, 4  ;;  %p18042_p11 = por %p51_p8, %p50_p0 }
  0x11   : > { %p18030_p9 = pnand %p17603_p7, %p19287_p2  ;;  %s17770_s30 = scalar_lea.hbm %s19285_s2, 16 }
  0x12   : > { %s19293_s26 = scalar_select %p18035_p10, 1, 0 }
  0x13   : > { %s19294_s27 = scalar_select %p18042_p11, 1, 0 }
  0x14   : > { %p17771_p13 = scmp.ne.s32.totalorder %s19285_s2, %s17770_s30  ;;  %p17772_p1 = pneg %p18030_p9 }
  0x15   : > { %p17777_p0 = scmp.lt.u32.totalorder %s17770_s30, %s19285_s2 }
  0x16   : > { %p17773_p3 = pnand %p17772_p1, %p17771_p13 }
  0x18   : > { %p17774_p4 = pneg %p17773_p3 }
  0x1a   : > { %p17779_p7 = pnand %p17777_p0, %p17774_p4 }
  0x1c   : > { %17782 = shalt.err (!%p17779_p7)
}
  0x1d   : > { %s17783_s8 = scalar_lea.vmem %s153_s23, 16  ;;  %s17790_s9 = scalar_lea.vmem %s153_s23, 32 }
  0x1e   : > { %p17784_p8 = scmp.ne.s32.totalorder %s153_s23, %s17783_s8  ;;  %p17791_p5 = scmp.lt.s32.totalorder %s153_s23, %s153_s23 }
  0x1f   : > { %p17792_p6 = scmp.lt.s32.totalorder %s17790_s9, %s17783_s8 }
  0x20   : > { %p17786_p2 = pnand %p17784_p8, %p17772_p1 }
  0x21   : > { %p17793_p11 = por %p17792_p6, %p17791_p5 }
  0x22   : > { %p17787_p12 = pneg %p17786_p2 }
  0x24   : > { %p17794_p10 = pnand %p17793_p11, %p17787_p12 }
  0x26   : > { %17797 = shalt.err (!%p17794_p10)
}
  0x27   : > { %17606 = dma.hbm_to_vmem [thread:$0]  (!%p18030_p9), %s19285_s2, 16, %s153_s23, [#allocation6]  }
  0x28   : > { %p19295_p2 = scmp.ne.s32.totalorder %s19293_s26, 0  ;;  %s18068_s12 = sand.u32 1, %s17934_s14  }
  0x29   : > { %s16816_s22 = smul.u32 12288, %s17942_s16  ;;  %p19296_p6 = scmp.ne.s32.totalorder %s19294_s27, 0 }
  0x2a   : > { %s19309_s25 = smov (%p19295_p2, %s29_s25), 0  ;;  %s17587_s28 = smul.u32 768, %s18068_s12 }
  0x2b   : > { %s40_s24 = ssub.s32 %s17942_s16, %s19309_s25  ;;  %s18077_s4 = scalar_lea.hbm %s19283_s0, %s16816_s22 }
  0x2c   : > { %p41_p5 = scmp.eq.s32.totalorder %s40_s24, 0  ;;  %p19297_p9 = scmp.lt.s32.totalorder %s17946_s17, 4 }
  0x2d   : > { %s167_s5 = scalar_lea.vmem [#allocation2], %s17587_s28  ;;  %s17588_s7 = smul.u32 6144, %s18068_s12 }
  0x2e   : > { %p18083_p10 = pnand %p19297_p9, %p19296_p6  ;;  %s177_s6 = sshll.u32 %s167_s5, 4  ;;  %s18093_s6 = int_to_ptr.vmem [resolvable:$true] %s177_s6 }
  0x2f   : > { %s18090_s26 = scalar_select %p41_p5, %s17934_s14, %s43_s19  }
  0x30   : > { %s16817_s27 = smul.u32 49152, %s17942_s16  ;;  %s164_s8 = scalar_lea.sflag [#allocation3], %s18068_s12 }
  0x31   : > { %s17798_s9 = scalar_lea.hbm %s18077_s4, 12288  ;;  %p17800_p12 = pneg %p18083_p10 }
  0x32   : > { %p17799_p11 = scmp.ne.s32.totalorder %s18077_s4, %s17798_s9  ;;  %s17803_s19 = scalar_lea.hbm %s19283_s0, 49152 }
  0x33   : > { %p17804_p3 = scmp.lt.u32.totalorder %s18077_s4, %s19283_s0  ;;  %p17805_p4 = scmp.lt.u32.totalorder %s17803_s19, %s17798_s9 }
  0x34   : > { %p17801_p13 = pnand %p17800_p12, %p17799_p11  ;;  %p17807_p7 = scmp.lt.u32.totalorder %s17798_s9, %s18077_s4 }
  0x35   : > { %p17806_p0 = por %p17805_p4, %p17804_p3 }
  0x36   : > { %p17802_p1 = pneg %p17801_p13 }
  0x37   : > { %p17808_p8 = por %p17807_p7, %p17806_p0 }
  0x39   : > { %p17809_p2 = pnand %p17808_p8, %p17802_p1 }
  0x3b   : > { %17812 = shalt.err (!%p17809_p2)
}
  0x3c   : > { %s17813_s28 = scalar_lea.vmem %s18093_s6, 12288  ;;  %s17949_s29 = smov [#allocation2]  }
  0x3d   : > { %p17814_p5 = scmp.ne.s32.totalorder %s18093_s6, %s17813_s28  ;;  %s17818_s30 = sshll.u32 %s17949_s29, 4  ;;  %s17819_s30 = int_to_ptr.vmem [resolvable:$false] %s17818_s30 }
  0x3e   : > { %s17820_s5 = scalar_lea.vmem %s17819_s30, 24576  ;;  %p17821_p11 = scmp.lt.s32.totalorder %s18093_s6, %s17819_s30 }
  0x3f   : > { %p17816_p6 = pnand %p17814_p5, %p17800_p12  ;;  %p17822_p13 = scmp.lt.s32.totalorder %s17820_s5, %s17813_s28 }
  0x41   : > { %p17817_p9 = pneg %p17816_p6  ;;  %p17823_p3 = por %p17822_p13, %p17821_p11 }
  0x43   : > { %p17824_p4 = pnand %p17823_p3, %p17817_p9 }
  0x45   : > { %17827 = shalt.err (!%p17824_p4)
}
  0x46   : > { %17610 = dma.hbm_to_vmem [thread:$0]  (!%p18083_p10), %s18077_s4, 12288, %s18093_s6, %s164_s8  }
  0x47   : > { %s18127_s11 = scalar_lea.hbm %s19284_s1, %s16817_s27  ;;  %s188_s19 = scalar_lea.vmem [#allocation5], %s17588_s7 }
  0x48   : > { %s197_s22 = sshll.u32 %s188_s19, 4  ;;  %s184_s24 = sand.u32 1, %s17946_s17   ;;  %s18132_s22 = int_to_ptr.vmem [resolvable:$true] %s197_s22 }
  0x49   : > { %s18134_s28 = scalar_lea.sflag [#allocation6], %s184_s24  ;;  %s17828_s29 = scalar_lea.hbm %s18127_s11, 98304 }
  0x4a   : > { %p17829_p1 = scmp.ne.s32.totalorder %s18127_s11, %s17828_s29  ;;  %s17833_s12 = scalar_lea.hbm %s19284_s1, 393216 }
  0x4b   : > { %p17834_p8 = scmp.lt.u32.totalorder %s18127_s11, %s19284_s1  ;;  %p17835_p2 = scmp.lt.u32.totalorder %s17833_s12, %s17828_s29 }
  0x4c   : > { %p17831_p0 = pnand %p17829_p1, %p17800_p12  ;;  %p17837_p6 = scmp.lt.u32.totalorder %s17828_s29, %s18127_s11 }
  0x4d   : > { %p17836_p5 = por %p17835_p2, %p17834_p8 }
  0x4e   : > { %p17832_p7 = pneg %p17831_p0 }
  0x4f   : > { %p17838_p9 = por %p17837_p6, %p17836_p5 }
  0x51   : > { %p17839_p11 = pnand %p17838_p9, %p17832_p7 }
  0x53   : > { %17842 = shalt.err (!%p17839_p11)
}
  0x54   : > { %s17843_s7 = scalar_lea.vmem %s18132_s22, 98304  ;;  %s17950_s30 = smov [#allocation5]  }
  0x55   : > { %p17844_p13 = scmp.ne.s32.totalorder %s18132_s22, %s17843_s7  ;;  %s17848_s5 = sshll.u32 %s17950_s30, 4  ;;  %s17849_s5 = int_to_ptr.vmem [resolvable:$false] %s17848_s5 }
  0x56   : > { %s17850_s9 = scalar_lea.vmem %s17849_s5, 196608  ;;  %p17851_p1 = scmp.lt.s32.totalorder %s18132_s22, %s17849_s5 }
  0x57   : > { %p17846_p3 = pnand %p17844_p13, %p17800_p12  ;;  %p17852_p0 = scmp.lt.s32.totalorder %s17850_s9, %s17843_s7 }
  0x59   : > { %p17847_p4 = pneg %p17846_p3  ;;  %p17853_p8 = por %p17852_p0, %p17851_p1 }
  0x5b   : > { %p17854_p2 = pnand %p17853_p8, %p17847_p4 }
  0x5d   : > { %17857 = shalt.err (!%p17854_p2)
}
  0x5e   : > { %s17951_s10 = smov 196608   ;;  %s17952_s19 = smov 49152  }
  0x5f   : > { %s17953_s24 = smov 3072   ;;  %p19299_p12 = scmp.ne.s32.totalorder %s19291_s21, 0 }
  0x60   : > { %17613 = dma.hbm_to_vmem [thread:$0]  (!%p18083_p10), %s18127_s11, 98304, %s18132_s22, %s18134_s28, %s17951_s10, %s17952_s19, %s17953_s24  }
  0x61   : > { %209 = sbr.rel (%p19299_p12) target bundleno = 1147 (0x47b), region = 32  ;;  %s211_s29 = sand.u32 (!%p19299_p12), 1, %s17930_s13  }
  0x62   : > { %s17589_s4 = smul.u32 (!%p19299_p12), 768, %s211_s29  ;;  %s212_s6 = scalar_lea.sflag (!%p19299_p12), [#allocation3], %s211_s29 }
  0x63   : > { %p19300_p7 = scmp.ne.s32.totalorder (!%p19299_p12), %s19290_s20, 0 }
  0x64   : > { %s18163_s12 = scalar_lea.vmem (!%p19299_p12), [#allocation2], %s17589_s4 }
  0x68   : > { %17909 = dma.done.wait (%p19300_p7), %s212_s6, 12288  }
  0x69   : > { %17911 = vsyncadd (%p19300_p7), %s212_s6, 4294955008  ;;  %s220_s27 = sand.u32 1, %s18006_s18   ;;  %s17590_s23 = smul.u32 6144, %s211_s29 }
  0x6a   : > { %s221_s11 = scalar_lea.sflag [#allocation6], %s220_s27 }
  0x6b   : > { %s18170_s22 = scalar_lea.vmem [#allocation5], %s17590_s23 }
  0x6c   : > { %17913 = dma.done.wait (%p19300_p7), %s221_s11, 98304  }
  0x6d   : > { %17915 = vsyncadd (%p19300_p7), %s221_s11, 4294868992  ;;  %p19301_p10 = scmp.eq.s32.totalorder %s18006_s18, 0 }
  0x6f   : > { %17917 = dma.done.wait (%p19301_p10), [#allocation6], 16   ;;  %p19302_p5 = pmov %p19301_p10 }
  0x70   : > { %p16809_p6 = scmp.ne.s32.totalorder %s17938_s15, 0 }
  0x71   : > { %17919 = vsyncadd (%p19302_p5), [#allocation6], 4294967280  ;;  %vm261_vm0 = vcmask (!%p16809_p6), 74752   ;;  %v17954_v0 = vmov (!%p16809_p6), 0.0  }
  0x72   : > { %260 = sbr.rel (%p16809_p6) target bundleno = 121 (0x79), region = 48  ;;  %262 = vst.msk [vmem:[#allocation8] sm:$0x3] (!%p16809_p6), %vm261_vm0, %v17954_v0 }
  0x79 PF: > { %v361_v1 = vld [vmem:[%s18170_s22 + $0x8] sm:$0xff]  ;;  %v360_v3 = vld [vmem:[%s18170_s22] sm:$0xff]  ;;  %v1228_v4 = vlaneseq  ;;  %v363_v7 = vld [vmem:[%s18170_s22 + $0x18] sm:$0xff]  ;;  %v17955_v9 = vmov 1983009808   ;;  %p16683_p9 = scmp.eq.s32.totalorder %s17938_s15, 3 }
  0x7a   : > { %v745_v2 = vld [vmem:[%s18170_s22 + $0xc08] sm:$0x3]  ;;  %v744_v6 = vld [vmem:[%s18170_s22 + $0xc00] sm:$0x3]  ;;  %v747_v8 = vld [vmem:[%s18170_s22 + $0xc18] sm:$0x3]  ;;  %v1226_v10 = vunpack.c.l.s4 %v17955_v9 }
  0x7b   : > { %v16819_v5 = vpack.c.bf16 %v745_v2, %v361_v1  ;;  %v16821_v11 = vpack.c.bf16 %v744_v6, %v360_v3  ;;  %v16823_v12 = vpack.c.bf16 %v747_v8, %v363_v7  ;;  %v362_v13 = vld [vmem:[%s18170_s22 + $0x10] sm:$0xff]  ;;  %v264_v15 = vld [vmem:[%s18163_s12] sm:$0xff]  ;;  %v1229_v16 = vshrl.u32 %v1228_v4, 7  ;;  %v365_v20 = vld [vmem:[%s18170_s22 + $0x28] sm:$0xff] }
  0x7c   : > { %v746_v14 = vld [vmem:[%s18170_s22 + $0xc10] sm:$0x3]  ;;  %v1227_v18 = vunpack.c.0.s8 %v1226_v10  ;;  %v1224_v19 = vcombine.high %v264_v15, %v264_v15  ;;  %v749_v21 = vld [vmem:[%s18170_s22 + $0xc28] sm:$0x3]  ;;  %v367_v23 = vld [vmem:[%s18170_s22 + $0x38] sm:$0xff]  ;;  %vm16681_vm1 = vcmask 74752  }
  0x7d   : > { %16820 = vmatprep.subr.bf16.mxu0 %v16819_v5  ;;  %v16825_v17 = vpack.c.bf16 %v746_v14, %v362_v13  ;;  %16824 = vmatprep.subr.bf16.mxu1 %v16823_v12  ;;  %v16827_v22 = vpack.c.bf16 %v749_v21, %v365_v20  ;;  %v751_v24 = vld [vmem:[%s18170_s22 + $0xc38] sm:$0x3]  ;;  %v364_v26 = vld [vmem:[%s18170_s22 + $0x20] sm:$0xff]  ;;  %v265_v28 = vld [vmem:[%s18163_s12 + $0x8] sm:$0xff] }
  0x7e   : > { %16822 = vmatpush1.bf16.xpose.msra.mxu0 %v16821_v11  ;;  %v18194_v25 = vsub.s32 %v1227_v18, %v1229_v16  ;;  %v16831_v27 = vpack.c.bf16 %v751_v24, %v367_v23  ;;  %v748_v29 = vld [vmem:[%s18170_s22 + $0xc20] sm:$0x3]  ;;  %v366_v30 = vld [vmem:[%s18170_s22 + $0x30] sm:$0xff]  ;;  %v1241_v32 = vcombine.high %v265_v28, %v265_v28  ;;  %v369_v36 = vld [vmem:[%s18170_s22 + $0x48] sm:$0xff] }
  0x7f   : > { %16826 = vmatpush1.bf16.xpose.msra.mxu1 %v16825_v17  ;;  %16828 = vmatprep.subr.bf16.mxu0 %v16827_v22  ;;  %v750_v31 = vld [vmem:[%s18170_s22 + $0xc30] sm:$0x3]  ;;  %v753_v37 = vld [vmem:[%s18170_s22 + $0xc48] sm:$0x3]  ;;  %v371_v39 = vld [vmem:[%s18170_s22 + $0x58] sm:$0xff]  ;;  %v16829_v44 = vpack.c.bf16 %v748_v29, %v364_v26 }
  0x80   : > { %v1231_v33 = vrot.slane %v264_v15, %v18194_v25  ;;  %v1238_v34 = vrot.slane %v1224_v19, %v18194_v25  ;;  %16832 = vmatprep.subr.bf16.mxu1 %v16831_v27  ;;  %v1248_v35 = vrot.slane %v265_v28, %v18194_v25  ;;  %v1255_v38 = vrot.slane %v1241_v32, %v18194_v25  ;;  %v755_v40 = vld [vmem:[%s18170_s22 + $0xc58] sm:$0x3]  ;;  %v266_v41 = vld [vmem:[%s18163_s12 + $0x10] sm:$0xff]  ;;  %v368_v51 = vld [vmem:[%s18170_s22 + $0x40] sm:$0xff] }
  0x81   : > { %v16833_v45 = vpack.c.bf16 %v750_v31, %v366_v30  ;;  %v16835_v47 = vpack.c.bf16 %v753_v37, %v369_v36  ;;  %v16839_v49 = vpack.c.bf16 %v755_v40, %v371_v39  ;;  %v1258_v50 = vcombine.high %v266_v41, %v266_v41  ;;  %v752_v52 = vld [vmem:[%s18170_s22 + $0xc40] sm:$0x3]  ;;  %v370_v53 = vld [vmem:[%s18170_s22 + $0x50] sm:$0xff]  ;;  %v373_v56 = vld [vmem:[%s18170_s22 + $0x68] sm:$0xff] }
  0x82   : > { %v1239_v42 = vcombine.high %v1231_v33, %v1231_v33  ;;  %v1240_v43 = vcombine.high %v1238_v34, %v1238_v34  ;;  %v1256_v46 = vcombine.high %v1248_v35, %v1248_v35  ;;  %v1257_v48 = vcombine.high %v1255_v38, %v1255_v38  ;;  %v754_v54 = vld [vmem:[%s18170_s22 + $0xc50] sm:$0x3]  ;;  %v757_v57 = vld [vmem:[%s18170_s22 + $0xc68] sm:$0x3]  ;;  %v375_v59 = vld [vmem:[%s18170_s22 + $0x78] sm:$0xff] }
  0x83   : > { %v1265_v55 = vrot.slane %v266_v41, %v18194_v25  ;;  %v1272_v58 = vrot.slane %v1258_v50, %v18194_v25  ;;  %v759_v60 = vld [vmem:[%s18170_s22 + $0xc78] sm:$0x3]  ;;  %v16837_v62 = vpack.c.bf16 %v752_v52, %v368_v51  ;;  %v16841_v63 = vpack.c.bf16 %v754_v54, %v370_v53  ;;  %v372_v5 = vld [vmem:[%s18170_s22 + $0x60] sm:$0xff]  ;;  %v374_v7 = vld [vmem:[%s18170_s22 + $0x70] sm:$0xff] }
  0x84   : > { %3304 = vmatprep.mubr.f32.mxu0 %v1239_v42  ;;  %3374 = vmatprep.mubr.f32.mxu1 %v1240_v43  ;;  %v267_v61 = vld [vmem:[%s18163_s12 + $0x18] sm:$0xff]  ;;  %v16843_v1 = vpack.c.bf16 %v757_v57, %v373_v56  ;;  %v16847_v3 = vpack.c.bf16 %v759_v60, %v375_v59  ;;  %v756_v6 = vld [vmem:[%s18170_s22 + $0xc60] sm:$0x3]  ;;  %v758_v8 = vld [vmem:[%s18170_s22 + $0xc70] sm:$0x3] }
  0x85   : > { %3305 = vmatmul.mubr.f32.vlgmr.msra.gmra.mrb[0].mxu0 %v1231_v33  ;;  %v1273_v0 = vcombine.high %v1265_v55, %v1265_v55  ;;  %v1274_v2 = vcombine.high %v1272_v58, %v1272_v58  ;;  %v1275_v4 = vcombine.high %v267_v61, %v267_v61  ;;  %v1282_v9 = vrot.slane %v267_v61, %v18194_v25  ;;  %v377_v10 = vld [vmem:[%s18170_s22 + $0x88] sm:$0xff]  ;;  %v379_v13 = vld [vmem:[%s18170_s22 + $0x98] sm:$0xff]  ;;  %v268_v15 = vld [vmem:[%s18163_s12 + $0x20] sm:$0xff] }
  0x86   : > { %3375 = vmatmul.mubr.f32.vlgmr.msra.gmra.mrb[0].mxu1 %v1238_v34  ;;  %16830 = vmatpush1.bf16.xpose.msra.mxu0 %v16829_v44  ;;  %v761_v11 = vld [vmem:[%s18170_s22 + $0xc88] sm:$0x3]  ;;  %v763_v14 = vld [vmem:[%s18170_s22 + $0xc98] sm:$0x3]  ;;  %v16845_v16 = vpack.c.bf16 %v756_v6, %v372_v5  ;;  %v16849_v17 = vpack.c.bf16 %v758_v8, %v374_v7  ;;  %v1292_v22 = vcombine.high %v268_v15, %v268_v15  ;;  %v376_v23 = vld [vmem:[%s18170_s22 + $0x80] sm:$0xff] }
  0x87   : > { %16834 = vmatpush1.bf16.xpose.msra.mxu1 %v16833_v45  ;;  %3444 = vmatprep.mubr.f32.mxu0 %v1256_v46  ;;  %v1289_v12 = vrot.slane %v1275_v4, %v18194_v25  ;;  %v1290_v18 = vcombine.high %v1282_v9, %v1282_v9  ;;  %v16851_v19 = vpack.c.bf16 %v761_v11, %v377_v10  ;;  %v760_v24 = vld [vmem:[%s18170_s22 + $0xc80] sm:$0x3]  ;;  %v378_v26 = vld [vmem:[%s18170_s22 + $0x90] sm:$0xff]  ;;  %v381_v29 = vld [vmem:[%s18170_s22 + $0xa8] sm:$0xff] }
  0x88   : > { %16836 = vmatprep.subr.bf16.mxu0 %v16835_v47  ;;  %3514 = vmatprep.mubr.f32.mxu1 %v1257_v48  ;;  %v16855_v21 = vpack.c.bf16 %v763_v14, %v379_v13  ;;  %v762_v27 = vld [vmem:[%s18170_s22 + $0xc90] sm:$0x3]  ;;  %v1299_v28 = vrot.slane %v268_v15, %v18194_v25  ;;  %v765_v30 = vld [vmem:[%s18170_s22 + $0xca8] sm:$0x3]  ;;  %v1306_v31 = vrot.slane %v1292_v22, %v18194_v25  ;;  %v383_v32 = vld [vmem:[%s18170_s22 + $0xb8] sm:$0xff] }
  0x89   : > { %16840 = vmatprep.subr.bf16.mxu1 %v16839_v49  ;;  %v1291_v20 = vcombine.high %v1289_v12, %v1289_v12  ;;  %v767_v33 = vld [vmem:[%s18170_s22 + $0xcb8] sm:$0x3]  ;;  %v269_v34 = vld [vmem:[%s18163_s12 + $0x28] sm:$0xff]  ;;  %v16857_v36 = vpack.c.bf16 %v762_v27, %v378_v26  ;;  %v380_v42 = vld [vmem:[%s18170_s22 + $0xa0] sm:$0xff] }
  0x8a   : > { %v1307_v37 = vcombine.high %v1299_v28, %v1299_v28  ;;  %v1308_v39 = vcombine.high %v1306_v31, %v1306_v31  ;;  %v16863_v40 = vpack.c.bf16 %v767_v33, %v383_v32  ;;  %v1309_v41 = vcombine.high %v269_v34, %v269_v34  ;;  %v764_v43 = vld [vmem:[%s18170_s22 + $0xca0] sm:$0x3]  ;;  %v382_v44 = vld [vmem:[%s18170_s22 + $0xb0] sm:$0xff]  ;;  %v385_v47 = vld [vmem:[%s18170_s22 + $0xc8] sm:$0xff] }
  0x8b   : > { %v766_v45 = vld [vmem:[%s18170_s22 + $0xcb0] sm:$0x3]  ;;  %v1316_v46 = vrot.slane %v269_v34, %v18194_v25  ;;  %v769_v48 = vld [vmem:[%s18170_s22 + $0xcc8] sm:$0x3]  ;;  %v387_v50 = vld [vmem:[%s18170_s22 + $0xd8] sm:$0xff]  ;;  %v16861_v53 = vpack.c.bf16 %v764_v43, %v380_v42 }
  0x8c   : > { %v1323_v49 = vrot.slane %v1309_v41, %v18194_v25  ;;  %v771_v51 = vld [vmem:[%s18170_s22 + $0xcd8] sm:$0x3]  ;;  %v270_v52 = vld [vmem:[%s18163_s12 + $0x30] sm:$0xff]  ;;  %v16865_v54 = vpack.c.bf16 %v766_v45, %v382_v44  ;;  %v16867_v56 = vpack.c.bf16 %v769_v48, %v385_v47  ;;  %v384_v60 = vld [vmem:[%s18170_s22 + $0xc0] sm:$0xff] }
  0x8d   : > { %3445 = vmatmul.mubr.f32.vlgmr.msra.gmra.mrb[2].mxu0 %v1248_v35  ;;  %v16853_v35 = vpack.c.bf16 %v760_v24, %v376_v23  ;;  %v1326_v59 = vcombine.high %v270_v52, %v270_v52  ;;  %v768_v61 = vld [vmem:[%s18170_s22 + $0xcc0] sm:$0x3]  ;;  %v391_v4 = vld [vmem:[%s18170_s22 + $0xf8] sm:$0xff]  ;;  %v273_v43 = vld [vmem:[%s18163_s12 + $0x48] sm:$0xff] }
  0x8e   : > { %3515 = vmatmul.mubr.f32.vlgmr.msra.gmra.mrb[2].mxu1 %v1255_v38  ;;  %16838 = vmatpush1.bf16.xpose.msra.mxu0 %v16837_v62  ;;  %v16859_v38 = vpack.c.bf16 %v765_v30, %v381_v29  ;;  %v1325_v57 = vcombine.high %v1323_v49, %v1323_v49  ;;  %v386_v62 = vld [vmem:[%s18170_s22 + $0xd0] sm:$0xff]  ;;  %v775_v5 = vld [vmem:[%s18170_s22 + $0xcf8] sm:$0x3]  ;;  %v16869_v7 = vpack.c.bf16 %v768_v61, %v384_v60  ;;  %v388_v14 = vld [vmem:[%s18170_s22 + $0xe0] sm:$0xff] }
  0x8f   : > { %16842 = vmatpush1.bf16.xpose.msra.mxu1 %v16841_v63  ;;  %3584 = vmatprep.mubr.f32.mxu0 %v1273_v0  ;;  %v770_v63 = vld [vmem:[%s18170_s22 + $0xcd0] sm:$0x3]  ;;  %v1333_v0 = vrot.slane %v270_v52, %v18194_v25  ;;  %v271_v6 = vld [vmem:[%s18163_s12 + $0x38] sm:$0xff]  ;;  %v772_v15 = vld [vmem:[%s18170_s22 + $0xce0] sm:$0x3] }
  0x90   : > { %16844 = vmatprep.subr.bf16.mxu0 %v16843_v1  ;;  %3654 = vmatprep.mubr.f32.mxu1 %v1274_v2  ;;  %v389_v1 = vld [vmem:[%s18170_s22 + $0xe8] sm:$0xff]  ;;  %v16873_v8 = vpack.c.bf16 %v770_v63, %v386_v62  ;;  %v1343_v13 = vcombine.high %v271_v6, %v271_v6  ;;  %v395_v22 = vld [vmem:[%s18170_s22 + $0x118] sm:$0xff]  ;;  %v272_v24 = vld [vmem:[%s18163_s12 + $0x40] sm:$0xff]  ;;  %v16877_v26 = vpack.c.bf16 %v772_v15, %v388_v14 }
  0x91   : > { %16848 = vmatprep.subr.bf16.mxu1 %v16847_v3  ;;  %v773_v2 = vld [vmem:[%s18170_s22 + $0xce8] sm:$0x3]  ;;  %v1340_v3 = vrot.slane %v1326_v59, %v18194_v25  ;;  %v779_v23 = vld [vmem:[%s18170_s22 + $0xd18] sm:$0x3]  ;;  %v1360_v32 = vcombine.high %v272_v24, %v272_v24  ;;  %v392_v33 = vld [vmem:[%s18170_s22 + $0x100] sm:$0xff] }
  0x92   : > { %v16875_v10 = vpack.c.bf16 %v773_v2, %v389_v1  ;;  %v776_v34 = vld [vmem:[%s18170_s22 + $0xd00] sm:$0x3]  ;;  %v399_v41 = vld [vmem:[%s18170_s22 + $0x138] sm:$0xff]  ;;  %v274_v61 = vld [vmem:[%s18163_s12 + $0x50] sm:$0xff] }
  0x93   : > { %v1342_v11 = vcombine.high %v1340_v3, %v1340_v3  ;;  %v783_v42 = vld [vmem:[%s18170_s22 + $0xd38] sm:$0x3]  ;;  %v16885_v44 = vpack.c.bf16 %v776_v34, %v392_v33  ;;  %v780_v52 = vld [vmem:[%s18170_s22 + $0xd20] sm:$0x3] }
  0x94   : > { %v403_v59 = vld [vmem:[%s18170_s22 + $0x158] sm:$0xff]  ;;  %v276_v34 = vld [vmem:[%s18163_s12 + $0x60] sm:$0xff] }
  0x95   : > { %3585 = vmatmul.mubr.f32.vlgmr.msra.gmra.mrb[4].mxu0 %v1265_v55  ;;  %v1324_v55 = vcombine.high %v1316_v46, %v1316_v46  ;;  %v787_v60 = vld [vmem:[%s18170_s22 + $0xd58] sm:$0x3] }
  0x96   : > { %3655 = vmatmul.mubr.f32.vlgmr.msra.gmra.mrb[4].mxu1 %v1272_v58  ;;  %16846 = vmatpush1.bf16.xpose.msra.mxu0 %v16845_v16  ;;  %v16871_v58 = vpack.c.bf16 %v771_v51, %v387_v50  ;;  %v390_v16 = vld [vmem:[%s18170_s22 + $0xf0] sm:$0xff]  ;;  %v1377_v50 = vcombine.high %v273_v43, %v273_v43  ;;  %v396_v51 = vld [vmem:[%s18170_s22 + $0x120] sm:$0xff]  ;;  %v791_v14 = vld [vmem:[%s18170_s22 + $0xd78] sm:$0x3] }
  0x97   : > { %16850 = vmatpush1.bf16.xpose.msra.mxu1 %v16849_v17  ;;  %3724 = vmatprep.mubr.f32.mxu0 %v1290_v18  ;;  %v774_v17 = vld [vmem:[%s18170_s22 + $0xcf0] sm:$0x3]  ;;  %v1350_v18 = vrot.slane %v271_v6, %v18194_v25  ;;  %v16893_v62 = vpack.c.bf16 %v780_v52, %v396_v51  ;;  %v784_v6 = vld [vmem:[%s18170_s22 + $0xd40] sm:$0x3]  ;;  %v275_v15 = vld [vmem:[%s18163_s12 + $0x58] sm:$0xff] }
  0x98   : > { %16852 = vmatprep.subr.bf16.mxu0 %v16851_v19  ;;  %3794 = vmatprep.mubr.f32.mxu1 %v1291_v20  ;;  %v393_v19 = vld [vmem:[%s18170_s22 + $0x108] sm:$0xff]  ;;  %v16881_v27 = vpack.c.bf16 %v774_v17, %v390_v16  ;;  %v795_v33 = vld [vmem:[%s18170_s22 + $0xd98] sm:$0x3] }
  0x99   : > { %16856 = vmatprep.subr.bf16.mxu1 %v16855_v21  ;;  %v777_v20 = vld [vmem:[%s18170_s22 + $0xd08] sm:$0x3]  ;;  %v1357_v21 = vrot.slane %v1343_v13, %v18194_v25  ;;  %v407_v13 = vld [vmem:[%s18170_s22 + $0x178] sm:$0xff] }
  0x9a   : > { %v16883_v29 = vpack.c.bf16 %v777_v20, %v393_v19  ;;  %v799_v51 = vld [vmem:[%s18170_s22 + $0xdb8] sm:$0x3]  ;;  %v277_v52 = vld [vmem:[%s18163_s12 + $0x68] sm:$0xff] }
  0x9b   : > { %v1359_v30 = vcombine.high %v1357_v21, %v1357_v21 }
  0x9d   : > { %3725 = vmatmul.mubr.f32.vlgmr.msra.gmra.mrb[6].mxu0 %v1282_v9  ;;  %v1341_v9 = vcombine.high %v1333_v0, %v1333_v0 }
  0x9e   : > { %3795 = vmatmul.mubr.f32.vlgmr.msra.gmra.mrb[6].mxu1 %v1289_v12  ;;  %16854 = vmatpush1.bf16.xpose.msra.mxu0 %v16853_v35  ;;  %v16879_v12 = vpack.c.bf16 %v775_v5, %v391_v4  ;;  %v394_v35 = vld [vmem:[%s18170_s22 + $0x110] sm:$0xff]  ;;  %v1394_v4 = vcombine.high %v274_v61, %v274_v61  ;;  %v400_v5 = vld [vmem:[%s18170_s22 + $0x140] sm:$0xff] }
  0x9f   : > { %16858 = vmatpush1.bf16.xpose.msra.mxu1 %v16857_v36  ;;  %3864 = vmatprep.mubr.f32.mxu0 %v1307_v37  ;;  %v778_v36 = vld [vmem:[%s18170_s22 + $0xd10] sm:$0x3]  ;;  %v1367_v37 = vrot.slane %v272_v24, %v18194_v25  ;;  %v16901_v16 = vpack.c.bf16 %v784_v6, %v400_v5  ;;  %v788_v24 = vld [vmem:[%s18170_s22 + $0xd60] sm:$0x3]  ;;  %v803_v5 = vld [vmem:[%s18170_s22 + $0xdd8] sm:$0x3] }
  0xa0   : > { %16860 = vmatprep.subr.bf16.mxu0 %v16859_v38  ;;  %3934 = vmatprep.mubr.f32.mxu1 %v1308_v39  ;;  %v397_v38 = vld [vmem:[%s18170_s22 + $0x128] sm:$0xff]  ;;  %v16889_v45 = vpack.c.bf16 %v778_v36, %v394_v35  ;;  %v278_v6 = vld [vmem:[%s18163_s12 + $0x70] sm:$0xff] }
  0xa1   : > { %16864 = vmatprep.subr.bf16.mxu1 %v16863_v40  ;;  %v781_v39 = vld [vmem:[%s18170_s22 + $0xd28] sm:$0x3]  ;;  %v1374_v40 = vrot.slane %v1360_v32, %v18194_v25  ;;  %v411_v32 = vld [vmem:[%s18170_s22 + $0x198] sm:$0xff] }
  0xa2   : > { %v16891_v47 = vpack.c.bf16 %v781_v39, %v397_v38 }
  0xa3   : > { %v1376_v48 = vcombine.high %v1374_v40, %v1374_v40 }
  0xa5   : > { %3865 = vmatmul.mubr.f32.vlgmr.msra.gmra.mrb[8].mxu0 %v1299_v28  ;;  %v1358_v28 = vcombine.high %v1350_v18, %v1350_v18 }
  0xa6   : > { %3935 = vmatmul.mubr.f32.vlgmr.msra.gmra.mrb[8].mxu1 %v1306_v31  ;;  %16862 = vmatpush1.bf16.xpose.msra.mxu0 %v16861_v53  ;;  %v16887_v31 = vpack.c.bf16 %v779_v23, %v395_v22  ;;  %v398_v53 = vld [vmem:[%s18170_s22 + $0x130] sm:$0xff]  ;;  %v1411_v22 = vcombine.high %v275_v15, %v275_v15  ;;  %v404_v23 = vld [vmem:[%s18170_s22 + $0x160] sm:$0xff] }
  0xa7   : > { %16866 = vmatpush1.bf16.xpose.msra.mxu1 %v16865_v54  ;;  %4004 = vmatprep.mubr.f32.mxu0 %v1324_v55  ;;  %v782_v54 = vld [vmem:[%s18170_s22 + $0xd30] sm:$0x3]  ;;  %v1384_v55 = vrot.slane %v273_v43, %v18194_v25  ;;  %v16909_v35 = vpack.c.bf16 %v788_v24, %v404_v23  ;;  %v792_v43 = vld [vmem:[%s18170_s22 + $0xd80] sm:$0x3]  ;;  %v807_v23 = vld [vmem:[%s18170_s22 + $0xdf8] sm:$0x3] }
  0xa8   : > { %16868 = vmatprep.subr.bf16.mxu0 %v16867_v56  ;;  %4074 = vmatprep.mubr.f32.mxu1 %v1325_v57  ;;  %v401_v56 = vld [vmem:[%s18170_s22 + $0x148] sm:$0xff]  ;;  %v16897_v63 = vpack.c.bf16 %v782_v54, %v398_v53  ;;  %v279_v24 = vld [vmem:[%s18163_s12 + $0x78] sm:$0xff] }
  0xa9   : > { %16872 = vmatprep.subr.bf16.mxu1 %v16871_v58  ;;  %v785_v57 = vld [vmem:[%s18170_s22 + $0xd48] sm:$0x3]  ;;  %v1391_v58 = vrot.slane %v1377_v50, %v18194_v25  ;;  %v415_v50 = vld [vmem:[%s18170_s22 + $0x1b8] sm:$0xff] }
  0xaa   : > { %v16899_v1 = vpack.c.bf16 %v785_v57, %v401_v56 }
  0xab   : > { %v1393_v2 = vcombine.high %v1391_v58, %v1391_v58 }
  0xad   : > { %4005 = vmatmul.mubr.f32.vlgmr.msra.gmra.mrb[10].mxu0 %v1316_v46  ;;  %v1375_v46 = vcombine.high %v1367_v37, %v1367_v37 }
  0xae   : > { %4075 = vmatmul.mubr.f32.vlgmr.msra.gmra.mrb[10].mxu1 %v1323_v49  ;;  %16870 = vmatpush1.bf16.xpose.msra.mxu0 %v16869_v7  ;;  %v16895_v49 = vpack.c.bf16 %v783_v42, %v399_v41  ;;  %v402_v7 = vld [vmem:[%s18170_s22 + $0x150] sm:$0xff]  ;;  %v1428_v41 = vcombine.high %v276_v34, %v276_v34  ;;  %v408_v42 = vld [vmem:[%s18170_s22 + $0x180] sm:$0xff] }
  0xaf   : > { %16874 = vmatpush1.bf16.xpose.msra.mxu1 %v16873_v8  ;;  %4144 = vmatprep.mubr.f32.mxu0 %v1341_v9  ;;  %v786_v8 = vld [vmem:[%s18170_s22 + $0xd50] sm:$0x3]  ;;  %v1401_v9 = vrot.slane %v274_v61, %v18194_v25  ;;  %v16917_v53 = vpack.c.bf16 %v792_v43, %v408_v42  ;;  %v796_v61 = vld [vmem:[%s18170_s22 + $0xda0] sm:$0x3]  ;;  %v811_v42 = vld [vmem:[%s18170_s22 + $0xe18] sm:$0x3] }
  0xb0   : > { %16876 = vmatprep.subr.bf16.mxu0 %v16875_v10  ;;  %4214 = vmatprep.mubr.f32.mxu1 %v1342_v11  ;;  %v405_v10 = vld [vmem:[%s18170_s22 + $0x168] sm:$0xff]  ;;  %v16905_v17 = vpack.c.bf16 %v786_v8, %v402_v7  ;;  %v280_v43 = vld [vmem:[%s18163_s12 + $0x80] sm:$0xff] }
  0xb1   : > { %16880 = vmatprep.subr.bf16.mxu1 %v16879_v12  ;;  %v789_v11 = vld [vmem:[%s18170_s22 + $0xd68] sm:$0x3]  ;;  %v1408_v12 = vrot.slane %v1394_v4, %v18194_v25  ;;  %v419_v4 = vld [vmem:[%s18170_s22 + $0x1d8] sm:$0xff] }
  0xb2   : > { %v16907_v19 = vpack.c.bf16 %v789_v11, %v405_v10 }
  0xb3   : > { %v1410_v20 = vcombine.high %v1408_v12, %v1408_v12 }
  0xb5   : > { %4145 = vmatmul.mubr.f32.vlgmr.msra.gmra.mrb[12].mxu0 %v1333_v0  ;;  %v1392_v0 = vcombine.high %v1384_v55, %v1384_v55 }
  0xb6   : > { %4215 = vmatmul.mubr.f32.vlgmr.msra.gmra.mrb[12].mxu1 %v1340_v3  ;;  %16878 = vmatpush1.bf16.xpose.msra.mxu0 %v16877_v26  ;;  %v16903_v3 = vpack.c.bf16 %v787_v60, %v403_v59  ;;  %v406_v26 = vld [vmem:[%s18170_s22 + $0x170] sm:$0xff]  ;;  %v1445_v59 = vcombine.high %v277_v52, %v277_v52  ;;  %v412_v60 = vld [vmem:[%s18170_s22 + $0x1a0] sm:$0xff] }
  0xb7   : > { %16882 = vmatpush1.bf16.xpose.msra.mxu1 %v16881_v27  ;;  %4284 = vmatprep.mubr.f32.mxu0 %v1358_v28  ;;  %v790_v27 = vld [vmem:[%s18170_s22 + $0xd70] sm:$0x3]  ;;  %v1418_v28 = vrot.slane %v275_v15, %v18194_v25  ;;  %v16925_v7 = vpack.c.bf16 %v796_v61, %v412_v60  ;;  %v800_v15 = vld [vmem:[%s18170_s22 + $0xdc0] sm:$0x3]  ;;  %v815_v60 = vld [vmem:[%s18170_s22 + $0xe38] sm:$0x3] }
  0xb8   : > { %16884 = vmatprep.subr.bf16.mxu0 %v16883_v29  ;;  %4354 = vmatprep.mubr.f32.mxu1 %v1359_v30  ;;  %v409_v29 = vld [vmem:[%s18170_s22 + $0x188] sm:$0xff]  ;;  %v16913_v36 = vpack.c.bf16 %v790_v27, %v406_v26 }
  0xb9   : > { %16888 = vmatprep.subr.bf16.mxu1 %v16887_v31  ;;  %v793_v30 = vld [vmem:[%s18170_s22 + $0xd88] sm:$0x3]  ;;  %v1425_v31 = vrot.slane %v1411_v22, %v18194_v25  ;;  %v423_v22 = vld [vmem:[%s18170_s22 + $0x1f8] sm:$0xff] }
  0xba   : > { %v16915_v38 = vpack.c.bf16 %v793_v30, %v409_v29  ;;  %v281_v61 = vld [vmem:[%s18163_s12 + $0x88] sm:$0xff] }
  0xbb   : > { %v1427_v39 = vcombine.high %v1425_v31, %v1425_v31 }
  0xbd   : > { %4285 = vmatmul.mubr.f32.vlgmr.msra.gmra.mrb[14].mxu0 %v1350_v18  ;;  %v1409_v18 = vcombine.high %v1401_v9, %v1401_v9 }
  0xbe   : > { %4355 = vmatmul.mubr.f32.vlgmr.msra.gmra.mrb[14].mxu1 %v1357_v21  ;;  %16886 = vmatpush1.bf16.xpose.msra.mxu0 %v16885_v44  ;;  %v16911_v21 = vpack.c.bf16 %v791_v14, %v407_v13  ;;  %v410_v44 = vld [vmem:[%s18170_s22 + $0x190] sm:$0xff]  ;;  %v1462_v13 = vcombine.high %v278_v6, %v278_v6  ;;  %v416_v14 = vld [vmem:[%s18170_s22 + $0x1c0] sm:$0xff] }
  0xbf   : > { %16890 = vmatpush1.bf16.xpose.msra.mxu1 %v16889_v45  ;;  %4424 = vmatprep.mubr.f32.mxu0 %v1375_v46  ;;  %v794_v45 = vld [vmem:[%s18170_s22 + $0xd90] sm:$0x3]  ;;  %v1435_v46 = vrot.slane %v276_v34, %v18194_v25  ;;  %v16933_v26 = vpack.c.bf16 %v800_v15, %v416_v14  ;;  %v804_v34 = vld [vmem:[%s18170_s22 + $0xde0] sm:$0x3]  ;;  %v819_v14 = vld [vmem:[%s18170_s22 + $0xe58] sm:$0x3] }
  0xc0   : > { %16892 = vmatprep.subr.bf16.mxu0 %v16891_v47  ;;  %4494 = vmatprep.mubr.f32.mxu1 %v1376_v48  ;;  %v413_v47 = vld [vmem:[%s18170_s22 + $0x1a8] sm:$0xff]  ;;  %v16921_v54 = vpack.c.bf16 %v794_v45, %v410_v44  ;;  %v282_v15 = vld [vmem:[%s18163_s12 + $0x90] sm:$0xff] }
  0xc1   : > { %16896 = vmatprep.subr.bf16.mxu1 %v16895_v49  ;;  %v797_v48 = vld [vmem:[%s18170_s22 + $0xda8] sm:$0x3]  ;;  %v1442_v49 = vrot.slane %v1428_v41, %v18194_v25  ;;  %v427_v41 = vld [vmem:[%s18170_s22 + $0x218] sm:$0xff] }
  0xc2   : > { %v16923_v56 = vpack.c.bf16 %v797_v48, %v413_v47 }
  0xc3   : > { %v1444_v57 = vcombine.high %v1442_v49, %v1442_v49 }
  0xc5   : > { %4425 = vmatmul.mubr.f32.vlgmr.msra.gmra.mrb[16].mxu0 %v1367_v37  ;;  %v1426_v37 = vcombine.high %v1418_v28, %v1418_v28 }
  0xc6   : > { %4495 = vmatmul.mubr.f32.vlgmr.msra.gmra.mrb[16].mxu1 %v1374_v40  ;;  %16894 = vmatpush1.bf16.xpose.msra.mxu0 %v16893_v62  ;;  %v16919_v40 = vpack.c.bf16 %v795_v33, %v411_v32  ;;  %v414_v62 = vld [vmem:[%s18170_s22 + $0x1b0] sm:$0xff]  ;;  %v1479_v32 = vcombine.high %v279_v24, %v279_v24  ;;  %v420_v33 = vld [vmem:[%s18170_s22 + $0x1e0] sm:$0xff] }
  0xc7   : > { %16898 = vmatpush1.bf16.xpose.msra.mxu1 %v16897_v63  ;;  %4564 = vmatprep.mubr.f32.mxu0 %v1392_v0  ;;  %v798_v63 = vld [vmem:[%s18170_s22 + $0xdb0] sm:$0x3]  ;;  %v1452_v0 = vrot.slane %v277_v52, %v18194_v25  ;;  %v16941_v44 = vpack.c.bf16 %v804_v34, %v420_v33  ;;  %v808_v52 = vld [vmem:[%s18170_s22 + $0xe00] sm:$0x3]  ;;  %v823_v33 = vld [vmem:[%s18170_s22 + $0xe78] sm:$0x3] }
  0xc8   : > { %16900 = vmatprep.subr.bf16.mxu0 %v16899_v1  ;;  %4634 = vmatprep.mubr.f32.mxu1 %v1393_v2  ;;  %v417_v1 = vld [vmem:[%s18170_s22 + $0x1c8] sm:$0xff]  ;;  %v16929_v8 = vpack.c.bf16 %v798_v63, %v414_v62  ;;  %v283_v34 = vld [vmem:[%s18163_s12 + $0x98] sm:$0xff] }
  0xc9   : > { %16904 = vmatprep.subr.bf16.mxu1 %v16903_v3  ;;  %v801_v2 = vld [vmem:[%s18170_s22 + $0xdc8] sm:$0x3]  ;;  %v1459_v3 = vrot.slane %v1445_v59, %v18194_v25  ;;  %v431_v59 = vld [vmem:[%s18170_s22 + $0x238] sm:$0xff] }
  0xca   : > { %v16931_v10 = vpack.c.bf16 %v801_v2, %v417_v1 }
  0xcb   : > { %v1461_v11 = vcombine.high %v1459_v3, %v1459_v3 }
  0xcd   : > { %4565 = vmatmul.mubr.f32.vlgmr.msra.gmra.mrb[18].mxu0 %v1384_v55  ;;  %v1443_v55 = vcombine.high %v1435_v46, %v1435_v46 }
  0xce   : > { %4635 = vmatmul.mubr.f32.vlgmr.msra.gmra.mrb[18].mxu1 %v1391_v58  ;;  %16902 = vmatpush1.bf16.xpose.msra.mxu0 %v16901_v16  ;;  %v16927_v58 = vpack.c.bf16 %v799_v51, %v415_v50  ;;  %v418_v16 = vld [vmem:[%s18170_s22 + $0x1d0] sm:$0xff]  ;;  %v1496_v50 = vcombine.high %v280_v43, %v280_v43  ;;  %v424_v51 = vld [vmem:[%s18170_s22 + $0x200] sm:$0xff] }
  0xcf   : > { %16906 = vmatpush1.bf16.xpose.msra.mxu1 %v16905_v17  ;;  %4704 = vmatprep.mubr.f32.mxu0 %v1409_v18  ;;  %v802_v17 = vld [vmem:[%s18170_s22 + $0xdd0] sm:$0x3]  ;;  %v1469_v18 = vrot.slane %v278_v6, %v18194_v25  ;;  %v16949_v62 = vpack.c.bf16 %v808_v52, %v424_v51  ;;  %v812_v6 = vld [vmem:[%s18170_s22 + $0xe20] sm:$0x3]  ;;  %v827_v51 = vld [vmem:[%s18170_s22 + $0xe98] sm:$0x3] }
  0xd0   : > { %16908 = vmatprep.subr.bf16.mxu0 %v16907_v19  ;;  %4774 = vmatprep.mubr.f32.mxu1 %v1410_v20  ;;  %v421_v19 = vld [vmem:[%s18170_s22 + $0x1e8] sm:$0xff]  ;;  %v16937_v27 = vpack.c.bf16 %v802_v17, %v418_v16  ;;  %v284_v52 = vld [vmem:[%s18163_s12 + $0xa0] sm:$0xff] }
  0xd1   : > { %16912 = vmatprep.subr.bf16.mxu1 %v16911_v21  ;;  %v805_v20 = vld [vmem:[%s18170_s22 + $0xde8] sm:$0x3]  ;;  %v1476_v21 = vrot.slane %v1462_v13, %v18194_v25  ;;  %v435_v13 = vld [vmem:[%s18170_s22 + $0x258] sm:$0xff] }
  0xd2   : > { %v16939_v29 = vpack.c.bf16 %v805_v20, %v421_v19 }
  0xd3   : > { %v1478_v30 = vcombine.high %v1476_v21, %v1476_v21 }
  0xd5   : > { %4705 = vmatmul.mubr.f32.vlgmr.msra.gmra.mrb[20].mxu0 %v1401_v9  ;;  %v1460_v9 = vcombine.high %v1452_v0, %v1452_v0 }
  0xd6   : > { %4775 = vmatmul.mubr.f32.vlgmr.msra.gmra.mrb[20].mxu1 %v1408_v12  ;;  %16910 = vmatpush1.bf16.xpose.msra.mxu0 %v16909_v35  ;;  %v16935_v12 = vpack.c.bf16 %v803_v5, %v419_v4  ;;  %v422_v35 = vld [vmem:[%s18170_s22 + $0x1f0] sm:$0xff]  ;;  %v1513_v4 = vcombine.high %v281_v61, %v281_v61  ;;  %v428_v5 = vld [vmem:[%s18170_s22 + $0x220] sm:$0xff] }
  0xd7   : > { %16914 = vmatpush1.bf16.xpose.msra.mxu1 %v16913_v36  ;;  %4844 = vmatprep.mubr.f32.mxu0 %v1426_v37  ;;  %v806_v36 = vld [vmem:[%s18170_s22 + $0xdf0] sm:$0x3]  ;;  %v1486_v37 = vrot.slane %v279_v24, %v18194_v25  ;;  %v16957_v16 = vpack.c.bf16 %v812_v6, %v428_v5  ;;  %v816_v24 = vld [vmem:[%s18170_s22 + $0xe40] sm:$0x3]  ;;  %v831_v5 = vld [vmem:[%s18170_s22 + $0xeb8] sm:$0x3] }
  0xd8   : > { %16916 = vmatprep.subr.bf16.mxu0 %v16915_v38  ;;  %4914 = vmatprep.mubr.f32.mxu1 %v1427_v39  ;;  %v425_v38 = vld [vmem:[%s18170_s22 + $0x208] sm:$0xff]  ;;  %v16945_v45 = vpack.c.bf16 %v806_v36, %v422_v35 }
  0xd9   : > { %16920 = vmatprep.subr.bf16.mxu1 %v16919_v40  ;;  %v809_v39 = vld [vmem:[%s18170_s22 + $0xe08] sm:$0x3]  ;;  %v1493_v40 = vrot.slane %v1479_v32, %v18194_v25  ;;  %v439_v32 = vld [vmem:[%s18170_s22 + $0x278] sm:$0xff] }
  0xda   : > { %v16947_v47 = vpack.c.bf16 %v809_v39, %v425_v38  ;;  %v285_v6 = vld [vmem:[%s18163_s12 + $0xa8] sm:$0xff] }
  0xdb   : > { %v1495_v48 = vcombine.high %v1493_v40, %v1493_v40 }
  0xdd   : > { %4845 = vmatmul.mubr.f32.vlgmr.msra.gmra.mrb[22].mxu0 %v1418_v28  ;;  %v1477_v28 = vcombine.high %v1469_v18, %v1469_v18 }
  0xde   : > { %4915 = vmatmul.mubr.f32.vlgmr.msra.gmra.mrb[22].mxu1 %v1425_v31  ;;  %16918 = vmatpush1.bf16.xpose.msra.mxu0 %v16917_v53  ;;  %v16943_v31 = vpack.c.bf16 %v807_v23, %v423_v22  ;;  %v426_v53 = vld [vmem:[%s18170_s22 + $0x210] sm:$0xff]  ;;  %v1530_v22 = vcombine.high %v282_v15, %v282_v15  ;;  %v432_v23 = vld [vmem:[%s18170_s22 + $0x240] sm:$0xff] }
  0xdf   : > { %16922 = vmatpush1.bf16.xpose.msra.mxu1 %v16921_v54  ;;  %4984 = vmatprep.mubr.f32.mxu0 %v1443_v55  ;;  %v810_v54 = vld [vmem:[%s18170_s22 + $0xe10] sm:$0x3]  ;;  %v1503_v55 = vrot.slane %v280_v43, %v18194_v25  ;;  %v16965_v35 = vpack.c.bf16 %v816_v24, %v432_v23  ;;  %v820_v43 = vld [vmem:[%s18170_s22 + $0xe60] sm:$0x3]  ;;  %v835_v23 = vld [vmem:[%s18170_s22 + $0xed8] sm:$0x3] }
  0xe0   : > { %16924 = vmatprep.subr.bf16.mxu0 %v16923_v56  ;;  %5054 = vmatprep.mubr.f32.mxu1 %v1444_v57  ;;  %v429_v56 = vld [vmem:[%s18170_s22 + $0x228] sm:$0xff]  ;;  %v16953_v63 = vpack.c.bf16 %v810_v54, %v426_v53  ;;  %v286_v24 = vld [vmem:[%s18163_s12 + $0xb0] sm:$0xff] }
  0xe1   : > { %16928 = vmatprep.subr.bf16.mxu1 %v16927_v58  ;;  %v813_v57 = vld [vmem:[%s18170_s22 + $0xe28] sm:$0x3]  ;;  %v1510_v58 = vrot.slane %v1496_v50, %v18194_v25  ;;  %v443_v50 = vld [vmem:[%s18170_s22 + $0x298] sm:$0xff] }
  0xe2   : > { %v16955_v1 = vpack.c.bf16 %v813_v57, %v429_v56 }
  0xe3   : > { %v1512_v2 = vcombine.high %v1510_v58, %v1510_v58 }
  0xe5   : > { %4985 = vmatmul.mubr.f32.vlgmr.msra.gmra.mrb[24].mxu0 %v1435_v46  ;;  %v1494_v46 = vcombine.high %v1486_v37, %v1486_v37 }
  0xe6   : > { %5055 = vmatmul.mubr.f32.vlgmr.msra.gmra.mrb[24].mxu1 %v1442_v49  ;;  %16926 = vmatpush1.bf16.xpose.msra.mxu0 %v16925_v7  ;;  %v16951_v49 = vpack.c.bf16 %v811_v42, %v427_v41  ;;  %v430_v7 = vld [vmem:[%s18170_s22 + $0x230] sm:$0xff]  ;;  %v1547_v41 = vcombine.high %v283_v34, %v283_v34  ;;  %v436_v42 = vld [vmem:[%s18170_s22 + $0x260] sm:$0xff] }
  0xe7   : > { %16930 = vmatpush1.bf16.xpose.msra.mxu1 %v16929_v8  ;;  %5124 = vmatprep.mubr.f32.mxu0 %v1460_v9  ;;  %v814_v8 = vld [vmem:[%s18170_s22 + $0xe30] sm:$0x3]  ;;  %v1520_v9 = vrot.slane %v281_v61, %v18194_v25  ;;  %v16973_v53 = vpack.c.bf16 %v820_v43, %v436_v42  ;;  %v824_v61 = vld [vmem:[%s18170_s22 + $0xe80] sm:$0x3]  ;;  %v839_v42 = vld [vmem:[%s18170_s22 + $0xef8] sm:$0x3] }
  0xe8   : > { %16932 = vmatprep.subr.bf16.mxu0 %v16931_v10  ;;  %5194 = vmatprep.mubr.f32.mxu1 %v1461_v11  ;;  %v433_v10 = vld [vmem:[%s18170_s22 + $0x248] sm:$0xff]  ;;  %v16961_v17 = vpack.c.bf16 %v814_v8, %v430_v7  ;;  %v287_v43 = vld [vmem:[%s18163_s12 + $0xb8] sm:$0xff] }
  0xe9   : > { %16936 = vmatprep.subr.bf16.mxu1 %v16935_v12  ;;  %v817_v11 = vld [vmem:[%s18170_s22 + $0xe48] sm:$0x3]  ;;  %v1527_v12 = vrot.slane %v1513_v4, %v18194_v25  ;;  %v447_v4 = vld [vmem:[%s18170_s22 + $0x2b8] sm:$0xff] }
  0xea   : > { %v16963_v19 = vpack.c.bf16 %v817_v11, %v433_v10 }
  0xeb   : > { %v1529_v20 = vcombine.high %v1527_v12, %v1527_v12 }
  0xed   : > { %5125 = vmatmul.mubr.f32.vlgmr.msra.gmra.mrb[26].mxu0 %v1452_v0  ;;  %v1511_v0 = vcombine.high %v1503_v55, %v1503_v55 }
  0xee   : > { %5195 = vmatmul.mubr.f32.vlgmr.msra.gmra.mrb[26].mxu1 %v1459_v3  ;;  %16934 = vmatpush1.bf16.xpose.msra.mxu0 %v16933_v26  ;;  %v16959_v3 = vpack.c.bf16 %v815_v60, %v431_v59  ;;  %v434_v26 = vld [vmem:[%s18170_s22 + $0x250] sm:$0xff]  ;;  %v1564_v59 = vcombine.high %v284_v52, %v284_v52  ;;  %v440_v60 = vld [vmem:[%s18170_s22 + $0x280] sm:$0xff] }
  0xef   : > { %16938 = vmatpush1.bf16.xpose.msra.mxu1 %v16937_v27  ;;  %5264 = vmatprep.mubr.f32.mxu0 %v1477_v28  ;;  %v818_v27 = vld [vmem:[%s18170_s22 + $0xe50] sm:$0x3]  ;;  %v1537_v28 = vrot.slane %v282_v15, %v18194_v25  ;;  %v16981_v7 = vpack.c.bf16 %v824_v61, %v440_v60  ;;  %v828_v15 = vld [vmem:[%s18170_s22 + $0xea0] sm:$0x3]  ;;  %v843_v60 = vld [vmem:[%s18170_s22 + $0xf18] sm:$0x3] }
  0xf0   : > { %16940 = vmatprep.subr.bf16.mxu0 %v16939_v29  ;;  %5334 = vmatprep.mubr.f32.mxu1 %v1478_v30  ;;  %v437_v29 = vld [vmem:[%s18170_s22 + $0x268] sm:$0xff]  ;;  %v16969_v36 = vpack.c.bf16 %v818_v27, %v434_v26  ;;  %v288_v61 = vld [vmem:[%s18163_s12 + $0xc0] sm:$0xff] }
  0xf1   : > { %16944 = vmatprep.subr.bf16.mxu1 %v16943_v31  ;;  %v821_v30 = vld [vmem:[%s18170_s22 + $0xe68] sm:$0x3]  ;;  %v1544_v31 = vrot.slane %v1530_v22, %v18194_v25  ;;  %v451_v22 = vld [vmem:[%s18170_s22 + $0x2d8] sm:$0xff] }
  0xf2   : > { %v16971_v38 = vpack.c.bf16 %v821_v30, %v437_v29 }
  0xf3   : > { %v1546_v39 = vcombine.high %v1544_v31, %v1544_v31 }
  0xf5   : > { %5265 = vmatmul.mubr.f32.vlgmr.msra.gmra.mrb[28].mxu0 %v1469_v18  ;;  %v1528_v18 = vcombine.high %v1520_v9, %v1520_v9 }
  0xf6   : > { %5335 = vmatmul.mubr.f32.vlgmr.msra.gmra.mrb[28].mxu1 %v1476_v21  ;;  %16942 = vmatpush1.bf16.xpose.msra.mxu0 %v16941_v44  ;;  %v16967_v21 = vpack.c.bf16 %v819_v14, %v435_v13  ;;  %v438_v44 = vld [vmem:[%s18170_s22 + $0x270] sm:$0xff]  ;;  %v1581_v13 = vcombine.high %v285_v6, %v285_v6  ;;  %v444_v14 = vld [vmem:[%s18170_s22 + $0x2a0] sm:$0xff] }
  0xf7   : > { %16946 = vmatpush1.bf16.xpose.msra.mxu1 %v16945_v45  ;;  %5404 = vmatprep.mubr.f32.mxu0 %v1494_v46  ;;  %v822_v45 = vld [vmem:[%s18170_s22 + $0xe70] sm:$0x3]  ;;  %v1554_v46 = vrot.slane %v283_v34, %v18194_v25  ;;  %v16989_v26 = vpack.c.bf16 %v828_v15, %v444_v14  ;;  %v832_v34 = vld [vmem:[%s18170_s22 + $0xec0] sm:$0x3]  ;;  %v847_v14 = vld [vmem:[%s18170_s22 + $0xf38] sm:$0x3] }
  0xf8   : > { %16948 = vmatprep.subr.bf16.mxu0 %v16947_v47  ;;  %5474 = vmatprep.mubr.f32.mxu1 %v1495_v48  ;;  %v441_v47 = vld [vmem:[%s18170_s22 + $0x288] sm:$0xff]  ;;  %v16977_v54 = vpack.c.bf16 %v822_v45, %v438_v44 }
  0xf9   : > { %16952 = vmatprep.subr.bf16.mxu1 %v16951_v49  ;;  %v825_v48 = vld [vmem:[%s18170_s22 + $0xe88] sm:$0x3]  ;;  %v1561_v49 = vrot.slane %v1547_v41, %v18194_v25  ;;  %v455_v41 = vld [vmem:[%s18170_s22 + $0x2f8] sm:$0xff] }
  0xfa   : > { %v16979_v56 = vpack.c.bf16 %v825_v48, %v441_v47  ;;  %v289_v15 = vld [vmem:[%s18163_s12 + $0xc8] sm:$0xff] }
  0xfb   : > { %v1563_v57 = vcombine.high %v1561_v49, %v1561_v49 }
  0xfd   : > { %5405 = vmatmul.mubr.f32.vlgmr.msra.gmra.mrb[30].mxu0 %v1486_v37  ;;  %v1545_v37 = vcombine.high %v1537_v28, %v1537_v28 }
  0xfe   : > { %5475 = vmatmul.mubr.f32.vlgmr.msra.gmra.mrb[30].mxu1 %v1493_v40  ;;  %16950 = vmatpush1.bf16.xpose.msra.mxu0 %v16949_v62  ;;  %v16975_v40 = vpack.c.bf16 %v823_v33, %v439_v32  ;;  %v442_v62 = vld [vmem:[%s18170_s22 + $0x290] sm:$0xff]  ;;  %v1598_v32 = vcombine.high %v286_v24, %v286_v24  ;;  %v448_v33 = vld [vmem:[%s18170_s22 + $0x2c0] sm:$0xff] }
  0xff   : > { %16954 = vmatpush1.bf16.xpose.msra.mxu1 %v16953_v63  ;;  %5544 = vmatprep.mubr.f32.mxu0 %v1511_v0  ;;  %v826_v63 = vld [vmem:[%s18170_s22 + $0xe90] sm:$0x3]  ;;  %v1571_v0 = vrot.slane %v284_v52, %v18194_v25  ;;  %v16997_v44 = vpack.c.bf16 %v832_v34, %v448_v33  ;;  %v836_v52 = vld [vmem:[%s18170_s22 + $0xee0] sm:$0x3]  ;;  %v851_v33 = vld [vmem:[%s18170_s22 + $0xf58] sm:$0x3] }
 0x100   : > { %16956 = vmatprep.subr.bf16.mxu0 %v16955_v1  ;;  %5614 = vmatprep.mubr.f32.mxu1 %v1512_v2  ;;  %v445_v1 = vld [vmem:[%s18170_s22 + $0x2a8] sm:$0xff]  ;;  %v16985_v8 = vpack.c.bf16 %v826_v63, %v442_v62  ;;  %v290_v34 = vld [vmem:[%s18163_s12 + $0xd0] sm:$0xff] }
 0x101   : > { %16960 = vmatprep.subr.bf16.mxu1 %v16959_v3  ;;  %v829_v2 = vld [vmem:[%s18170_s22 + $0xea8] sm:$0x3]  ;;  %v1578_v3 = vrot.slane %v1564_v59, %v18194_v25  ;;  %v459_v59 = vld [vmem:[%s18170_s22 + $0x318] sm:$0xff] }
 0x102   : > { %v16987_v10 = vpack.c.bf16 %v829_v2, %v445_v1 }
 0x103   : > { %v1580_v11 = vcombine.high %v1578_v3, %v1578_v3 }
 0x105   : > { %5545 = vmatmul.mubr.f32.vlgmr.msra.gmra.mrb[32].mxu0 %v1503_v55  ;;  %v1562_v55 = vcombine.high %v1554_v46, %v1554_v46 }
 0x106   : > { %5615 = vmatmul.mubr.f32.vlgmr.msra.gmra.mrb[32].mxu1 %v1510_v58  ;;  %16958 = vmatpush1.bf16.xpose.msra.mxu0 %v16957_v16  ;;  %v16983_v58 = vpack.c.bf16 %v827_v51, %v443_v50  ;;  %v446_v16 = vld [vmem:[%s18170_s22 + $0x2b0] sm:$0xff]  ;;  %v1615_v50 = vcombine.high %v287_v43, %v287_v43  ;;  %v452_v51 = vld [vmem:[%s18170_s22 + $0x2e0] sm:$0xff] }
 0x107   : > { %16962 = vmatpush1.bf16.xpose.msra.mxu1 %v16961_v17  ;;  %5684 = vmatprep.mubr.f32.mxu0 %v1528_v18  ;;  %v830_v17 = vld [vmem:[%s18170_s22 + $0xeb0] sm:$0x3]  ;;  %v1588_v18 = vrot.slane %v285_v6, %v18194_v25  ;;  %v17005_v62 = vpack.c.bf16 %v836_v52, %v452_v51  ;;  %v840_v6 = vld [vmem:[%s18170_s22 + $0xf00] sm:$0x3]  ;;  %v855_v51 = vld [vmem:[%s18170_s22 + $0xf78] sm:$0x3] }
 0x108   : > { %16964 = vmatprep.subr.bf16.mxu0 %v16963_v19  ;;  %5754 = vmatprep.mubr.f32.mxu1 %v1529_v20  ;;  %v449_v19 = vld [vmem:[%s18170_s22 + $0x2c8] sm:$0xff]  ;;  %v16993_v27 = vpack.c.bf16 %v830_v17, %v446_v16  ;;  %v291_v52 = vld [vmem:[%s18163_s12 + $0xd8] sm:$0xff] }
 0x109   : > { %16968 = vmatprep.subr.bf16.mxu1 %v16967_v21  ;;  %v833_v20 = vld [vmem:[%s18170_s22 + $0xec8] sm:$0x3]  ;;  %v1595_v21 = vrot.slane %v1581_v13, %v18194_v25  ;;  %v463_v13 = vld [vmem:[%s18170_s22 + $0x338] sm:$0xff] }
 0x10a   : > { %v16995_v29 = vpack.c.bf16 %v833_v20, %v449_v19 }
 0x10b   : > { %v1597_v30 = vcombine.high %v1595_v21, %v1595_v21 }
 0x10d   : > { %5685 = vmatmul.mubr.f32.vlgmr.msra.gmra.mrb[34].mxu0 %v1520_v9  ;;  %v1579_v9 = vcombine.high %v1571_v0, %v1571_v0 }
 0x10e   : > { %5755 = vmatmul.mubr.f32.vlgmr.msra.gmra.mrb[34].mxu1 %v1527_v12  ;;  %16966 = vmatpush1.bf16.xpose.msra.mxu0 %v16965_v35  ;;  %v16991_v12 = vpack.c.bf16 %v831_v5, %v447_v4  ;;  %v450_v35 = vld [vmem:[%s18170_s22 + $0x2d0] sm:$0xff]  ;;  %v1632_v4 = vcombine.high %v288_v61, %v288_v61  ;;  %v456_v5 = vld [vmem:[%s18170_s22 + $0x300] sm:$0xff] }
 0x10f   : > { %16970 = vmatpush1.bf16.xpose.msra.mxu1 %v16969_v36  ;;  %5824 = vmatprep.mubr.f32.mxu0 %v1545_v37  ;;  %v834_v36 = vld [vmem:[%s18170_s22 + $0xed0] sm:$0x3]  ;;  %v1605_v37 = vrot.slane %v286_v24, %v18194_v25  ;;  %v17013_v16 = vpack.c.bf16 %v840_v6, %v456_v5  ;;  %v844_v24 = vld [vmem:[%s18170_s22 + $0xf20] sm:$0x3]  ;;  %v859_v5 = vld [vmem:[%s18170_s22 + $0xf98] sm:$0x3] }
 0x110   : > { %16972 = vmatprep.subr.bf16.mxu0 %v16971_v38  ;;  %5894 = vmatprep.mubr.f32.mxu1 %v1546_v39  ;;  %v453_v38 = vld [vmem:[%s18170_s22 + $0x2e8] sm:$0xff]  ;;  %v17001_v45 = vpack.c.bf16 %v834_v36, %v450_v35  ;;  %v292_v6 = vld [vmem:[%s18163_s12 + $0xe0] sm:$0xff] }
 0x111   : > { %16976 = vmatprep.subr.bf16.mxu1 %v16975_v40  ;;  %v837_v39 = vld [vmem:[%s18170_s22 + $0xee8] sm:$0x3]  ;;  %v1612_v40 = vrot.slane %v1598_v32, %v18194_v25  ;;  %v467_v32 = vld [vmem:[%s18170_s22 + $0x358] sm:$0xff] }
 0x112   : > { %v17003_v47 = vpack.c.bf16 %v837_v39, %v453_v38 }
 0x113   : > { %v1614_v48 = vcombine.high %v1612_v40, %v1612_v40 }
 0x115   : > { %5825 = vmatmul.mubr.f32.vlgmr.msra.gmra.mrb[36].mxu0 %v1537_v28  ;;  %v1596_v28 = vcombine.high %v1588_v18, %v1588_v18 }
 0x116   : > { %5895 = vmatmul.mubr.f32.vlgmr.msra.gmra.mrb[36].mxu1 %v1544_v31  ;;  %16974 = vmatpush1.bf16.xpose.msra.mxu0 %v16973_v53  ;;  %v16999_v31 = vpack.c.bf16 %v835_v23, %v451_v22  ;;  %v454_v53 = vld [vmem:[%s18170_s22 + $0x2f0] sm:$0xff]  ;;  %v1649_v22 = vcombine.high %v289_v15, %v289_v15  ;;  %v460_v23 = vld [vmem:[%s18170_s22 + $0x320] sm:$0xff] }
 0x117   : > { %16978 = vmatpush1.bf16.xpose.msra.mxu1 %v16977_v54  ;;  %5964 = vmatprep.mubr.f32.mxu0 %v1562_v55  ;;  %v838_v54 = vld [vmem:[%s18170_s22 + $0xef0] sm:$0x3]  ;;  %v1622_v55 = vrot.slane %v287_v43, %v18194_v25  ;;  %v17021_v35 = vpack.c.bf16 %v844_v24, %v460_v23  ;;  %v848_v43 = vld [vmem:[%s18170_s22 + $0xf40] sm:$0x3] }
 0x118   : > { %16980 = vmatprep.subr.bf16.mxu0 %v16979_v56  ;;  %6034 = vmatprep.mubr.f32.mxu1 %v1563_v57  ;;  %v457_v56 = vld [vmem:[%s18170_s22 + $0x308] sm:$0xff]  ;;  %v17009_v63 = vpack.c.bf16 %v838_v54, %v454_v53 }
 0x119   : > { %16984 = vmatprep.subr.bf16.mxu1 %v16983_v58  ;;  %v841_v57 = vld [vmem:[%s18170_s22 + $0xf08] sm:$0x3]  ;;  %v1629_v58 = vrot.slane %v1615_v50, %v18194_v25  ;;  %v471_v50 = vld [vmem:[%s18170_s22 + $0x378] sm:$0xff] }
 0x11a   : > { %v17011_v1 = vpack.c.bf16 %v841_v57, %v457_v56 }
 0x11b   : > { %v1631_v2 = vcombine.high %v1629_v58, %v1629_v58 }
 0x11d   : > { %5965 = vmatmul.mubr.f32.vlgmr.msra.gmra.mrb[38].mxu0 %v1554_v46  ;;  %v1613_v46 = vcombine.high %v1605_v37, %v1605_v37 }
 0x11e   : > { %6035 = vmatmul.mubr.f32.vlgmr.msra.gmra.mrb[38].mxu1 %v1561_v49  ;;  %16982 = vmatpush1.bf16.xpose.msra.mxu0 %v16981_v7  ;;  %v17007_v49 = vpack.c.bf16 %v839_v42, %v455_v41  ;;  %v458_v7 = vld [vmem:[%s18170_s22 + $0x310] sm:$0xff]  ;;  %v1666_v41 = vcombine.high %v290_v34, %v290_v34  ;;  %v464_v42 = vld [vmem:[%s18170_s22 + $0x340] sm:$0xff] }
 0x11f   : > { %16986 = vmatpush1.bf16.xpose.msra.mxu1 %v16985_v8  ;;  %6104 = vmatprep.mubr.f32.mxu0 %v1579_v9  ;;  %v842_v8 = vld [vmem:[%s18170_s22 + $0xf10] sm:$0x3]  ;;  %v1639_v9 = vrot.slane %v288_v61, %v18194_v25  ;;  %v17029_v53 = vpack.c.bf16 %v848_v43, %v464_v42  ;;  %v852_v61 = vld [vmem:[%s18170_s22 + $0xf60] sm:$0x3] }
 0x120   : > { %16988 = vmatprep.subr.bf16.mxu0 %v16987_v10  ;;  %6174 = vmatprep.mubr.f32.mxu1 %v1580_v11  ;;  %v461_v10 = vld [vmem:[%s18170_s22 + $0x328] sm:$0xff]  ;;  %v17017_v17 = vpack.c.bf16 %v842_v8, %v458_v7 }
 0x121   : > { %16992 = vmatprep.subr.bf16.mxu1 %v16991_v12  ;;  %v845_v11 = vld [vmem:[%s18170_s22 + $0xf28] sm:$0x3]  ;;  %v1646_v12 = vrot.slane %v1632_v4, %v18194_v25  ;;  %v475_v4 = vld [vmem:[%s18170_s22 + $0x398] sm:$0xff] }
 0x122   : > { %v17019_v19 = vpack.c.bf16 %v845_v11, %v461_v10 }
 0x123   : > { %v1648_v20 = vcombine.high %v1646_v12, %v1646_v12 }
 0x125   : > { %6105 = vmatmul.mubr.f32.vlgmr.msra.gmra.mrb[40].mxu0 %v1571_v0  ;;  %v1630_v0 = vcombine.high %v1622_v55, %v1622_v55 }
 0x126   : > { %6175 = vmatmul.mubr.f32.vlgmr.msra.gmra.mrb[40].mxu1 %v1578_v3  ;;  %16990 = vmatpush1.bf16.xpose.msra.mxu0 %v16989_v26  ;;  %v17015_v3 = vpack.c.bf16 %v843_v60, %v459_v59  ;;  %v462_v26 = vld [vmem:[%s18170_s22 + $0x330] sm:$0xff]  ;;  %v1683_v59 = vcombine.high %v291_v52, %v291_v52  ;;  %v468_v60 = vld [vmem:[%s18170_s22 + $0x360] sm:$0xff] }
 0x127   : > { %16994 = vmatpush1.bf16.xpose.msra.mxu1 %v16993_v27  ;;  %6244 = vmatprep.mubr.f32.mxu0 %v1596_v28  ;;  %v846_v27 = vld [vmem:[%s18170_s22 + $0xf30] sm:$0x3]  ;;  %v1656_v28 = vrot.slane %v289_v15, %v18194_v25  ;;  %v17037_v7 = vpack.c.bf16 %v852_v61, %v468_v60  ;;  %v856_v15 = vld [vmem:[%s18170_s22 + $0xf80] sm:$0x3] }
 0x128   : > { %16996 = vmatprep.subr.bf16.mxu0 %v16995_v29  ;;  %6314 = vmatprep.mubr.f32.mxu1 %v1597_v30  ;;  %v465_v29 = vld [vmem:[%s18170_s22 + $0x348] sm:$0xff]  ;;  %v17025_v36 = vpack.c.bf16 %v846_v27, %v462_v26 }
 0x129   : > { %17000 = vmatprep.subr.bf16.mxu1 %v16999_v31  ;;  %v849_v30 = vld [vmem:[%s18170_s22 + $0xf48] sm:$0x3]  ;;  %v1663_v31 = vrot.slane %v1649_v22, %v18194_v25 }
 0x12a   : > { %v17027_v38 = vpack.c.bf16 %v849_v30, %v465_v29  ;;  %v861_v22 = vld [vmem:[%s18170_s22 + $0xfa8] sm:$0x3]  ;;  %v863_v29 = vld [vmem:[%s18170_s22 + $0xfb8] sm:$0x3] }
 0x12b   : > { %v1665_v39 = vcombine.high %v1663_v31, %v1663_v31  ;;  %v293_v30 = vld [vmem:[%s18163_s12 + $0xe8] sm:$0xff] }
 0x12c   : > { %v1724_v42 = vrot.slane %v293_v30, %v18194_v25 }
 0x12d   : > { %6245 = vmatmul.mubr.f32.vlgmr.msra.gmra.mrb[42].mxu0 %v1588_v18  ;;  %v1647_v18 = vcombine.high %v1639_v9, %v1639_v9 }
 0x12e   : > { %6315 = vmatmul.mubr.f32.vlgmr.msra.gmra.mrb[42].mxu1 %v1595_v21  ;;  %16998 = vmatpush1.bf16.xpose.msra.mxu0 %v16997_v44  ;;  %v17023_v21 = vpack.c.bf16 %v847_v14, %v463_v13  ;;  %v466_v44 = vld [vmem:[%s18170_s22 + $0x350] sm:$0xff]  ;;  %v1700_v13 = vcombine.high %v292_v6, %v292_v6  ;;  %v472_v14 = vld [vmem:[%s18170_s22 + $0x380] sm:$0xff] }
 0x12f   : > { %17002 = vmatpush1.bf16.xpose.msra.mxu1 %v17001_v45  ;;  %6384 = vmatprep.mubr.f32.mxu0 %v1613_v46  ;;  %v850_v45 = vld [vmem:[%s18170_s22 + $0xf50] sm:$0x3]  ;;  %v1673_v46 = vrot.slane %v290_v34, %v18194_v25 }
 0x130   : > { %17004 = vmatprep.subr.bf16.mxu0 %v17003_v47  ;;  %6454 = vmatprep.mubr.f32.mxu1 %v1614_v48  ;;  %v469_v47 = vld [vmem:[%s18170_s22 + $0x368] sm:$0xff]  ;;  %v17033_v54 = vpack.c.bf16 %v850_v45, %v466_v44  ;;  %v1714_v23 = vrot.slane %v1700_v13, %v18194_v25  ;;  %v295_v13 = vld [vmem:[%s18163_s12 + $0xf8] sm:$0xff] }
 0x131   : > { %17008 = vmatprep.subr.bf16.mxu1 %v17007_v49  ;;  %v853_v48 = vld [vmem:[%s18170_s22 + $0xf68] sm:$0x3]  ;;  %v1680_v49 = vrot.slane %v1666_v41, %v18194_v25  ;;  %v862_v41 = vld [vmem:[%s18170_s22 + $0xfb0] sm:$0x3] }
 0x132   : > { %v17035_v56 = vpack.c.bf16 %v853_v48, %v469_v47  ;;  %v481_v45 = vld [vmem:[%s18170_s22 + $0x3c8] sm:$0xff] }
 0x133   : > { %v1682_v57 = vcombine.high %v1680_v49, %v1680_v49 }
 0x135   : > { %6385 = vmatmul.mubr.f32.vlgmr.msra.gmra.mrb[44].mxu0 %v1605_v37  ;;  %v1664_v37 = vcombine.high %v1656_v28, %v1656_v28 }
 0x136   : > { %6455 = vmatmul.mubr.f32.vlgmr.msra.gmra.mrb[44].mxu1 %v1612_v40  ;;  %17006 = vmatpush1.bf16.xpose.msra.mxu0 %v17005_v62  ;;  %v17031_v40 = vpack.c.bf16 %v851_v33, %v467_v32  ;;  %v470_v62 = vld [vmem:[%s18170_s22 + $0x370] sm:$0xff] }
 0x137   : > { %17010 = vmatpush1.bf16.xpose.msra.mxu1 %v17009_v63  ;;  %6524 = vmatprep.mubr.f32.mxu0 %v1630_v0  ;;  %v854_v63 = vld [vmem:[%s18170_s22 + $0xf70] sm:$0x3]  ;;  %v1690_v0 = vrot.slane %v291_v52, %v18194_v25  ;;  %v867_v52 = vld [vmem:[%s18170_s22 + $0xfd8] sm:$0x3] }
 0x138   : > { %17012 = vmatprep.subr.bf16.mxu0 %v17011_v1  ;;  %6594 = vmatprep.mubr.f32.mxu1 %v1631_v2  ;;  %v473_v1 = vld [vmem:[%s18170_s22 + $0x388] sm:$0xff]  ;;  %v17041_v8 = vpack.c.bf16 %v854_v63, %v470_v62  ;;  %v480_v62 = vld [vmem:[%s18170_s22 + $0x3c0] sm:$0xff] }
 0x139   : > { %17016 = vmatprep.subr.bf16.mxu1 %v17015_v3  ;;  %v857_v2 = vld [vmem:[%s18170_s22 + $0xf88] sm:$0x3]  ;;  %v1697_v3 = vrot.slane %v1683_v59, %v18194_v25  ;;  %v864_v63 = vld [vmem:[%s18170_s22 + $0xfc0] sm:$0x3] }
 0x13a   : > { %v17043_v10 = vpack.c.bf16 %v857_v2, %v473_v1  ;;  %v866_v1 = vld [vmem:[%s18170_s22 + $0xfd0] sm:$0x3] }
 0x13b   : > { %v1699_v11 = vcombine.high %v1697_v3, %v1697_v3 }
 0x13d   : > { %6525 = vmatmul.mubr.f32.vlgmr.msra.gmra.mrb[46].mxu0 %v1622_v55  ;;  %v1681_v55 = vcombine.high %v1673_v46, %v1673_v46 }
 0x13e   : > { %6595 = vmatmul.mubr.f32.vlgmr.msra.gmra.mrb[46].mxu1 %v1629_v58  ;;  %17014 = vmatpush1.bf16.xpose.msra.mxu0 %v17013_v16  ;;  %v17039_v58 = vpack.c.bf16 %v855_v51, %v471_v50  ;;  %v474_v16 = vld [vmem:[%s18170_s22 + $0x390] sm:$0xff]  ;;  %v483_v51 = vld [vmem:[%s18170_s22 + $0x3d8] sm:$0xff] }
 0x13f   : > { %17018 = vmatpush1.bf16.xpose.msra.mxu1 %v17017_v17  ;;  %6664 = vmatprep.mubr.f32.mxu0 %v1647_v18  ;;  %v858_v17 = vld [vmem:[%s18170_s22 + $0xf90] sm:$0x3]  ;;  %v1707_v18 = vrot.slane %v292_v6, %v18194_v25  ;;  %v17063_v60 = vpack.c.bf16 %v867_v52, %v483_v51  ;;  %v869_v6 = vld [vmem:[%s18170_s22 + $0xfe8] sm:$0x3] }
 0x140   : > { %17020 = vmatprep.subr.bf16.mxu0 %v17019_v19  ;;  %6734 = vmatprep.mubr.f32.mxu1 %v1648_v20  ;;  %v17049_v32 = vpack.c.bf16 %v858_v17, %v474_v16 }
 0x141   : > { %17024 = vmatprep.subr.bf16.mxu1 %v17023_v21  ;;  %v477_v21 = vld [vmem:[%s18170_s22 + $0x3a8] sm:$0xff]  ;;  %v1715_v33 = vcombine.high %v1707_v18, %v1707_v18 }
 0x142   : > { %v17051_v34 = vpack.c.bf16 %v861_v22, %v477_v21  ;;  %v1751_v21 = vcombine.high %v295_v13, %v295_v13  ;;  %v484_v22 = vld [vmem:[%s18170_s22 + $0x3e0] sm:$0xff] }
 0x145   : > { %6665 = vmatmul.mubr.f32.vlgmr.msra.gmra.mrb[48].mxu0 %v1639_v9  ;;  %v1698_v9 = vcombine.high %v1690_v0, %v1690_v0 }
 0x146   : > { %6735 = vmatmul.mubr.f32.vlgmr.msra.gmra.mrb[48].mxu1 %v1646_v12  ;;  %17022 = vmatpush1.bf16.xpose.msra.mxu0 %v17021_v35  ;;  %v17047_v12 = vpack.c.bf16 %v859_v5, %v475_v4  ;;  %v1716_v35 = vcombine.high %v1714_v23, %v1714_v23  ;;  %v485_v5 = vld [vmem:[%s18170_s22 + $0x3e8] sm:$0xff] }
 0x147   : > { %17026 = vmatpush1.bf16.xpose.msra.mxu1 %v17025_v36  ;;  %6804 = vmatprep.mubr.f32.mxu0 %v1664_v37  ;;  %v1717_v37 = vcombine.high %v293_v30, %v293_v30  ;;  %v489_v30 = vld [vmem:[%s18170_s22 + $0x408] sm:$0xff] }
 0x148   : > { %17028 = vmatprep.subr.bf16.mxu0 %v17027_v38  ;;  %6874 = vmatprep.mubr.f32.mxu1 %v1665_v39  ;;  %v476_v38 = vld [vmem:[%s18170_s22 + $0x3a0] sm:$0xff] }
 0x149   : > { %17032 = vmatprep.subr.bf16.mxu1 %v17031_v40  ;;  %v860_v39 = vld [vmem:[%s18170_s22 + $0xfa0] sm:$0x3]  ;;  %v478_v40 = vld [vmem:[%s18170_s22 + $0x3b0] sm:$0xff]  ;;  %v1731_v47 = vrot.slane %v1717_v37, %v18194_v25  ;;  %v875_v37 = vld [vmem:[%s18170_s22 + $0x1018] sm:$0x3] }
 0x14b   : > { %v1733_v59 = vcombine.high %v1731_v47, %v1731_v47 }
 0x14d   : > { %6805 = vmatmul.mubr.f32.vlgmr.msra.gmra.mrb[50].mxu0 %v1656_v28  ;;  %v479_v28 = vld [vmem:[%s18170_s22 + $0x3b8] sm:$0xff] }
 0x14e   : > { %6875 = vmatmul.mubr.f32.vlgmr.msra.gmra.mrb[50].mxu1 %v1663_v31  ;;  %17030 = vmatpush1.bf16.xpose.msra.mxu0 %v17029_v53  ;;  %v17045_v31 = vpack.c.bf16 %v856_v15, %v472_v14  ;;  %v17055_v36 = vpack.c.bf16 %v863_v29, %v479_v28  ;;  %v294_v53 = vld [vmem:[%s18163_s12 + $0xf0] sm:$0xff]  ;;  %v17061_v14 = vpack.c.bf16 %v864_v63, %v480_v62  ;;  %v297_v62 = vld [vmem:[%s18163_s12 + $0x108] sm:$0xff] }
 0x14f   : > { %17034 = vmatpush1.bf16.xpose.msra.mxu1 %v17033_v54  ;;  %6944 = vmatprep.mubr.f32.mxu0 %v1681_v55  ;;  %v17053_v54 = vpack.c.bf16 %v860_v39, %v476_v38  ;;  %v17057_v55 = vpack.c.bf16 %v862_v41, %v478_v40  ;;  %v1734_v61 = vcombine.high %v294_v53, %v294_v53  ;;  %v296_v38 = vld [vmem:[%s18163_s12 + $0x100] sm:$0xff] }
 0x150   : > { %17036 = vmatprep.subr.bf16.mxu0 %v17035_v56  ;;  %7014 = vmatprep.mubr.f32.mxu1 %v1682_v57  ;;  %v1732_v57 = vcombine.high %v1724_v42, %v1724_v42  ;;  %v1741_v2 = vrot.slane %v294_v53, %v18194_v25  ;;  %v1775_v51 = vrot.slane %v296_v38, %v18194_v25 }
 0x151   : > { %17040 = vmatprep.subr.bf16.mxu1 %v17039_v58 }
 0x152   : > { %v1749_v17 = vcombine.high %v1741_v2, %v1741_v2 }
 0x155   : > { %6945 = vmatmul.mubr.f32.vlgmr.msra.gmra.mrb[52].mxu0 %v1673_v46  ;;  %v865_v46 = vld [vmem:[%s18170_s22 + $0xfc8] sm:$0x3] }
 0x156   : > { %7015 = vmatmul.mubr.f32.vlgmr.msra.gmra.mrb[52].mxu1 %v1680_v49  ;;  %17038 = vmatpush1.bf16.xpose.msra.mxu0 %v17037_v7  ;;  %v17059_v58 = vpack.c.bf16 %v865_v46, %v481_v45  ;;  %v1748_v7 = vrot.slane %v1734_v61, %v18194_v25  ;;  %v1768_v46 = vcombine.high %v296_v38, %v296_v38  ;;  %v879_v61 = vld [vmem:[%s18170_s22 + $0x1038] sm:$0x3] }
 0x157   : > { %17042 = vmatpush1.bf16.xpose.msra.mxu1 %v17041_v8  ;;  %7084 = vmatprep.mubr.f32.mxu0 %v1698_v9 }
 0x158   : > { %17044 = vmatprep.subr.bf16.mxu0 %v17043_v10  ;;  %v3306_v19 = vpop.f32.mrb[0].mxu0  ;;  %7154 = vmatprep.mubr.f32.mxu1 %v1699_v11  ;;  %v487_v11 = vld [vmem:[%s18170_s22 + $0x3f8] sm:$0xff] }
 0x159   : > { %v3376_v20 = vpop.f32.mrb[0].mxu1  ;;  %17048 = vmatprep.subr.bf16.mxu1 %v17047_v12  ;;  %v3308_v26 = vpop.f32.mrb[1].mxu0  ;;  %v871_v12 = vld [vmem:[%s18170_s22 + $0xff8] sm:$0x3] }
 0x15a   : > { %v3377_v24 = vadd.f32 %v3376_v20, %v3306_v19  ;;  %v3378_v27 = vpop.f32.mrb[1].mxu1  ;;  %v1750_v19 = vcombine.high %v1748_v7, %v1748_v7  ;;  %v17071_v20 = vpack.c.bf16 %v871_v12, %v487_v11  ;;  %v870_v26 = vld [vmem:[%s18170_s22 + $0xff0] sm:$0x3]  ;;  %v1792_v11 = vrot.slane %v297_v62, %v18194_v25 }
 0x15b   : > { %v1758_v27 = vrot.slane %v295_v13, %v18194_v25 }
 0x15d   : > { %7085 = vmatmul.mubr.f32.vlgmr.msra.gmra.mrb[54].mxu0 %v1690_v0  ;;  %v482_v0 = vld [vmem:[%s18170_s22 + $0x3d0] sm:$0xff] }
 0x15e   : > { %7155 = vmatmul.mubr.f32.vlgmr.msra.gmra.mrb[54].mxu1 %v1697_v3  ;;  %17046 = vmatpush1.bf16.xpose.msra.mxu0 %v17045_v31  ;;  %v17065_v15 = vpack.c.bf16 %v866_v1, %v482_v0  ;;  %v873_v31 = vld [vmem:[%s18170_s22 + $0x1008] sm:$0x3] }
 0x15f   : > { %17050 = vmatpush1.bf16.xpose.msra.mxu1 %v17049_v32  ;;  %7224 = vmatprep.mubr.f32.mxu0 %v1715_v33  ;;  %v1765_v32 = vrot.slane %v1751_v21, %v18194_v25  ;;  %v883_v21 = vld [vmem:[%s18170_s22 + $0x1058] sm:$0x3] }
 0x160   : > { %17052 = vmatprep.subr.bf16.mxu0 %v17051_v34  ;;  %v3446_v43 = vpop.f32.mrb[2].mxu0  ;;  %7294 = vmatprep.mubr.f32.mxu1 %v1716_v35 }
 0x161   : > { %v3516_v44 = vpop.f32.mrb[2].mxu1  ;;  %17056 = vmatprep.subr.bf16.mxu1 %v17055_v36  ;;  %v3447_v48 = vadd.f32 %v3446_v43, %v3377_v24  ;;  %v3448_v49 = vpop.f32.mrb[3].mxu0  ;;  %v486_v24 = vld [vmem:[%s18170_s22 + $0x3f0] sm:$0xff]  ;;  %v491_v36 = vld [vmem:[%s18170_s22 + $0x418] sm:$0xff]  ;;  %v17075_v43 = vpack.c.bf16 %v873_v31, %v489_v30 }
 0x162   : > { %v3518_v50 = vpop.f32.mrb[3].mxu1  ;;  %v17073_v40 = vpack.c.bf16 %v870_v26, %v486_v24  ;;  %v17079_v45 = vpack.c.bf16 %v875_v37, %v491_v36  ;;  %v490_v49 = vld [vmem:[%s18170_s22 + $0x410] sm:$0xff] }
 0x163   : > { %v3517_v56 = vadd.f32 %v3516_v44, %v3447_v48  ;;  %v1767_v44 = vcombine.high %v1765_v32, %v1765_v32  ;;  %v872_v48 = vld [vmem:[%s18170_s22 + $0x1000] sm:$0x3]  ;;  %v874_v50 = vld [vmem:[%s18170_s22 + $0x1010] sm:$0x3] }
 0x164   : > { %v17081_v0 = vpack.c.bf16 %v874_v50, %v490_v49 }
 0x165   : > { %7225 = vmatmul.mubr.f32.vlgmr.msra.gmra.mrb[56].mxu0 %v1707_v18  ;;  %v17067_v18 = vpack.c.bf16 %v869_v6, %v485_v5  ;;  %v1785_v6 = vcombine.high %v297_v62, %v297_v62 }
 0x166   : > { %7295 = vmatmul.mubr.f32.vlgmr.msra.gmra.mrb[56].mxu1 %v1714_v23  ;;  %17054 = vmatpush1.bf16.xpose.msra.mxu0 %v17053_v54  ;;  %v868_v23 = vld [vmem:[%s18170_s22 + $0xfe0] sm:$0x3]  ;;  %v493_v54 = vld [vmem:[%s18170_s22 + $0x428] sm:$0xff] }
 0x167   : > { %17058 = vmatpush1.bf16.xpose.msra.mxu1 %v17057_v55  ;;  %7364 = vmatprep.mubr.f32.mxu0 %v1732_v57  ;;  %v17069_v39 = vpack.c.bf16 %v868_v23, %v484_v22  ;;  %v877_v55 = vld [vmem:[%s18170_s22 + $0x1028] sm:$0x3]  ;;  %v298_v22 = vld [vmem:[%s18163_s12 + $0x110] sm:$0xff] }
 0x168   : > { %17060 = vmatprep.subr.bf16.mxu0 %v17059_v58  ;;  %v3586_v3 = vpop.f32.mrb[4].mxu0  ;;  %7434 = vmatprep.mubr.f32.mxu1 %v1733_v59  ;;  %v1802_v31 = vcombine.high %v298_v22, %v298_v22  ;;  %v1809_v36 = vrot.slane %v298_v22, %v18194_v25 }
 0x169   : > { %v3656_v4 = vpop.f32.mrb[4].mxu1  ;;  %17064 = vmatprep.subr.bf16.mxu1 %v17063_v60  ;;  %v3587_v8 = vadd.f32 %v3586_v3, %v3517_v56  ;;  %v3588_v9 = vpop.f32.mrb[5].mxu0  ;;  %v1782_v56 = vrot.slane %v1768_v46, %v18194_v25  ;;  %v495_v60 = vld [vmem:[%s18170_s22 + $0x438] sm:$0xff]  ;;  %v17083_v3 = vpack.c.bf16 %v877_v55, %v493_v54 }
 0x16a   : > { %v3658_v10 = vpop.f32.mrb[5].mxu1  ;;  %v17087_v5 = vpack.c.bf16 %v879_v61, %v495_v60  ;;  %v494_v9 = vld [vmem:[%s18170_s22 + $0x430] sm:$0xff]  ;;  %v887_v46 = vld [vmem:[%s18170_s22 + $0x1078] sm:$0x3] }
 0x16b   : > { %v3657_v16 = vadd.f32 %v3656_v4, %v3587_v8  ;;  %v1784_v4 = vcombine.high %v1782_v56, %v1782_v56  ;;  %v876_v8 = vld [vmem:[%s18170_s22 + $0x1020] sm:$0x3]  ;;  %v878_v10 = vld [vmem:[%s18170_s22 + $0x1030] sm:$0x3] }
 0x16c   : > { %v17089_v24 = vpack.c.bf16 %v878_v10, %v494_v9 }
 0x16d   : > { %7365 = vmatmul.mubr.f32.vlgmr.msra.gmra.mrb[58].mxu0 %v1724_v42  ;;  %v1766_v42 = vcombine.high %v1758_v27, %v1758_v27 }
 0x16e   : > { %7435 = vmatmul.mubr.f32.vlgmr.msra.gmra.mrb[58].mxu1 %v1731_v47  ;;  %17062 = vmatpush1.bf16.xpose.msra.mxu0 %v17061_v14  ;;  %v488_v47 = vld [vmem:[%s18170_s22 + $0x400] sm:$0xff]  ;;  %v497_v14 = vld [vmem:[%s18170_s22 + $0x448] sm:$0xff] }
 0x16f   : > { %17066 = vmatpush1.bf16.xpose.msra.mxu1 %v17065_v15  ;;  %7504 = vmatprep.mubr.f32.mxu0 %v1749_v17  ;;  %v17077_v63 = vpack.c.bf16 %v872_v48, %v488_v47  ;;  %v881_v15 = vld [vmem:[%s18170_s22 + $0x1048] sm:$0x3]  ;;  %v299_v47 = vld [vmem:[%s18163_s12 + $0x118] sm:$0xff] }
 0x170   : > { %17068 = vmatprep.subr.bf16.mxu0 %v17067_v18  ;;  %v3726_v28 = vpop.f32.mrb[6].mxu0  ;;  %7574 = vmatprep.mubr.f32.mxu1 %v1750_v19  ;;  %v1819_v55 = vcombine.high %v299_v47, %v299_v47  ;;  %v1826_v60 = vrot.slane %v299_v47, %v18194_v25 }
 0x171   : > { %v3796_v29 = vpop.f32.mrb[6].mxu1  ;;  %17072 = vmatprep.subr.bf16.mxu1 %v17071_v20  ;;  %v3727_v33 = vadd.f32 %v3726_v28, %v3657_v16  ;;  %v3728_v34 = vpop.f32.mrb[7].mxu0  ;;  %v1799_v16 = vrot.slane %v1785_v6, %v18194_v25  ;;  %v499_v20 = vld [vmem:[%s18170_s22 + $0x458] sm:$0xff]  ;;  %v17091_v28 = vpack.c.bf16 %v881_v15, %v497_v14 }
 0x172   : > { %v3798_v35 = vpop.f32.mrb[7].mxu1  ;;  %v17095_v30 = vpack.c.bf16 %v883_v21, %v499_v20  ;;  %v498_v34 = vld [vmem:[%s18170_s22 + $0x450] sm:$0xff]  ;;  %v891_v6 = vld [vmem:[%s18170_s22 + $0x1098] sm:$0x3] }
 0x173   : > { %v3797_v41 = vadd.f32 %v3796_v29, %v3727_v33  ;;  %v1801_v29 = vcombine.high %v1799_v16, %v1799_v16  ;;  %v880_v33 = vld [vmem:[%s18170_s22 + $0x1040] sm:$0x3]  ;;  %v882_v35 = vld [vmem:[%s18170_s22 + $0x1050] sm:$0x3] }
 0x174   : > { %v17097_v49 = vpack.c.bf16 %v882_v35, %v498_v34 }
 0x175   : > { %7505 = vmatmul.mubr.f32.vlgmr.msra.gmra.mrb[60].mxu0 %v1741_v2  ;;  %v1783_v2 = vcombine.high %v1775_v51, %v1775_v51 }
 0x176   : > { %7575 = vmatmul.mubr.f32.vlgmr.msra.gmra.mrb[60].mxu1 %v1748_v7  ;;  %17070 = vmatpush1.bf16.xpose.msra.mxu0 %v17069_v39  ;;  %v492_v7 = vld [vmem:[%s18170_s22 + $0x420] sm:$0xff]  ;;  %v501_v39 = vld [vmem:[%s18170_s22 + $0x468] sm:$0xff] }
 0x177   : > { %17074 = vmatpush1.bf16.xpose.msra.mxu1 %v17073_v40  ;;  %7644 = vmatprep.mubr.f32.mxu0 %v1766_v42  ;;  %v17085_v23 = vpack.c.bf16 %v876_v8, %v492_v7  ;;  %v885_v40 = vld [vmem:[%s18170_s22 + $0x1068] sm:$0x3]  ;;  %v300_v7 = vld [vmem:[%s18163_s12 + $0x120] sm:$0xff] }
 0x178   : > { %17076 = vmatprep.subr.bf16.mxu0 %v17075_v43  ;;  %v3866_v52 = vpop.f32.mrb[8].mxu0  ;;  %7714 = vmatprep.mubr.f32.mxu1 %v1767_v44  ;;  %v1836_v15 = vcombine.high %v300_v7, %v300_v7  ;;  %v1843_v20 = vrot.slane %v300_v7, %v18194_v25 }
 0x179   : > { %v3936_v53 = vpop.f32.mrb[8].mxu1  ;;  %17080 = vmatprep.subr.bf16.mxu1 %v17079_v45  ;;  %v3867_v57 = vadd.f32 %v3866_v52, %v3797_v41  ;;  %v3868_v58 = vpop.f32.mrb[9].mxu0  ;;  %v1816_v41 = vrot.slane %v1802_v31, %v18194_v25  ;;  %v503_v45 = vld [vmem:[%s18170_s22 + $0x478] sm:$0xff]  ;;  %v17099_v52 = vpack.c.bf16 %v885_v40, %v501_v39 }
 0x17a   : > { %v3938_v59 = vpop.f32.mrb[9].mxu1  ;;  %v17103_v54 = vpack.c.bf16 %v887_v46, %v503_v45  ;;  %v502_v58 = vld [vmem:[%s18170_s22 + $0x470] sm:$0xff]  ;;  %v895_v31 = vld [vmem:[%s18170_s22 + $0x10b8] sm:$0x3] }
 0x17b   : > { %v3937_v1 = vadd.f32 %v3936_v53, %v3867_v57  ;;  %v1818_v53 = vcombine.high %v1816_v41, %v1816_v41  ;;  %v884_v57 = vld [vmem:[%s18170_s22 + $0x1060] sm:$0x3]  ;;  %v886_v59 = vld [vmem:[%s18170_s22 + $0x1070] sm:$0x3] }
 0x17c   : > { %v17105_v9 = vpack.c.bf16 %v886_v59, %v502_v58 }
 0x17d   : > { %7645 = vmatmul.mubr.f32.vlgmr.msra.gmra.mrb[62].mxu0 %v1758_v27  ;;  %v1800_v27 = vcombine.high %v1792_v11, %v1792_v11 }
 0x17e   : > { %7715 = vmatmul.mubr.f32.vlgmr.msra.gmra.mrb[62].mxu1 %v1765_v32  ;;  %17078 = vmatpush1.bf16.xpose.msra.mxu0 %v17077_v63  ;;  %v496_v32 = vld [vmem:[%s18170_s22 + $0x440] sm:$0xff]  ;;  %v505_v63 = vld [vmem:[%s18170_s22 + $0x488] sm:$0xff] }
 0x17f   : > { %17082 = vmatpush1.bf16.xpose.msra.mxu1 %v17081_v0  ;;  %7784 = vmatprep.mubr.f32.mxu0 %v1783_v2  ;;  %v17093_v48 = vpack.c.bf16 %v880_v33, %v496_v32  ;;  %v889_v0 = vld [vmem:[%s18170_s22 + $0x1088] sm:$0x3] }
 0x180   : > { %17084 = vmatprep.subr.bf16.mxu0 %v17083_v3  ;;  %v4006_v12 = vpop.f32.mrb[10].mxu0  ;;  %7854 = vmatprep.mubr.f32.mxu1 %v1784_v4  ;;  %v301_v32 = vld [vmem:[%s18163_s12 + $0x128] sm:$0xff] }
 0x181   : > { %v4076_v13 = vpop.f32.mrb[10].mxu1  ;;  %17088 = vmatprep.subr.bf16.mxu1 %v17087_v5  ;;  %v4007_v17 = vadd.f32 %v4006_v12, %v3937_v1  ;;  %v4008_v18 = vpop.f32.mrb[11].mxu0  ;;  %v1833_v1 = vrot.slane %v1819_v55, %v18194_v25  ;;  %v507_v5 = vld [vmem:[%s18170_s22 + $0x498] sm:$0xff]  ;;  %v17107_v12 = vpack.c.bf16 %v889_v0, %v505_v63  ;;  %v1853_v40 = vcombine.high %v301_v32, %v301_v32 }
 0x182   : > { %v4078_v19 = vpop.f32.mrb[11].mxu1  ;;  %v17111_v14 = vpack.c.bf16 %v891_v6, %v507_v5  ;;  %v506_v18 = vld [vmem:[%s18170_s22 + $0x490] sm:$0xff]  ;;  %v1860_v45 = vrot.slane %v301_v32, %v18194_v25  ;;  %v899_v55 = vld [vmem:[%s18170_s22 + $0x10d8] sm:$0x3] }
 0x183   : > { %v4077_v26 = vadd.f32 %v4076_v13, %v4007_v17  ;;  %v1835_v13 = vcombine.high %v1833_v1, %v1833_v1  ;;  %v888_v17 = vld [vmem:[%s18170_s22 + $0x1080] sm:$0x3]  ;;  %v890_v19 = vld [vmem:[%s18170_s22 + $0x1090] sm:$0x3] }
 0x184   : > { %v17113_v34 = vpack.c.bf16 %v890_v19, %v506_v18 }
 0x185   : > { %7785 = vmatmul.mubr.f32.vlgmr.msra.gmra.mrb[64].mxu0 %v1775_v51  ;;  %v1817_v51 = vcombine.high %v1809_v36, %v1809_v36 }
 0x186   : > { %7855 = vmatmul.mubr.f32.vlgmr.msra.gmra.mrb[64].mxu1 %v1782_v56  ;;  %17086 = vmatpush1.bf16.xpose.msra.mxu0 %v17085_v23  ;;  %v500_v56 = vld [vmem:[%s18170_s22 + $0x460] sm:$0xff]  ;;  %v509_v23 = vld [vmem:[%s18170_s22 + $0x4a8] sm:$0xff] }
 0x187   : > { %17090 = vmatpush1.bf16.xpose.msra.mxu1 %v17089_v24  ;;  %7924 = vmatprep.mubr.f32.mxu0 %v1800_v27  ;;  %v17101_v8 = vpack.c.bf16 %v884_v57, %v500_v56  ;;  %v893_v24 = vld [vmem:[%s18170_s22 + $0x10a8] sm:$0x3]  ;;  %v302_v56 = vld [vmem:[%s18163_s12 + $0x130] sm:$0xff] }
 0x188   : > { %17092 = vmatprep.subr.bf16.mxu0 %v17091_v28  ;;  %v4146_v37 = vpop.f32.mrb[12].mxu0  ;;  %7994 = vmatprep.mubr.f32.mxu1 %v1801_v29  ;;  %v1870_v0 = vcombine.high %v302_v56, %v302_v56  ;;  %v1877_v5 = vrot.slane %v302_v56, %v18194_v25 }
 0x189   : > { %v4216_v38 = vpop.f32.mrb[12].mxu1  ;;  %17096 = vmatprep.subr.bf16.mxu1 %v17095_v30  ;;  %v4147_v42 = vadd.f32 %v4146_v37, %v4077_v26  ;;  %v4148_v43 = vpop.f32.mrb[13].mxu0  ;;  %v1850_v26 = vrot.slane %v1836_v15, %v18194_v25  ;;  %v511_v30 = vld [vmem:[%s18170_s22 + $0x4b8] sm:$0xff]  ;;  %v17115_v37 = vpack.c.bf16 %v893_v24, %v509_v23 }
 0x18a   : > { %v4218_v44 = vpop.f32.mrb[13].mxu1  ;;  %v17119_v39 = vpack.c.bf16 %v895_v31, %v511_v30  ;;  %v510_v43 = vld [vmem:[%s18170_s22 + $0x4b0] sm:$0xff]  ;;  %v903_v15 = vld [vmem:[%s18170_s22 + $0x10f8] sm:$0x3] }
 0x18b   : > { %v4217_v50 = vadd.f32 %v4216_v38, %v4147_v42  ;;  %v1852_v38 = vcombine.high %v1850_v26, %v1850_v26  ;;  %v892_v42 = vld [vmem:[%s18170_s22 + $0x10a0] sm:$0x3]  ;;  %v894_v44 = vld [vmem:[%s18170_s22 + $0x10b0] sm:$0x3] }
 0x18c   : > { %v17121_v58 = vpack.c.bf16 %v894_v44, %v510_v43 }
 0x18d   : > { %7925 = vmatmul.mubr.f32.vlgmr.msra.gmra.mrb[66].mxu0 %v1792_v11  ;;  %v1834_v11 = vcombine.high %v1826_v60, %v1826_v60 }
 0x18e   : > { %7995 = vmatmul.mubr.f32.vlgmr.msra.gmra.mrb[66].mxu1 %v1799_v16  ;;  %17094 = vmatpush1.bf16.xpose.msra.mxu0 %v17093_v48  ;;  %v504_v16 = vld [vmem:[%s18170_s22 + $0x480] sm:$0xff]  ;;  %v513_v48 = vld [vmem:[%s18170_s22 + $0x4c8] sm:$0xff] }
 0x18f   : > { %17098 = vmatpush1.bf16.xpose.msra.mxu1 %v17097_v49  ;;  %8064 = vmatprep.mubr.f32.mxu0 %v1817_v51  ;;  %v17109_v33 = vpack.c.bf16 %v888_v17, %v504_v16  ;;  %v897_v49 = vld [vmem:[%s18170_s22 + $0x10c8] sm:$0x3]  ;;  %v303_v16 = vld [vmem:[%s18163_s12 + $0x138] sm:$0xff] }
 0x190   : > { %17100 = vmatprep.subr.bf16.mxu0 %v17099_v52  ;;  %v4286_v61 = vpop.f32.mrb[14].mxu0  ;;  %8134 = vmatprep.mubr.f32.mxu1 %v1818_v53  ;;  %v1887_v24 = vcombine.high %v303_v16, %v303_v16  ;;  %v1894_v30 = vrot.slane %v303_v16, %v18194_v25 }
 0x191   : > { %v4356_v62 = vpop.f32.mrb[14].mxu1  ;;  %17104 = vmatprep.subr.bf16.mxu1 %v17103_v54  ;;  %v4287_v2 = vadd.f32 %v4286_v61, %v4217_v50  ;;  %v4288_v3 = vpop.f32.mrb[15].mxu0  ;;  %v1867_v50 = vrot.slane %v1853_v40, %v18194_v25  ;;  %v515_v54 = vld [vmem:[%s18170_s22 + $0x4d8] sm:$0xff]  ;;  %v17123_v61 = vpack.c.bf16 %v897_v49, %v513_v48 }
 0x192   : > { %v4358_v4 = vpop.f32.mrb[15].mxu1  ;;  %v17127_v63 = vpack.c.bf16 %v899_v55, %v515_v54  ;;  %v514_v3 = vld [vmem:[%s18170_s22 + $0x4d0] sm:$0xff]  ;;  %v907_v40 = vld [vmem:[%s18170_s22 + $0x1118] sm:$0x3] }
 0x193   : > { %v4357_v10 = vadd.f32 %v4356_v62, %v4287_v2  ;;  %v1869_v62 = vcombine.high %v1867_v50, %v1867_v50  ;;  %v896_v2 = vld [vmem:[%s18170_s22 + $0x10c0] sm:$0x3]  ;;  %v898_v4 = vld [vmem:[%s18170_s22 + $0x10d0] sm:$0x3] }
 0x194   : > { %v17129_v18 = vpack.c.bf16 %v898_v4, %v514_v3 }
 0x195   : > { %8065 = vmatmul.mubr.f32.vlgmr.msra.gmra.mrb[68].mxu0 %v1809_v36  ;;  %v1851_v36 = vcombine.high %v1843_v20, %v1843_v20 }
 0x196   : > { %8135 = vmatmul.mubr.f32.vlgmr.msra.gmra.mrb[68].mxu1 %v1816_v41  ;;  %17102 = vmatpush1.bf16.xpose.msra.mxu0 %v17101_v8  ;;  %v508_v41 = vld [vmem:[%s18170_s22 + $0x4a0] sm:$0xff]  ;;  %v517_v8 = vld [vmem:[%s18170_s22 + $0x4e8] sm:$0xff] }
 0x197   : > { %17106 = vmatpush1.bf16.xpose.msra.mxu1 %v17105_v9  ;;  %8204 = vmatprep.mubr.f32.mxu0 %v1834_v11  ;;  %v17117_v57 = vpack.c.bf16 %v892_v42, %v508_v41  ;;  %v901_v9 = vld [vmem:[%s18170_s22 + $0x10e8] sm:$0x3]  ;;  %v304_v41 = vld [vmem:[%s18163_s12 + $0x140] sm:$0xff] }
 0x198   : > { %17108 = vmatprep.subr.bf16.mxu0 %v17107_v12  ;;  %v4426_v21 = vpop.f32.mrb[16].mxu0  ;;  %8274 = vmatprep.mubr.f32.mxu1 %v1835_v13  ;;  %v1904_v49 = vcombine.high %v304_v41, %v304_v41  ;;  %v1911_v54 = vrot.slane %v304_v41, %v18194_v25 }
 0x199   : > { %v4496_v22 = vpop.f32.mrb[16].mxu1  ;;  %17112 = vmatprep.subr.bf16.mxu1 %v17111_v14  ;;  %v4427_v27 = vadd.f32 %v4426_v21, %v4357_v10  ;;  %v4428_v28 = vpop.f32.mrb[17].mxu0  ;;  %v1884_v10 = vrot.slane %v1870_v0, %v18194_v25  ;;  %v519_v14 = vld [vmem:[%s18170_s22 + $0x4f8] sm:$0xff]  ;;  %v17131_v21 = vpack.c.bf16 %v901_v9, %v517_v8 }
 0x19a   : > { %v4498_v29 = vpop.f32.mrb[17].mxu1  ;;  %v17135_v23 = vpack.c.bf16 %v903_v15, %v519_v14  ;;  %v518_v28 = vld [vmem:[%s18170_s22 + $0x4f0] sm:$0xff]  ;;  %v911_v0 = vld [vmem:[%s18170_s22 + $0x1138] sm:$0x3] }
 0x19b   : > { %v4497_v35 = vadd.f32 %v4496_v22, %v4427_v27  ;;  %v1886_v22 = vcombine.high %v1884_v10, %v1884_v10  ;;  %v900_v27 = vld [vmem:[%s18170_s22 + $0x10e0] sm:$0x3]  ;;  %v902_v29 = vld [vmem:[%s18170_s22 + $0x10f0] sm:$0x3] }
 0x19c   : > { %v17137_v43 = vpack.c.bf16 %v902_v29, %v518_v28 }
 0x19d   : > { %8205 = vmatmul.mubr.f32.vlgmr.msra.gmra.mrb[70].mxu0 %v1826_v60  ;;  %v1868_v60 = vcombine.high %v1860_v45, %v1860_v45 }
 0x19e   : > { %8275 = vmatmul.mubr.f32.vlgmr.msra.gmra.mrb[70].mxu1 %v1833_v1  ;;  %17110 = vmatpush1.bf16.xpose.msra.mxu0 %v17109_v33  ;;  %v512_v1 = vld [vmem:[%s18170_s22 + $0x4c0] sm:$0xff]  ;;  %v521_v33 = vld [vmem:[%s18170_s22 + $0x508] sm:$0xff] }
 0x19f   : > { %17114 = vmatpush1.bf16.xpose.msra.mxu1 %v17113_v34  ;;  %8344 = vmatprep.mubr.f32.mxu0 %v1851_v36  ;;  %v17125_v17 = vpack.c.bf16 %v896_v2, %v512_v1  ;;  %v905_v34 = vld [vmem:[%s18170_s22 + $0x1108] sm:$0x3] }
 0x1a0   : > { %17116 = vmatprep.subr.bf16.mxu0 %v17115_v37  ;;  %v4566_v46 = vpop.f32.mrb[18].mxu0  ;;  %8414 = vmatprep.mubr.f32.mxu1 %v1852_v38  ;;  %v305_v1 = vld [vmem:[%s18163_s12 + $0x148] sm:$0xff] }
 0x1a1   : > { %v4636_v47 = vpop.f32.mrb[18].mxu1  ;;  %17120 = vmatprep.subr.bf16.mxu1 %v17119_v39  ;;  %v4567_v51 = vadd.f32 %v4566_v46, %v4497_v35  ;;  %v4568_v52 = vpop.f32.mrb[19].mxu0  ;;  %v1901_v35 = vrot.slane %v1887_v24, %v18194_v25  ;;  %v523_v39 = vld [vmem:[%s18170_s22 + $0x518] sm:$0xff]  ;;  %v17139_v46 = vpack.c.bf16 %v905_v34, %v521_v33  ;;  %v1921_v9 = vcombine.high %v305_v1, %v305_v1 }
 0x1a2   : > { %v4638_v53 = vpop.f32.mrb[19].mxu1  ;;  %v17143_v48 = vpack.c.bf16 %v907_v40, %v523_v39  ;;  %v522_v52 = vld [vmem:[%s18170_s22 + $0x510] sm:$0xff]  ;;  %v1928_v14 = vrot.slane %v305_v1, %v18194_v25  ;;  %v915_v24 = vld [vmem:[%s18170_s22 + $0x1158] sm:$0x3] }
 0x1a3   : > { %v4637_v59 = vadd.f32 %v4636_v47, %v4567_v51  ;;  %v1903_v47 = vcombine.high %v1901_v35, %v1901_v35  ;;  %v904_v51 = vld [vmem:[%s18170_s22 + $0x1100] sm:$0x3]  ;;  %v906_v53 = vld [vmem:[%s18170_s22 + $0x1110] sm:$0x3] }
 0x1a4   : > { %v17145_v3 = vpack.c.bf16 %v906_v53, %v522_v52 }
 0x1a5   : > { %8345 = vmatmul.mubr.f32.vlgmr.msra.gmra.mrb[72].mxu0 %v1843_v20  ;;  %v1885_v20 = vcombine.high %v1877_v5, %v1877_v5 }
 0x1a6   : > { %8415 = vmatmul.mubr.f32.vlgmr.msra.gmra.mrb[72].mxu1 %v1850_v26  ;;  %17118 = vmatpush1.bf16.xpose.msra.mxu0 %v17117_v57  ;;  %v516_v26 = vld [vmem:[%s18170_s22 + $0x4e0] sm:$0xff]  ;;  %v525_v57 = vld [vmem:[%s18170_s22 + $0x528] sm:$0xff] }
 0x1a7   : > { %17122 = vmatpush1.bf16.xpose.msra.mxu1 %v17121_v58  ;;  %8484 = vmatprep.mubr.f32.mxu0 %v1868_v60  ;;  %v17133_v42 = vpack.c.bf16 %v900_v27, %v516_v26  ;;  %v909_v58 = vld [vmem:[%s18170_s22 + $0x1128] sm:$0x3]  ;;  %v306_v26 = vld [vmem:[%s18163_s12 + $0x150] sm:$0xff] }
 0x1a8   : > { %17124 = vmatprep.subr.bf16.mxu0 %v17123_v61  ;;  %v4706_v6 = vpop.f32.mrb[20].mxu0  ;;  %8554 = vmatprep.mubr.f32.mxu1 %v1869_v62  ;;  %v1938_v34 = vcombine.high %v306_v26, %v306_v26  ;;  %v1945_v39 = vrot.slane %v306_v26, %v18194_v25 }
 0x1a9   : > { %v4776_v7 = vpop.f32.mrb[20].mxu1  ;;  %17128 = vmatprep.subr.bf16.mxu1 %v17127_v63  ;;  %v4707_v11 = vadd.f32 %v4706_v6, %v4637_v59  ;;  %v4708_v12 = vpop.f32.mrb[21].mxu0  ;;  %v1918_v59 = vrot.slane %v1904_v49, %v18194_v25  ;;  %v527_v63 = vld [vmem:[%s18170_s22 + $0x538] sm:$0xff]  ;;  %v17147_v6 = vpack.c.bf16 %v909_v58, %v525_v57 }
 0x1aa   : > { %v4778_v13 = vpop.f32.mrb[21].mxu1  ;;  %v17151_v8 = vpack.c.bf16 %v911_v0, %v527_v63  ;;  %v526_v12 = vld [vmem:[%s18170_s22 + $0x530] sm:$0xff]  ;;  %v919_v49 = vld [vmem:[%s18170_s22 + $0x1178] sm:$0x3] }
 0x1ab   : > { %v4777_v19 = vadd.f32 %v4776_v7, %v4707_v11  ;;  %v1920_v7 = vcombine.high %v1918_v59, %v1918_v59  ;;  %v908_v11 = vld [vmem:[%s18170_s22 + $0x1120] sm:$0x3]  ;;  %v910_v13 = vld [vmem:[%s18170_s22 + $0x1130] sm:$0x3] }
 0x1ac   : > { %v17153_v28 = vpack.c.bf16 %v910_v13, %v526_v12 }
 0x1ad   : > { %8485 = vmatmul.mubr.f32.vlgmr.msra.gmra.mrb[74].mxu0 %v1860_v45  ;;  %v1902_v45 = vcombine.high %v1894_v30, %v1894_v30 }
 0x1ae   : > { %8555 = vmatmul.mubr.f32.vlgmr.msra.gmra.mrb[74].mxu1 %v1867_v50  ;;  %17126 = vmatpush1.bf16.xpose.msra.mxu0 %v17125_v17  ;;  %v520_v50 = vld [vmem:[%s18170_s22 + $0x500] sm:$0xff]  ;;  %v529_v17 = vld [vmem:[%s18170_s22 + $0x548] sm:$0xff] }
 0x1af   : > { %17130 = vmatpush1.bf16.xpose.msra.mxu1 %v17129_v18  ;;  %8624 = vmatprep.mubr.f32.mxu0 %v1885_v20  ;;  %v17141_v2 = vpack.c.bf16 %v904_v51, %v520_v50  ;;  %v913_v18 = vld [vmem:[%s18170_s22 + $0x1148] sm:$0x3]  ;;  %v307_v50 = vld [vmem:[%s18163_s12 + $0x158] sm:$0xff] }
 0x1b0   : > { %17132 = vmatprep.subr.bf16.mxu0 %v17131_v21  ;;  %v4846_v31 = vpop.f32.mrb[22].mxu0  ;;  %8694 = vmatprep.mubr.f32.mxu1 %v1886_v22  ;;  %v1955_v58 = vcombine.high %v307_v50, %v307_v50  ;;  %v1962_v63 = vrot.slane %v307_v50, %v18194_v25 }
 0x1b1   : > { %v4916_v32 = vpop.f32.mrb[22].mxu1  ;;  %17136 = vmatprep.subr.bf16.mxu1 %v17135_v23  ;;  %v4847_v36 = vadd.f32 %v4846_v31, %v4777_v19  ;;  %v4848_v37 = vpop.f32.mrb[23].mxu0  ;;  %v1935_v19 = vrot.slane %v1921_v9, %v18194_v25  ;;  %v531_v23 = vld [vmem:[%s18170_s22 + $0x558] sm:$0xff]  ;;  %v17155_v31 = vpack.c.bf16 %v913_v18, %v529_v17 }
 0x1b2   : > { %v4918_v38 = vpop.f32.mrb[23].mxu1  ;;  %v17159_v33 = vpack.c.bf16 %v915_v24, %v531_v23  ;;  %v530_v37 = vld [vmem:[%s18170_s22 + $0x550] sm:$0xff]  ;;  %v923_v9 = vld [vmem:[%s18170_s22 + $0x1198] sm:$0x3] }
 0x1b3   : > { %v4917_v44 = vadd.f32 %v4916_v32, %v4847_v36  ;;  %v1937_v32 = vcombine.high %v1935_v19, %v1935_v19  ;;  %v912_v36 = vld [vmem:[%s18170_s22 + $0x1140] sm:$0x3]  ;;  %v914_v38 = vld [vmem:[%s18170_s22 + $0x1150] sm:$0x3] }
 0x1b4   : > { %v17161_v52 = vpack.c.bf16 %v914_v38, %v530_v37 }
 0x1b5   : > { %8625 = vmatmul.mubr.f32.vlgmr.msra.gmra.mrb[76].mxu0 %v1877_v5  ;;  %v1919_v5 = vcombine.high %v1911_v54, %v1911_v54 }
 0x1b6   : > { %8695 = vmatmul.mubr.f32.vlgmr.msra.gmra.mrb[76].mxu1 %v1884_v10  ;;  %17134 = vmatpush1.bf16.xpose.msra.mxu0 %v17133_v42  ;;  %v524_v10 = vld [vmem:[%s18170_s22 + $0x520] sm:$0xff]  ;;  %v533_v42 = vld [vmem:[%s18170_s22 + $0x568] sm:$0xff] }
 0x1b7   : > { %17138 = vmatpush1.bf16.xpose.msra.mxu1 %v17137_v43  ;;  %8764 = vmatprep.mubr.f32.mxu0 %v1902_v45  ;;  %v17149_v27 = vpack.c.bf16 %v908_v11, %v524_v10  ;;  %v917_v43 = vld [vmem:[%s18170_s22 + $0x1168] sm:$0x3]  ;;  %v308_v10 = vld [vmem:[%s18163_s12 + $0x160] sm:$0xff] }
 0x1b8   : > { %17140 = vmatprep.subr.bf16.mxu0 %v17139_v46  ;;  %v4986_v55 = vpop.f32.mrb[24].mxu0  ;;  %8834 = vmatprep.mubr.f32.mxu1 %v1903_v47  ;;  %v1972_v18 = vcombine.high %v308_v10, %v308_v10  ;;  %v1979_v23 = vrot.slane %v308_v10, %v18194_v25 }
 0x1b9   : > { %v5056_v56 = vpop.f32.mrb[24].mxu1  ;;  %17144 = vmatprep.subr.bf16.mxu1 %v17143_v48  ;;  %v4987_v60 = vadd.f32 %v4986_v55, %v4917_v44  ;;  %v4988_v61 = vpop.f32.mrb[25].mxu0  ;;  %v1952_v44 = vrot.slane %v1938_v34, %v18194_v25  ;;  %v535_v48 = vld [vmem:[%s18170_s22 + $0x578] sm:$0xff]  ;;  %v17163_v55 = vpack.c.bf16 %v917_v43, %v533_v42 }
 0x1ba   : > { %v5058_v62 = vpop.f32.mrb[25].mxu1  ;;  %v17167_v57 = vpack.c.bf16 %v919_v49, %v535_v48  ;;  %v534_v61 = vld [vmem:[%s18170_s22 + $0x570] sm:$0xff]  ;;  %v927_v34 = vld [vmem:[%s18170_s22 + $0x11b8] sm:$0x3] }
 0x1bb   : > { %v5057_v4 = vadd.f32 %v5056_v56, %v4987_v60  ;;  %v1954_v56 = vcombine.high %v1952_v44, %v1952_v44  ;;  %v916_v60 = vld [vmem:[%s18170_s22 + $0x1160] sm:$0x3]  ;;  %v918_v62 = vld [vmem:[%s18170_s22 + $0x1170] sm:$0x3] }
 0x1bc   : > { %v17169_v12 = vpack.c.bf16 %v918_v62, %v534_v61 }
 0x1bd   : > { %8765 = vmatmul.mubr.f32.vlgmr.msra.gmra.mrb[78].mxu0 %v1894_v30  ;;  %v1936_v30 = vcombine.high %v1928_v14, %v1928_v14 }
 0x1be   : > { %8835 = vmatmul.mubr.f32.vlgmr.msra.gmra.mrb[78].mxu1 %v1901_v35  ;;  %17142 = vmatpush1.bf16.xpose.msra.mxu0 %v17141_v2  ;;  %v528_v35 = vld [vmem:[%s18170_s22 + $0x540] sm:$0xff]  ;;  %v537_v2 = vld [vmem:[%s18170_s22 + $0x588] sm:$0xff] }
 0x1bf   : > { %17146 = vmatpush1.bf16.xpose.msra.mxu1 %v17145_v3  ;;  %8904 = vmatprep.mubr.f32.mxu0 %v1919_v5  ;;  %v17157_v51 = vpack.c.bf16 %v912_v36, %v528_v35  ;;  %v921_v3 = vld [vmem:[%s18170_s22 + $0x1188] sm:$0x3] }
 0x1c0   : > { %17148 = vmatprep.subr.bf16.mxu0 %v17147_v6  ;;  %v5126_v15 = vpop.f32.mrb[26].mxu0  ;;  %8974 = vmatprep.mubr.f32.mxu1 %v1920_v7  ;;  %v309_v35 = vld [vmem:[%s18163_s12 + $0x168] sm:$0xff] }
 0x1c1   : > { %v5196_v16 = vpop.f32.mrb[26].mxu1  ;;  %17152 = vmatprep.subr.bf16.mxu1 %v17151_v8  ;;  %v5127_v20 = vadd.f32 %v5126_v15, %v5057_v4  ;;  %v5128_v21 = vpop.f32.mrb[27].mxu0  ;;  %v1969_v4 = vrot.slane %v1955_v58, %v18194_v25  ;;  %v539_v8 = vld [vmem:[%s18170_s22 + $0x598] sm:$0xff]  ;;  %v17171_v15 = vpack.c.bf16 %v921_v3, %v537_v2  ;;  %v1989_v43 = vcombine.high %v309_v35, %v309_v35 }
 0x1c2   : > { %v5198_v22 = vpop.f32.mrb[27].mxu1  ;;  %v17175_v17 = vpack.c.bf16 %v923_v9, %v539_v8  ;;  %v538_v21 = vld [vmem:[%s18170_s22 + $0x590] sm:$0xff]  ;;  %v1996_v48 = vrot.slane %v309_v35, %v18194_v25  ;;  %v931_v58 = vld [vmem:[%s18170_s22 + $0x11d8] sm:$0x3] }
 0x1c3   : > { %v5197_v29 = vadd.f32 %v5196_v16, %v5127_v20  ;;  %v1971_v16 = vcombine.high %v1969_v4, %v1969_v4  ;;  %v920_v20 = vld [vmem:[%s18170_s22 + $0x1180] sm:$0x3]  ;;  %v922_v22 = vld [vmem:[%s18170_s22 + $0x1190] sm:$0x3] }
 0x1c4   : > { %v17177_v37 = vpack.c.bf16 %v922_v22, %v538_v21 }
 0x1c5   : > { %8905 = vmatmul.mubr.f32.vlgmr.msra.gmra.mrb[80].mxu0 %v1911_v54  ;;  %v1953_v54 = vcombine.high %v1945_v39, %v1945_v39 }
 0x1c6   : > { %8975 = vmatmul.mubr.f32.vlgmr.msra.gmra.mrb[80].mxu1 %v1918_v59  ;;  %17150 = vmatpush1.bf16.xpose.msra.mxu0 %v17149_v27  ;;  %v532_v59 = vld [vmem:[%s18170_s22 + $0x560] sm:$0xff]  ;;  %v541_v27 = vld [vmem:[%s18170_s22 + $0x5a8] sm:$0xff] }
 0x1c7   : > { %17154 = vmatpush1.bf16.xpose.msra.mxu1 %v17153_v28  ;;  %9044 = vmatprep.mubr.f32.mxu0 %v1936_v30  ;;  %v17165_v11 = vpack.c.bf16 %v916_v60, %v532_v59  ;;  %v925_v28 = vld [vmem:[%s18170_s22 + $0x11a8] sm:$0x3]  ;;  %v310_v59 = vld [vmem:[%s18163_s12 + $0x170] sm:$0xff] }
 0x1c8   : > { %17156 = vmatprep.subr.bf16.mxu0 %v17155_v31  ;;  %v5266_v40 = vpop.f32.mrb[28].mxu0  ;;  %9114 = vmatprep.mubr.f32.mxu1 %v1937_v32  ;;  %v2006_v3 = vcombine.high %v310_v59, %v310_v59  ;;  %v2013_v8 = vrot.slane %v310_v59, %v18194_v25 }
 0x1c9   : > { %v5336_v41 = vpop.f32.mrb[28].mxu1  ;;  %17160 = vmatprep.subr.bf16.mxu1 %v17159_v33  ;;  %v5267_v45 = vadd.f32 %v5266_v40, %v5197_v29  ;;  %v5268_v46 = vpop.f32.mrb[29].mxu0  ;;  %v1986_v29 = vrot.slane %v1972_v18, %v18194_v25  ;;  %v543_v33 = vld [vmem:[%s18170_s22 + $0x5b8] sm:$0xff]  ;;  %v17179_v40 = vpack.c.bf16 %v925_v28, %v541_v27 }
 0x1ca   : > { %v5338_v47 = vpop.f32.mrb[29].mxu1  ;;  %v17183_v42 = vpack.c.bf16 %v927_v34, %v543_v33  ;;  %v542_v46 = vld [vmem:[%s18170_s22 + $0x5b0] sm:$0xff]  ;;  %v935_v18 = vld [vmem:[%s18170_s22 + $0x11f8] sm:$0x3] }
 0x1cb   : > { %v5337_v53 = vadd.f32 %v5336_v41, %v5267_v45  ;;  %v1988_v41 = vcombine.high %v1986_v29, %v1986_v29  ;;  %v924_v45 = vld [vmem:[%s18170_s22 + $0x11a0] sm:$0x3]  ;;  %v926_v47 = vld [vmem:[%s18170_s22 + $0x11b0] sm:$0x3] }
 0x1cc   : > { %v17185_v61 = vpack.c.bf16 %v926_v47, %v542_v46 }
 0x1cd   : > { %9045 = vmatmul.mubr.f32.vlgmr.msra.gmra.mrb[82].mxu0 %v1928_v14  ;;  %v1970_v14 = vcombine.high %v1962_v63, %v1962_v63 }
 0x1ce   : > { %9115 = vmatmul.mubr.f32.vlgmr.msra.gmra.mrb[82].mxu1 %v1935_v19  ;;  %17158 = vmatpush1.bf16.xpose.msra.mxu0 %v17157_v51  ;;  %v536_v19 = vld [vmem:[%s18170_s22 + $0x580] sm:$0xff]  ;;  %v545_v51 = vld [vmem:[%s18170_s22 + $0x5c8] sm:$0xff] }
 0x1cf   : > { %17162 = vmatpush1.bf16.xpose.msra.mxu1 %v17161_v52  ;;  %9184 = vmatprep.mubr.f32.mxu0 %v1953_v54  ;;  %v17173_v36 = vpack.c.bf16 %v920_v20, %v536_v19  ;;  %v929_v52 = vld [vmem:[%s18170_s22 + $0x11c8] sm:$0x3]  ;;  %v311_v19 = vld [vmem:[%s18163_s12 + $0x178] sm:$0xff] }
 0x1d0   : > { %17164 = vmatprep.subr.bf16.mxu0 %v17163_v55  ;;  %v5406_v0 = vpop.f32.mrb[30].mxu0  ;;  %9254 = vmatprep.mubr.f32.mxu1 %v1954_v56  ;;  %v2023_v28 = vcombine.high %v311_v19, %v311_v19  ;;  %v2030_v33 = vrot.slane %v311_v19, %v18194_v25 }
 0x1d1   : > { %v5476_v1 = vpop.f32.mrb[30].mxu1  ;;  %17168 = vmatprep.subr.bf16.mxu1 %v17167_v57  ;;  %v5407_v5 = vadd.f32 %v5406_v0, %v5337_v53  ;;  %v5408_v6 = vpop.f32.mrb[31].mxu0  ;;  %v2003_v53 = vrot.slane %v1989_v43, %v18194_v25  ;;  %v547_v57 = vld [vmem:[%s18170_s22 + $0x5d8] sm:$0xff]  ;;  %v17187_v0 = vpack.c.bf16 %v929_v52, %v545_v51 }
 0x1d2   : > { %v5478_v7 = vpop.f32.mrb[31].mxu1  ;;  %v17191_v2 = vpack.c.bf16 %v931_v58, %v547_v57  ;;  %v546_v6 = vld [vmem:[%s18170_s22 + $0x5d0] sm:$0xff]  ;;  %v939_v43 = vld [vmem:[%s18170_s22 + $0x1218] sm:$0x3] }
 0x1d3   : > { %v5477_v13 = vadd.f32 %v5476_v1, %v5407_v5  ;;  %v2005_v1 = vcombine.high %v2003_v53, %v2003_v53  ;;  %v928_v5 = vld [vmem:[%s18170_s22 + $0x11c0] sm:$0x3]  ;;  %v930_v7 = vld [vmem:[%s18170_s22 + $0x11d0] sm:$0x3] }
 0x1d4   : > { %v17193_v21 = vpack.c.bf16 %v930_v7, %v546_v6 }
 0x1d5   : > { %9185 = vmatmul.mubr.f32.vlgmr.msra.gmra.mrb[84].mxu0 %v1945_v39  ;;  %v1987_v39 = vcombine.high %v1979_v23, %v1979_v23 }
 0x1d6   : > { %9255 = vmatmul.mubr.f32.vlgmr.msra.gmra.mrb[84].mxu1 %v1952_v44  ;;  %17166 = vmatpush1.bf16.xpose.msra.mxu0 %v17165_v11  ;;  %v540_v44 = vld [vmem:[%s18170_s22 + $0x5a0] sm:$0xff]  ;;  %v549_v11 = vld [vmem:[%s18170_s22 + $0x5e8] sm:$0xff] }
 0x1d7   : > { %17170 = vmatpush1.bf16.xpose.msra.mxu1 %v17169_v12  ;;  %9324 = vmatprep.mubr.f32.mxu0 %v1970_v14  ;;  %v17181_v60 = vpack.c.bf16 %v924_v45, %v540_v44  ;;  %v933_v12 = vld [vmem:[%s18170_s22 + $0x11e8] sm:$0x3]  ;;  %v312_v44 = vld [vmem:[%s18163_s12 + $0x180] sm:$0xff] }
 0x1d8   : > { %17172 = vmatprep.subr.bf16.mxu0 %v17171_v15  ;;  %v5546_v24 = vpop.f32.mrb[32].mxu0  ;;  %9394 = vmatprep.mubr.f32.mxu1 %v1971_v16  ;;  %v2040_v52 = vcombine.high %v312_v44, %v312_v44  ;;  %v2047_v57 = vrot.slane %v312_v44, %v18194_v25 }
 0x1d9   : > { %v5616_v26 = vpop.f32.mrb[32].mxu1  ;;  %17176 = vmatprep.subr.bf16.mxu1 %v17175_v17  ;;  %v5547_v30 = vadd.f32 %v5546_v24, %v5477_v13  ;;  %v5548_v31 = vpop.f32.mrb[33].mxu0  ;;  %v2020_v13 = vrot.slane %v2006_v3, %v18194_v25  ;;  %v551_v17 = vld [vmem:[%s18170_s22 + $0x5f8] sm:$0xff]  ;;  %v17195_v24 = vpack.c.bf16 %v933_v12, %v549_v11 }
 0x1da   : > { %v5618_v32 = vpop.f32.mrb[33].mxu1  ;;  %v17199_v27 = vpack.c.bf16 %v935_v18, %v551_v17  ;;  %v550_v31 = vld [vmem:[%s18170_s22 + $0x5f0] sm:$0xff]  ;;  %v943_v3 = vld [vmem:[%s18170_s22 + $0x1238] sm:$0x3] }
 0x1db   : > { %v5617_v38 = vadd.f32 %v5616_v26, %v5547_v30  ;;  %v2022_v26 = vcombine.high %v2020_v13, %v2020_v13  ;;  %v932_v30 = vld [vmem:[%s18170_s22 + $0x11e0] sm:$0x3]  ;;  %v934_v32 = vld [vmem:[%s18170_s22 + $0x11f0] sm:$0x3] }
 0x1dc   : > { %v17201_v46 = vpack.c.bf16 %v934_v32, %v550_v31 }
 0x1dd   : > { %9325 = vmatmul.mubr.f32.vlgmr.msra.gmra.mrb[86].mxu0 %v1962_v63  ;;  %v2004_v63 = vcombine.high %v1996_v48, %v1996_v48 }
 0x1de   : > { %9395 = vmatmul.mubr.f32.vlgmr.msra.gmra.mrb[86].mxu1 %v1969_v4  ;;  %17174 = vmatpush1.bf16.xpose.msra.mxu0 %v17173_v36  ;;  %v544_v4 = vld [vmem:[%s18170_s22 + $0x5c0] sm:$0xff]  ;;  %v553_v36 = vld [vmem:[%s18170_s22 + $0x608] sm:$0xff] }
 0x1df   : > { %17178 = vmatpush1.bf16.xpose.msra.mxu1 %v17177_v37  ;;  %9464 = vmatprep.mubr.f32.mxu0 %v1987_v39  ;;  %v17189_v20 = vpack.c.bf16 %v928_v5, %v544_v4  ;;  %v937_v37 = vld [vmem:[%s18170_s22 + $0x1208] sm:$0x3] }
 0x1e0   : > { %17180 = vmatprep.subr.bf16.mxu0 %v17179_v40  ;;  %v5686_v49 = vpop.f32.mrb[34].mxu0  ;;  %9534 = vmatprep.mubr.f32.mxu1 %v1988_v41  ;;  %v313_v4 = vld [vmem:[%s18163_s12 + $0x188] sm:$0xff] }
 0x1e1   : > { %v5756_v50 = vpop.f32.mrb[34].mxu1  ;;  %17184 = vmatprep.subr.bf16.mxu1 %v17183_v42  ;;  %v5687_v54 = vadd.f32 %v5686_v49, %v5617_v38  ;;  %v5688_v55 = vpop.f32.mrb[35].mxu0  ;;  %v2037_v38 = vrot.slane %v2023_v28, %v18194_v25  ;;  %v555_v42 = vld [vmem:[%s18170_s22 + $0x618] sm:$0xff]  ;;  %v17203_v49 = vpack.c.bf16 %v937_v37, %v553_v36  ;;  %v2057_v12 = vcombine.high %v313_v4, %v313_v4 }
 0x1e2   : > { %v5758_v56 = vpop.f32.mrb[35].mxu1  ;;  %v17207_v51 = vpack.c.bf16 %v939_v43, %v555_v42  ;;  %v554_v55 = vld [vmem:[%s18170_s22 + $0x610] sm:$0xff]  ;;  %v2064_v17 = vrot.slane %v313_v4, %v18194_v25  ;;  %v947_v28 = vld [vmem:[%s18170_s22 + $0x1258] sm:$0x3] }
 0x1e3   : > { %v5757_v62 = vadd.f32 %v5756_v50, %v5687_v54  ;;  %v2039_v50 = vcombine.high %v2037_v38, %v2037_v38  ;;  %v936_v54 = vld [vmem:[%s18170_s22 + $0x1200] sm:$0x3]  ;;  %v938_v56 = vld [vmem:[%s18170_s22 + $0x1210] sm:$0x3] }
 0x1e4   : > { %v17209_v6 = vpack.c.bf16 %v938_v56, %v554_v55 }
 0x1e5   : > { %9465 = vmatmul.mubr.f32.vlgmr.msra.gmra.mrb[88].mxu0 %v1979_v23  ;;  %v2021_v23 = vcombine.high %v2013_v8, %v2013_v8 }
 0x1e6   : > { %9535 = vmatmul.mubr.f32.vlgmr.msra.gmra.mrb[88].mxu1 %v1986_v29  ;;  %17182 = vmatpush1.bf16.xpose.msra.mxu0 %v17181_v60  ;;  %v548_v29 = vld [vmem:[%s18170_s22 + $0x5e0] sm:$0xff]  ;;  %v557_v60 = vld [vmem:[%s18170_s22 + $0x628] sm:$0xff] }
 0x1e7   : > { %17186 = vmatpush1.bf16.xpose.msra.mxu1 %v17185_v61  ;;  %9604 = vmatprep.mubr.f32.mxu0 %v2004_v63  ;;  %v17197_v45 = vpack.c.bf16 %v932_v30, %v548_v29  ;;  %v941_v61 = vld [vmem:[%s18170_s22 + $0x1228] sm:$0x3]  ;;  %v314_v29 = vld [vmem:[%s18163_s12 + $0x190] sm:$0xff] }
 0x1e8   : > { %17188 = vmatprep.subr.bf16.mxu0 %v17187_v0  ;;  %v5826_v9 = vpop.f32.mrb[36].mxu0  ;;  %9674 = vmatprep.mubr.f32.mxu1 %v2005_v1  ;;  %v2074_v37 = vcombine.high %v314_v29, %v314_v29  ;;  %v2081_v42 = vrot.slane %v314_v29, %v18194_v25 }
 0x1e9   : > { %v5896_v10 = vpop.f32.mrb[36].mxu1  ;;  %17192 = vmatprep.subr.bf16.mxu1 %v17191_v2  ;;  %v5827_v14 = vadd.f32 %v5826_v9, %v5757_v62  ;;  %v5828_v15 = vpop.f32.mrb[37].mxu0  ;;  %v2054_v62 = vrot.slane %v2040_v52, %v18194_v25  ;;  %v559_v2 = vld [vmem:[%s18170_s22 + $0x638] sm:$0xff]  ;;  %v17211_v9 = vpack.c.bf16 %v941_v61, %v557_v60 }
 0x1ea   : > { %v5898_v16 = vpop.f32.mrb[37].mxu1  ;;  %v17215_v11 = vpack.c.bf16 %v943_v3, %v559_v2  ;;  %v558_v15 = vld [vmem:[%s18170_s22 + $0x630] sm:$0xff]  ;;  %v951_v52 = vld [vmem:[%s18170_s22 + $0x1278] sm:$0x3] }
 0x1eb   : > { %v5897_v22 = vadd.f32 %v5896_v10, %v5827_v14  ;;  %v2056_v10 = vcombine.high %v2054_v62, %v2054_v62  ;;  %v940_v14 = vld [vmem:[%s18170_s22 + $0x1220] sm:$0x3]  ;;  %v942_v16 = vld [vmem:[%s18170_s22 + $0x1230] sm:$0x3] }
 0x1ec   : > { %v17217_v31 = vpack.c.bf16 %v942_v16, %v558_v15 }
 0x1ed   : > { %9605 = vmatmul.mubr.f32.vlgmr.msra.gmra.mrb[90].mxu0 %v1996_v48  ;;  %v2038_v48 = vcombine.high %v2030_v33, %v2030_v33 }
 0x1ee   : > { %9675 = vmatmul.mubr.f32.vlgmr.msra.gmra.mrb[90].mxu1 %v2003_v53  ;;  %17190 = vmatpush1.bf16.xpose.msra.mxu0 %v17189_v20  ;;  %v552_v53 = vld [vmem:[%s18170_s22 + $0x600] sm:$0xff]  ;;  %v561_v20 = vld [vmem:[%s18170_s22 + $0x648] sm:$0xff] }
 0x1ef   : > { %17194 = vmatpush1.bf16.xpose.msra.mxu1 %v17193_v21  ;;  %9744 = vmatprep.mubr.f32.mxu0 %v2021_v23  ;;  %v17205_v5 = vpack.c.bf16 %v936_v54, %v552_v53  ;;  %v945_v21 = vld [vmem:[%s18170_s22 + $0x1248] sm:$0x3]  ;;  %v315_v53 = vld [vmem:[%s18163_s12 + $0x198] sm:$0xff] }
 0x1f0   : > { %17196 = vmatprep.subr.bf16.mxu0 %v17195_v24  ;;  %v5966_v34 = vpop.f32.mrb[38].mxu0  ;;  %9814 = vmatprep.mubr.f32.mxu1 %v2022_v26  ;;  %v2091_v61 = vcombine.high %v315_v53, %v315_v53  ;;  %v2098_v2 = vrot.slane %v315_v53, %v18194_v25 }
 0x1f1   : > { %v6036_v35 = vpop.f32.mrb[38].mxu1  ;;  %17200 = vmatprep.subr.bf16.mxu1 %v17199_v27  ;;  %v5967_v39 = vadd.f32 %v5966_v34, %v5897_v22  ;;  %v5968_v40 = vpop.f32.mrb[39].mxu0  ;;  %v2071_v22 = vrot.slane %v2057_v12, %v18194_v25  ;;  %v563_v27 = vld [vmem:[%s18170_s22 + $0x658] sm:$0xff]  ;;  %v17219_v34 = vpack.c.bf16 %v945_v21, %v561_v20 }
 0x1f2   : > { %v6038_v41 = vpop.f32.mrb[39].mxu1  ;;  %v17223_v36 = vpack.c.bf16 %v947_v28, %v563_v27  ;;  %v562_v40 = vld [vmem:[%s18170_s22 + $0x650] sm:$0xff]  ;;  %v955_v12 = vld [vmem:[%s18170_s22 + $0x1298] sm:$0x3] }
 0x1f3   : > { %v6037_v47 = vadd.f32 %v6036_v35, %v5967_v39  ;;  %v2073_v35 = vcombine.high %v2071_v22, %v2071_v22  ;;  %v944_v39 = vld [vmem:[%s18170_s22 + $0x1240] sm:$0x3]  ;;  %v946_v41 = vld [vmem:[%s18170_s22 + $0x1250] sm:$0x3] }
 0x1f4   : > { %v17225_v55 = vpack.c.bf16 %v946_v41, %v562_v40 }
 0x1f5   : > { %9745 = vmatmul.mubr.f32.vlgmr.msra.gmra.mrb[92].mxu0 %v2013_v8  ;;  %v2055_v8 = vcombine.high %v2047_v57, %v2047_v57 }
 0x1f6   : > { %9815 = vmatmul.mubr.f32.vlgmr.msra.gmra.mrb[92].mxu1 %v2020_v13  ;;  %17198 = vmatpush1.bf16.xpose.msra.mxu0 %v17197_v45  ;;  %v556_v13 = vld [vmem:[%s18170_s22 + $0x620] sm:$0xff]  ;;  %v565_v45 = vld [vmem:[%s18170_s22 + $0x668] sm:$0xff] }
 0x1f7   : > { %17202 = vmatpush1.bf16.xpose.msra.mxu1 %v17201_v46  ;;  %9884 = vmatprep.mubr.f32.mxu0 %v2038_v48  ;;  %v17213_v30 = vpack.c.bf16 %v940_v14, %v556_v13  ;;  %v949_v46 = vld [vmem:[%s18170_s22 + $0x1268] sm:$0x3]  ;;  %v316_v13 = vld [vmem:[%s18163_s12 + $0x1a0] sm:$0xff] }
 0x1f8   : > { %17204 = vmatprep.subr.bf16.mxu0 %v17203_v49  ;;  %v6106_v58 = vpop.f32.mrb[40].mxu0  ;;  %9954 = vmatprep.mubr.f32.mxu1 %v2039_v50  ;;  %v2108_v21 = vcombine.high %v316_v13, %v316_v13  ;;  %v2115_v27 = vrot.slane %v316_v13, %v18194_v25 }
 0x1f9   : > { %v6176_v59 = vpop.f32.mrb[40].mxu1  ;;  %17208 = vmatprep.subr.bf16.mxu1 %v17207_v51  ;;  %v6107_v63 = vadd.f32 %v6106_v58, %v6037_v47  ;;  %v6108_v0 = vpop.f32.mrb[41].mxu0  ;;  %v2088_v47 = vrot.slane %v2074_v37, %v18194_v25  ;;  %v567_v51 = vld [vmem:[%s18170_s22 + $0x678] sm:$0xff]  ;;  %v17227_v58 = vpack.c.bf16 %v949_v46, %v565_v45 }
 0x1fa   : > { %v6178_v1 = vpop.f32.mrb[41].mxu1  ;;  %v17231_v60 = vpack.c.bf16 %v951_v52, %v567_v51  ;;  %v566_v0 = vld [vmem:[%s18170_s22 + $0x670] sm:$0xff]  ;;  %v959_v37 = vld [vmem:[%s18170_s22 + $0x12b8] sm:$0x3] }
 0x1fb   : > { %v6177_v7 = vadd.f32 %v6176_v59, %v6107_v63  ;;  %v2090_v59 = vcombine.high %v2088_v47, %v2088_v47  ;;  %v948_v63 = vld [vmem:[%s18170_s22 + $0x1260] sm:$0x3]  ;;  %v950_v1 = vld [vmem:[%s18170_s22 + $0x1270] sm:$0x3] }
 0x1fc   : > { %v17233_v15 = vpack.c.bf16 %v950_v1, %v566_v0 }
 0x1fd   : > { %9885 = vmatmul.mubr.f32.vlgmr.msra.gmra.mrb[94].mxu0 %v2030_v33  ;;  %v2072_v33 = vcombine.high %v2064_v17, %v2064_v17 }
 0x1fe   : > { %9955 = vmatmul.mubr.f32.vlgmr.msra.gmra.mrb[94].mxu1 %v2037_v38  ;;  %17206 = vmatpush1.bf16.xpose.msra.mxu0 %v17205_v5  ;;  %v560_v38 = vld [vmem:[%s18170_s22 + $0x640] sm:$0xff]  ;;  %v569_v5 = vld [vmem:[%s18170_s22 + $0x688] sm:$0xff] }
 0x1ff   : > { %17210 = vmatpush1.bf16.xpose.msra.mxu1 %v17209_v6  ;;  %10024 = vmatprep.mubr.f32.mxu0 %v2055_v8  ;;  %v17221_v54 = vpack.c.bf16 %v944_v39, %v560_v38  ;;  %v953_v6 = vld [vmem:[%s18170_s22 + $0x1288] sm:$0x3] }
 0x200   : > { %17212 = vmatprep.subr.bf16.mxu0 %v17211_v9  ;;  %v6246_v18 = vpop.f32.mrb[42].mxu0  ;;  %10094 = vmatprep.mubr.f32.mxu1 %v2056_v10  ;;  %v317_v38 = vld [vmem:[%s18163_s12 + $0x1a8] sm:$0xff] }
 0x201   : > { %v6316_v19 = vpop.f32.mrb[42].mxu1  ;;  %17216 = vmatprep.subr.bf16.mxu1 %v17215_v11  ;;  %v6247_v23 = vadd.f32 %v6246_v18, %v6177_v7  ;;  %v6248_v24 = vpop.f32.mrb[43].mxu0  ;;  %v2105_v7 = vrot.slane %v2091_v61, %v18194_v25  ;;  %v571_v11 = vld [vmem:[%s18170_s22 + $0x698] sm:$0xff]  ;;  %v17235_v18 = vpack.c.bf16 %v953_v6, %v569_v5  ;;  %v2125_v46 = vcombine.high %v317_v38, %v317_v38 }
 0x202   : > { %v6318_v26 = vpop.f32.mrb[43].mxu1  ;;  %v17239_v20 = vpack.c.bf16 %v955_v12, %v571_v11  ;;  %v570_v24 = vld [vmem:[%s18170_s22 + $0x690] sm:$0xff]  ;;  %v2132_v51 = vrot.slane %v317_v38, %v18194_v25  ;;  %v963_v61 = vld [vmem:[%s18170_s22 + $0x12d8] sm:$0x3] }
 0x203   : > { %v6317_v32 = vadd.f32 %v6316_v19, %v6247_v23  ;;  %v2107_v19 = vcombine.high %v2105_v7, %v2105_v7  ;;  %v952_v23 = vld [vmem:[%s18170_s22 + $0x1280] sm:$0x3]  ;;  %v954_v26 = vld [vmem:[%s18170_s22 + $0x1290] sm:$0x3] }
 0x204   : > { %v17241_v40 = vpack.c.bf16 %v954_v26, %v570_v24 }
 0x205   : > { %10025 = vmatmul.mubr.f32.vlgmr.msra.gmra.mrb[96].mxu0 %v2047_v57  ;;  %v2089_v57 = vcombine.high %v2081_v42, %v2081_v42 }
 0x206   : > { %10095 = vmatmul.mubr.f32.vlgmr.msra.gmra.mrb[96].mxu1 %v2054_v62  ;;  %17214 = vmatpush1.bf16.xpose.msra.mxu0 %v17213_v30  ;;  %v564_v62 = vld [vmem:[%s18170_s22 + $0x660] sm:$0xff]  ;;  %v573_v30 = vld [vmem:[%s18170_s22 + $0x6a8] sm:$0xff] }
 0x207   : > { %17218 = vmatpush1.bf16.xpose.msra.mxu1 %v17217_v31  ;;  %10164 = vmatprep.mubr.f32.mxu0 %v2072_v33  ;;  %v17229_v14 = vpack.c.bf16 %v948_v63, %v564_v62  ;;  %v957_v31 = vld [vmem:[%s18170_s22 + $0x12a8] sm:$0x3]  ;;  %v318_v62 = vld [vmem:[%s18163_s12 + $0x1b0] sm:$0xff] }
 0x208   : > { %17220 = vmatprep.subr.bf16.mxu0 %v17219_v34  ;;  %v6386_v43 = vpop.f32.mrb[44].mxu0  ;;  %10234 = vmatprep.mubr.f32.mxu1 %v2073_v35  ;;  %v2142_v6 = vcombine.high %v318_v62, %v318_v62  ;;  %v2149_v11 = vrot.slane %v318_v62, %v18194_v25 }
 0x209   : > { %v6456_v44 = vpop.f32.mrb[44].mxu1  ;;  %17224 = vmatprep.subr.bf16.mxu1 %v17223_v36  ;;  %v6387_v48 = vadd.f32 %v6386_v43, %v6317_v32  ;;  %v6388_v49 = vpop.f32.mrb[45].mxu0  ;;  %v2122_v32 = vrot.slane %v2108_v21, %v18194_v25  ;;  %v575_v36 = vld [vmem:[%s18170_s22 + $0x6b8] sm:$0xff]  ;;  %v17243_v43 = vpack.c.bf16 %v957_v31, %v573_v30 }
 0x20a   : > { %v6458_v50 = vpop.f32.mrb[45].mxu1  ;;  %v17247_v45 = vpack.c.bf16 %v959_v37, %v575_v36  ;;  %v574_v49 = vld [vmem:[%s18170_s22 + $0x6b0] sm:$0xff]  ;;  %v967_v21 = vld [vmem:[%s18170_s22 + $0x12f8] sm:$0x3] }
 0x20b   : > { %v6457_v56 = vadd.f32 %v6456_v44, %v6387_v48  ;;  %v2124_v44 = vcombine.high %v2122_v32, %v2122_v32  ;;  %v956_v48 = vld [vmem:[%s18170_s22 + $0x12a0] sm:$0x3]  ;;  %v958_v50 = vld [vmem:[%s18170_s22 + $0x12b0] sm:$0x3] }
 0x20c   : > { %v17249_v0 = vpack.c.bf16 %v958_v50, %v574_v49 }
 0x20d   : > { %10165 = vmatmul.mubr.f32.vlgmr.msra.gmra.mrb[98].mxu0 %v2064_v17  ;;  %v2106_v17 = vcombine.high %v2098_v2, %v2098_v2 }
 0x20e   : > { %10235 = vmatmul.mubr.f32.vlgmr.msra.gmra.mrb[98].mxu1 %v2071_v22  ;;  %17222 = vmatpush1.bf16.xpose.msra.mxu0 %v17221_v54  ;;  %v568_v22 = vld [vmem:[%s18170_s22 + $0x680] sm:$0xff]  ;;  %v577_v54 = vld [vmem:[%s18170_s22 + $0x6c8] sm:$0xff] }
 0x20f   : > { %17226 = vmatpush1.bf16.xpose.msra.mxu1 %v17225_v55  ;;  %10304 = vmatprep.mubr.f32.mxu0 %v2089_v57  ;;  %v17237_v39 = vpack.c.bf16 %v952_v23, %v568_v22  ;;  %v961_v55 = vld [vmem:[%s18170_s22 + $0x12c8] sm:$0x3]  ;;  %v319_v22 = vld [vmem:[%s18163_s12 + $0x1b8] sm:$0xff] }
 0x210   : > { %17228 = vmatprep.subr.bf16.mxu0 %v17227_v58  ;;  %v6526_v3 = vpop.f32.mrb[46].mxu0  ;;  %10374 = vmatprep.mubr.f32.mxu1 %v2090_v59  ;;  %v2159_v31 = vcombine.high %v319_v22, %v319_v22  ;;  %v2166_v36 = vrot.slane %v319_v22, %v18194_v25 }
 0x211   : > { %v6596_v4 = vpop.f32.mrb[46].mxu1  ;;  %17232 = vmatprep.subr.bf16.mxu1 %v17231_v60  ;;  %v6527_v8 = vadd.f32 %v6526_v3, %v6457_v56  ;;  %v6528_v9 = vpop.f32.mrb[47].mxu0  ;;  %v2139_v56 = vrot.slane %v2125_v46, %v18194_v25  ;;  %v579_v60 = vld [vmem:[%s18170_s22 + $0x6d8] sm:$0xff]  ;;  %v17251_v3 = vpack.c.bf16 %v961_v55, %v577_v54 }
 0x212   : > { %v6598_v10 = vpop.f32.mrb[47].mxu1  ;;  %v17255_v5 = vpack.c.bf16 %v963_v61, %v579_v60  ;;  %v578_v9 = vld [vmem:[%s18170_s22 + $0x6d0] sm:$0xff]  ;;  %v971_v46 = vld [vmem:[%s18170_s22 + $0x1318] sm:$0x3] }
 0x213   : > { %v6597_v16 = vadd.f32 %v6596_v4, %v6527_v8  ;;  %v2141_v4 = vcombine.high %v2139_v56, %v2139_v56  ;;  %v960_v8 = vld [vmem:[%s18170_s22 + $0x12c0] sm:$0x3]  ;;  %v962_v10 = vld [vmem:[%s18170_s22 + $0x12d0] sm:$0x3] }
 0x214   : > { %v17257_v24 = vpack.c.bf16 %v962_v10, %v578_v9 }
 0x215   : > { %10305 = vmatmul.mubr.f32.vlgmr.msra.gmra.mrb[100].mxu0 %v2081_v42  ;;  %v2123_v42 = vcombine.high %v2115_v27, %v2115_v27 }
 0x216   : > { %10375 = vmatmul.mubr.f32.vlgmr.msra.gmra.mrb[100].mxu1 %v2088_v47  ;;  %17230 = vmatpush1.bf16.xpose.msra.mxu0 %v17229_v14  ;;  %v572_v47 = vld [vmem:[%s18170_s22 + $0x6a0] sm:$0xff]  ;;  %v581_v14 = vld [vmem:[%s18170_s22 + $0x6e8] sm:$0xff] }
 0x217   : > { %17234 = vmatpush1.bf16.xpose.msra.mxu1 %v17233_v15  ;;  %10444 = vmatprep.mubr.f32.mxu0 %v2106_v17  ;;  %v17245_v63 = vpack.c.bf16 %v956_v48, %v572_v47  ;;  %v965_v15 = vld [vmem:[%s18170_s22 + $0x12e8] sm:$0x3]  ;;  %v320_v47 = vld [vmem:[%s18163_s12 + $0x1c0] sm:$0xff] }
 0x218   : > { %17236 = vmatprep.subr.bf16.mxu0 %v17235_v18  ;;  %v6666_v28 = vpop.f32.mrb[48].mxu0  ;;  %10514 = vmatprep.mubr.f32.mxu1 %v2107_v19  ;;  %v2176_v55 = vcombine.high %v320_v47, %v320_v47  ;;  %v2183_v60 = vrot.slane %v320_v47, %v18194_v25 }
 0x219   : > { %v6736_v29 = vpop.f32.mrb[48].mxu1  ;;  %17240 = vmatprep.subr.bf16.mxu1 %v17239_v20  ;;  %v6667_v33 = vadd.f32 %v6666_v28, %v6597_v16  ;;  %v6668_v34 = vpop.f32.mrb[49].mxu0  ;;  %v2156_v16 = vrot.slane %v2142_v6, %v18194_v25  ;;  %v583_v20 = vld [vmem:[%s18170_s22 + $0x6f8] sm:$0xff]  ;;  %v17259_v28 = vpack.c.bf16 %v965_v15, %v581_v14 }
 0x21a   : > { %v6738_v35 = vpop.f32.mrb[49].mxu1  ;;  %v17263_v30 = vpack.c.bf16 %v967_v21, %v583_v20  ;;  %v582_v34 = vld [vmem:[%s18170_s22 + $0x6f0] sm:$0xff]  ;;  %v975_v6 = vld [vmem:[%s18170_s22 + $0x1338] sm:$0x3] }
 0x21b   : > { %v6737_v41 = vadd.f32 %v6736_v29, %v6667_v33  ;;  %v2158_v29 = vcombine.high %v2156_v16, %v2156_v16  ;;  %v964_v33 = vld [vmem:[%s18170_s22 + $0x12e0] sm:$0x3]  ;;  %v966_v35 = vld [vmem:[%s18170_s22 + $0x12f0] sm:$0x3] }
 0x21c   : > { %v17265_v49 = vpack.c.bf16 %v966_v35, %v582_v34 }
 0x21d   : > { %10445 = vmatmul.mubr.f32.vlgmr.msra.gmra.mrb[102].mxu0 %v2098_v2  ;;  %v2140_v2 = vcombine.high %v2132_v51, %v2132_v51 }
 0x21e   : > { %10515 = vmatmul.mubr.f32.vlgmr.msra.gmra.mrb[102].mxu1 %v2105_v7  ;;  %17238 = vmatpush1.bf16.xpose.msra.mxu0 %v17237_v39  ;;  %v576_v7 = vld [vmem:[%s18170_s22 + $0x6c0] sm:$0xff]  ;;  %v585_v39 = vld [vmem:[%s18170_s22 + $0x708] sm:$0xff] }
 0x21f   : > { %17242 = vmatpush1.bf16.xpose.msra.mxu1 %v17241_v40  ;;  %10584 = vmatprep.mubr.f32.mxu0 %v2123_v42  ;;  %v17253_v23 = vpack.c.bf16 %v960_v8, %v576_v7  ;;  %v969_v40 = vld [vmem:[%s18170_s22 + $0x1308] sm:$0x3] }
 0x220   : > { %17244 = vmatprep.subr.bf16.mxu0 %v17243_v43  ;;  %v6806_v52 = vpop.f32.mrb[50].mxu0  ;;  %10654 = vmatprep.mubr.f32.mxu1 %v2124_v44  ;;  %v321_v7 = vld [vmem:[%s18163_s12 + $0x1c8] sm:$0xff] }
 0x221   : > { %v6876_v53 = vpop.f32.mrb[50].mxu1  ;;  %17248 = vmatprep.subr.bf16.mxu1 %v17247_v45  ;;  %v6807_v57 = vadd.f32 %v6806_v52, %v6737_v41  ;;  %v6808_v58 = vpop.f32.mrb[51].mxu0  ;;  %v2173_v41 = vrot.slane %v2159_v31, %v18194_v25  ;;  %v587_v45 = vld [vmem:[%s18170_s22 + $0x718] sm:$0xff]  ;;  %v17267_v52 = vpack.c.bf16 %v969_v40, %v585_v39  ;;  %v2193_v15 = vcombine.high %v321_v7, %v321_v7 }
 0x222   : > { %v6878_v59 = vpop.f32.mrb[51].mxu1  ;;  %v17271_v54 = vpack.c.bf16 %v971_v46, %v587_v45  ;;  %v586_v58 = vld [vmem:[%s18170_s22 + $0x710] sm:$0xff]  ;;  %v2200_v20 = vrot.slane %v321_v7, %v18194_v25  ;;  %v979_v31 = vld [vmem:[%s18170_s22 + $0x1358] sm:$0x3] }
 0x223   : > { %v6877_v1 = vadd.f32 %v6876_v53, %v6807_v57  ;;  %v2175_v53 = vcombine.high %v2173_v41, %v2173_v41  ;;  %v968_v57 = vld [vmem:[%s18170_s22 + $0x1300] sm:$0x3]  ;;  %v970_v59 = vld [vmem:[%s18170_s22 + $0x1310] sm:$0x3] }
 0x224   : > { %v17273_v9 = vpack.c.bf16 %v970_v59, %v586_v58 }
 0x225   : > { %10585 = vmatmul.mubr.f32.vlgmr.msra.gmra.mrb[104].mxu0 %v2115_v27  ;;  %v2157_v27 = vcombine.high %v2149_v11, %v2149_v11 }
 0x226   : > { %10655 = vmatmul.mubr.f32.vlgmr.msra.gmra.mrb[104].mxu1 %v2122_v32  ;;  %17246 = vmatpush1.bf16.xpose.msra.mxu0 %v17245_v63  ;;  %v580_v32 = vld [vmem:[%s18170_s22 + $0x6e0] sm:$0xff]  ;;  %v589_v63 = vld [vmem:[%s18170_s22 + $0x728] sm:$0xff] }
 0x227   : > { %17250 = vmatpush1.bf16.xpose.msra.mxu1 %v17249_v0  ;;  %10724 = vmatprep.mubr.f32.mxu0 %v2140_v2  ;;  %v17261_v48 = vpack.c.bf16 %v964_v33, %v580_v32  ;;  %v973_v0 = vld [vmem:[%s18170_s22 + $0x1328] sm:$0x3]  ;;  %v322_v32 = vld [vmem:[%s18163_s12 + $0x1d0] sm:$0xff] }
 0x228   : > { %17252 = vmatprep.subr.bf16.mxu0 %v17251_v3  ;;  %v6946_v12 = vpop.f32.mrb[52].mxu0  ;;  %10794 = vmatprep.mubr.f32.mxu1 %v2141_v4  ;;  %v2210_v40 = vcombine.high %v322_v32, %v322_v32  ;;  %v2217_v45 = vrot.slane %v322_v32, %v18194_v25 }
 0x229   : > { %v7016_v13 = vpop.f32.mrb[52].mxu1  ;;  %17256 = vmatprep.subr.bf16.mxu1 %v17255_v5  ;;  %v6947_v17 = vadd.f32 %v6946_v12, %v6877_v1  ;;  %v6948_v18 = vpop.f32.mrb[53].mxu0  ;;  %v2190_v1 = vrot.slane %v2176_v55, %v18194_v25  ;;  %v591_v5 = vld [vmem:[%s18170_s22 + $0x738] sm:$0xff]  ;;  %v17275_v12 = vpack.c.bf16 %v973_v0, %v589_v63 }
 0x22a   : > { %v7018_v19 = vpop.f32.mrb[53].mxu1  ;;  %v17279_v14 = vpack.c.bf16 %v975_v6, %v591_v5  ;;  %v590_v18 = vld [vmem:[%s18170_s22 + $0x730] sm:$0xff]  ;;  %v983_v55 = vld [vmem:[%s18170_s22 + $0x1378] sm:$0x3] }
 0x22b   : > { %v7017_v26 = vadd.f32 %v7016_v13, %v6947_v17  ;;  %v2192_v13 = vcombine.high %v2190_v1, %v2190_v1  ;;  %v972_v17 = vld [vmem:[%s18170_s22 + $0x1320] sm:$0x3]  ;;  %v974_v19 = vld [vmem:[%s18170_s22 + $0x1330] sm:$0x3] }
 0x22c   : > { %v17281_v34 = vpack.c.bf16 %v974_v19, %v590_v18 }
 0x22d   : > { %10725 = vmatmul.mubr.f32.vlgmr.msra.gmra.mrb[106].mxu0 %v2132_v51  ;;  %v2174_v51 = vcombine.high %v2166_v36, %v2166_v36 }
 0x22e   : > { %10795 = vmatmul.mubr.f32.vlgmr.msra.gmra.mrb[106].mxu1 %v2139_v56  ;;  %17254 = vmatpush1.bf16.xpose.msra.mxu0 %v17253_v23  ;;  %v584_v56 = vld [vmem:[%s18170_s22 + $0x700] sm:$0xff]  ;;  %v593_v23 = vld [vmem:[%s18170_s22 + $0x748] sm:$0xff] }
 0x22f   : > { %17258 = vmatpush1.bf16.xpose.msra.mxu1 %v17257_v24  ;;  %10864 = vmatprep.mubr.f32.mxu0 %v2157_v27  ;;  %v17269_v8 = vpack.c.bf16 %v968_v57, %v584_v56  ;;  %v977_v24 = vld [vmem:[%s18170_s22 + $0x1348] sm:$0x3]  ;;  %v323_v56 = vld [vmem:[%s18163_s12 + $0x1d8] sm:$0xff] }
 0x230   : > { %17260 = vmatprep.subr.bf16.mxu0 %v17259_v28  ;;  %v7086_v37 = vpop.f32.mrb[54].mxu0  ;;  %10934 = vmatprep.mubr.f32.mxu1 %v2158_v29  ;;  %v2227_v0 = vcombine.high %v323_v56, %v323_v56  ;;  %v2234_v5 = vrot.slane %v323_v56, %v18194_v25 }
 0x231   : > { %v7156_v38 = vpop.f32.mrb[54].mxu1  ;;  %17264 = vmatprep.subr.bf16.mxu1 %v17263_v30  ;;  %v7087_v42 = vadd.f32 %v7086_v37, %v7017_v26  ;;  %v7088_v43 = vpop.f32.mrb[55].mxu0  ;;  %v2207_v26 = vrot.slane %v2193_v15, %v18194_v25  ;;  %v595_v30 = vld [vmem:[%s18170_s22 + $0x758] sm:$0xff]  ;;  %v17283_v37 = vpack.c.bf16 %v977_v24, %v593_v23 }
 0x232   : > { %v7158_v44 = vpop.f32.mrb[55].mxu1  ;;  %v17287_v39 = vpack.c.bf16 %v979_v31, %v595_v30  ;;  %v594_v43 = vld [vmem:[%s18170_s22 + $0x750] sm:$0xff]  ;;  %v987_v15 = vld [vmem:[%s18170_s22 + $0x1398] sm:$0x3] }
 0x233   : > { %v7157_v50 = vadd.f32 %v7156_v38, %v7087_v42  ;;  %v2209_v38 = vcombine.high %v2207_v26, %v2207_v26  ;;  %v976_v42 = vld [vmem:[%s18170_s22 + $0x1340] sm:$0x3]  ;;  %v978_v44 = vld [vmem:[%s18170_s22 + $0x1350] sm:$0x3] }
 0x234   : > { %v17289_v58 = vpack.c.bf16 %v978_v44, %v594_v43 }
 0x235   : > { %10865 = vmatmul.mubr.f32.vlgmr.msra.gmra.mrb[108].mxu0 %v2149_v11  ;;  %v2191_v11 = vcombine.high %v2183_v60, %v2183_v60 }
 0x236   : > { %10935 = vmatmul.mubr.f32.vlgmr.msra.gmra.mrb[108].mxu1 %v2156_v16  ;;  %17262 = vmatpush1.bf16.xpose.msra.mxu0 %v17261_v48  ;;  %v588_v16 = vld [vmem:[%s18170_s22 + $0x720] sm:$0xff]  ;;  %v597_v48 = vld [vmem:[%s18170_s22 + $0x768] sm:$0xff] }
 0x237   : > { %17266 = vmatpush1.bf16.xpose.msra.mxu1 %v17265_v49  ;;  %11004 = vmatprep.mubr.f32.mxu0 %v2174_v51  ;;  %v17277_v33 = vpack.c.bf16 %v972_v17, %v588_v16  ;;  %v981_v49 = vld [vmem:[%s18170_s22 + $0x1368] sm:$0x3]  ;;  %v324_v16 = vld [vmem:[%s18163_s12 + $0x1e0] sm:$0xff] }
 0x238   : > { %17268 = vmatprep.subr.bf16.mxu0 %v17267_v52  ;;  %v7226_v61 = vpop.f32.mrb[56].mxu0  ;;  %11074 = vmatprep.mubr.f32.mxu1 %v2175_v53  ;;  %v2244_v24 = vcombine.high %v324_v16, %v324_v16  ;;  %v2251_v30 = vrot.slane %v324_v16, %v18194_v25 }
 0x239   : > { %v7296_v62 = vpop.f32.mrb[56].mxu1  ;;  %17272 = vmatprep.subr.bf16.mxu1 %v17271_v54  ;;  %v7227_v2 = vadd.f32 %v7226_v61, %v7157_v50  ;;  %v7228_v3 = vpop.f32.mrb[57].mxu0  ;;  %v2224_v50 = vrot.slane %v2210_v40, %v18194_v25  ;;  %v599_v54 = vld [vmem:[%s18170_s22 + $0x778] sm:$0xff]  ;;  %v17291_v61 = vpack.c.bf16 %v981_v49, %v597_v48 }
 0x23a   : > { %v7298_v4 = vpop.f32.mrb[57].mxu1  ;;  %v17295_v63 = vpack.c.bf16 %v983_v55, %v599_v54  ;;  %v598_v3 = vld [vmem:[%s18170_s22 + $0x770] sm:$0xff]  ;;  %v991_v40 = vld [vmem:[%s18170_s22 + $0x13b8] sm:$0x3] }
 0x23b   : > { %v7297_v10 = vadd.f32 %v7296_v62, %v7227_v2  ;;  %v2226_v62 = vcombine.high %v2224_v50, %v2224_v50  ;;  %v980_v2 = vld [vmem:[%s18170_s22 + $0x1360] sm:$0x3]  ;;  %v982_v4 = vld [vmem:[%s18170_s22 + $0x1370] sm:$0x3] }
 0x23c   : > { %v17297_v18 = vpack.c.bf16 %v982_v4, %v598_v3 }
 0x23d   : > { %11005 = vmatmul.mubr.f32.vlgmr.msra.gmra.mrb[110].mxu0 %v2166_v36  ;;  %v2208_v36 = vcombine.high %v2200_v20, %v2200_v20 }
 0x23e   : > { %11075 = vmatmul.mubr.f32.vlgmr.msra.gmra.mrb[110].mxu1 %v2173_v41  ;;  %17270 = vmatpush1.bf16.xpose.msra.mxu0 %v17269_v8  ;;  %v592_v41 = vld [vmem:[%s18170_s22 + $0x740] sm:$0xff]  ;;  %v601_v8 = vld [vmem:[%s18170_s22 + $0x788] sm:$0xff] }
 0x23f   : > { %17274 = vmatpush1.bf16.xpose.msra.mxu1 %v17273_v9  ;;  %11144 = vmatprep.mubr.f32.mxu0 %v2191_v11  ;;  %v17285_v57 = vpack.c.bf16 %v976_v42, %v592_v41  ;;  %v985_v9 = vld [vmem:[%s18170_s22 + $0x1388] sm:$0x3] }
 0x240   : > { %17276 = vmatprep.subr.bf16.mxu0 %v17275_v12  ;;  %v7366_v21 = vpop.f32.mrb[58].mxu0  ;;  %11214 = vmatprep.mubr.f32.mxu1 %v2192_v13  ;;  %v325_v41 = vld [vmem:[%s18163_s12 + $0x1e8] sm:$0xff] }
 0x241   : > { %v7436_v22 = vpop.f32.mrb[58].mxu1  ;;  %17280 = vmatprep.subr.bf16.mxu1 %v17279_v14  ;;  %v7367_v27 = vadd.f32 %v7366_v21, %v7297_v10  ;;  %v7368_v28 = vpop.f32.mrb[59].mxu0  ;;  %v2241_v10 = vrot.slane %v2227_v0, %v18194_v25  ;;  %v603_v14 = vld [vmem:[%s18170_s22 + $0x798] sm:$0xff]  ;;  %v17299_v21 = vpack.c.bf16 %v985_v9, %v601_v8  ;;  %v2261_v49 = vcombine.high %v325_v41, %v325_v41 }
 0x242   : > { %v7438_v29 = vpop.f32.mrb[59].mxu1  ;;  %v17303_v23 = vpack.c.bf16 %v987_v15, %v603_v14  ;;  %v602_v28 = vld [vmem:[%s18170_s22 + $0x790] sm:$0xff]  ;;  %v2268_v54 = vrot.slane %v325_v41, %v18194_v25  ;;  %v995_v0 = vld [vmem:[%s18170_s22 + $0x13d8] sm:$0x3] }
 0x243   : > { %v7437_v35 = vadd.f32 %v7436_v22, %v7367_v27  ;;  %v2243_v22 = vcombine.high %v2241_v10, %v2241_v10  ;;  %v984_v27 = vld [vmem:[%s18170_s22 + $0x1380] sm:$0x3]  ;;  %v986_v29 = vld [vmem:[%s18170_s22 + $0x1390] sm:$0x3] }
 0x244   : > { %v17305_v43 = vpack.c.bf16 %v986_v29, %v602_v28 }
 0x245   : > { %11145 = vmatmul.mubr.f32.vlgmr.msra.gmra.mrb[112].mxu0 %v2183_v60  ;;  %v2225_v60 = vcombine.high %v2217_v45, %v2217_v45 }
 0x246   : > { %11215 = vmatmul.mubr.f32.vlgmr.msra.gmra.mrb[112].mxu1 %v2190_v1  ;;  %17278 = vmatpush1.bf16.xpose.msra.mxu0 %v17277_v33  ;;  %v596_v1 = vld [vmem:[%s18170_s22 + $0x760] sm:$0xff]  ;;  %v605_v33 = vld [vmem:[%s18170_s22 + $0x7a8] sm:$0xff] }
 0x247   : > { %17282 = vmatpush1.bf16.xpose.msra.mxu1 %v17281_v34  ;;  %11284 = vmatprep.mubr.f32.mxu0 %v2208_v36  ;;  %v17293_v17 = vpack.c.bf16 %v980_v2, %v596_v1  ;;  %v989_v34 = vld [vmem:[%s18170_s22 + $0x13a8] sm:$0x3]  ;;  %v326_v1 = vld [vmem:[%s18163_s12 + $0x1f0] sm:$0xff] }
 0x248   : > { %17284 = vmatprep.subr.bf16.mxu0 %v17283_v37  ;;  %v7506_v46 = vpop.f32.mrb[60].mxu0  ;;  %11354 = vmatprep.mubr.f32.mxu1 %v2209_v38  ;;  %v2278_v9 = vcombine.high %v326_v1, %v326_v1  ;;  %v2285_v14 = vrot.slane %v326_v1, %v18194_v25 }
 0x249   : > { %v7576_v47 = vpop.f32.mrb[60].mxu1  ;;  %17288 = vmatprep.subr.bf16.mxu1 %v17287_v39  ;;  %v7507_v51 = vadd.f32 %v7506_v46, %v7437_v35  ;;  %v7508_v52 = vpop.f32.mrb[61].mxu0  ;;  %v2258_v35 = vrot.slane %v2244_v24, %v18194_v25  ;;  %v607_v39 = vld [vmem:[%s18170_s22 + $0x7b8] sm:$0xff]  ;;  %v17307_v46 = vpack.c.bf16 %v989_v34, %v605_v33 }
 0x24a   : > { %v7578_v53 = vpop.f32.mrb[61].mxu1  ;;  %v17311_v48 = vpack.c.bf16 %v991_v40, %v607_v39  ;;  %v606_v52 = vld [vmem:[%s18170_s22 + $0x7b0] sm:$0xff]  ;;  %v999_v24 = vld [vmem:[%s18170_s22 + $0x13f8] sm:$0x3] }
 0x24b   : > { %v7577_v59 = vadd.f32 %v7576_v47, %v7507_v51  ;;  %v2260_v47 = vcombine.high %v2258_v35, %v2258_v35  ;;  %v988_v51 = vld [vmem:[%s18170_s22 + $0x13a0] sm:$0x3]  ;;  %v990_v53 = vld [vmem:[%s18170_s22 + $0x13b0] sm:$0x3] }
 0x24c   : > { %v17313_v3 = vpack.c.bf16 %v990_v53, %v606_v52 }
 0x24d   : > { %11285 = vmatmul.mubr.f32.vlgmr.msra.gmra.mrb[114].mxu0 %v2200_v20  ;;  %v2242_v20 = vcombine.high %v2234_v5, %v2234_v5 }
 0x24e   : > { %11355 = vmatmul.mubr.f32.vlgmr.msra.gmra.mrb[114].mxu1 %v2207_v26  ;;  %17286 = vmatpush1.bf16.xpose.msra.mxu0 %v17285_v57  ;;  %v600_v26 = vld [vmem:[%s18170_s22 + $0x780] sm:$0xff]  ;;  %v609_v57 = vld [vmem:[%s18170_s22 + $0x7c8] sm:$0xff] }
 0x24f   : > { %17290 = vmatpush1.bf16.xpose.msra.mxu1 %v17289_v58  ;;  %11424 = vmatprep.mubr.f32.mxu0 %v2225_v60  ;;  %v17301_v42 = vpack.c.bf16 %v984_v27, %v600_v26  ;;  %v993_v58 = vld [vmem:[%s18170_s22 + $0x13c8] sm:$0x3]  ;;  %v327_v26 = vld [vmem:[%s18163_s12 + $0x1f8] sm:$0xff] }
 0x250   : > { %17292 = vmatprep.subr.bf16.mxu0 %v17291_v61  ;;  %v7646_v6 = vpop.f32.mrb[62].mxu0  ;;  %11494 = vmatprep.mubr.f32.mxu1 %v2226_v62  ;;  %v2295_v34 = vcombine.high %v327_v26, %v327_v26  ;;  %v2302_v39 = vrot.slane %v327_v26, %v18194_v25 }
 0x251   : > { %v7716_v7 = vpop.f32.mrb[62].mxu1  ;;  %17296 = vmatprep.subr.bf16.mxu1 %v17295_v63  ;;  %v7647_v11 = vadd.f32 %v7646_v6, %v7577_v59  ;;  %v7648_v12 = vpop.f32.mrb[63].mxu0  ;;  %v2275_v59 = vrot.slane %v2261_v49, %v18194_v25  ;;  %v611_v63 = vld [vmem:[%s18170_s22 + $0x7d8] sm:$0xff]  ;;  %v17315_v6 = vpack.c.bf16 %v993_v58, %v609_v57 }
 0x252   : > { %v7718_v13 = vpop.f32.mrb[63].mxu1  ;;  %v17319_v8 = vpack.c.bf16 %v995_v0, %v611_v63  ;;  %v610_v12 = vld [vmem:[%s18170_s22 + $0x7d0] sm:$0xff]  ;;  %v1003_v49 = vld [vmem:[%s18170_s22 + $0x1418] sm:$0x3] }
 0x253   : > { %v7717_v19 = vadd.f32 %v7716_v7, %v7647_v11  ;;  %v2277_v7 = vcombine.high %v2275_v59, %v2275_v59  ;;  %v992_v11 = vld [vmem:[%s18170_s22 + $0x13c0] sm:$0x3]  ;;  %v994_v13 = vld [vmem:[%s18170_s22 + $0x13d0] sm:$0x3] }
 0x254   : > { %v17321_v28 = vpack.c.bf16 %v994_v13, %v610_v12 }
 0x255   : > { %11425 = vmatmul.mubr.f32.vlgmr.msra.gmra.mrb[116].mxu0 %v2217_v45  ;;  %v2259_v45 = vcombine.high %v2251_v30, %v2251_v30 }
 0x256   : > { %11495 = vmatmul.mubr.f32.vlgmr.msra.gmra.mrb[116].mxu1 %v2224_v50  ;;  %17294 = vmatpush1.bf16.xpose.msra.mxu0 %v17293_v17  ;;  %v604_v50 = vld [vmem:[%s18170_s22 + $0x7a0] sm:$0xff]  ;;  %v613_v17 = vld [vmem:[%s18170_s22 + $0x7e8] sm:$0xff] }
 0x257   : > { %17298 = vmatpush1.bf16.xpose.msra.mxu1 %v17297_v18  ;;  %11564 = vmatprep.mubr.f32.mxu0 %v2242_v20  ;;  %v17309_v2 = vpack.c.bf16 %v988_v51, %v604_v50  ;;  %v997_v18 = vld [vmem:[%s18170_s22 + $0x13e8] sm:$0x3]  ;;  %v328_v50 = vld [vmem:[%s18163_s12 + $0x200] sm:$0xff] }
 0x258   : > { %17300 = vmatprep.subr.bf16.mxu0 %v17299_v21  ;;  %v7786_v31 = vpop.f32.mrb[64].mxu0  ;;  %11634 = vmatprep.mubr.f32.mxu1 %v2243_v22  ;;  %v2312_v58 = vcombine.high %v328_v50, %v328_v50  ;;  %v2319_v63 = vrot.slane %v328_v50, %v18194_v25 }
 0x259   : > { %v7856_v32 = vpop.f32.mrb[64].mxu1  ;;  %17304 = vmatprep.subr.bf16.mxu1 %v17303_v23  ;;  %v7787_v36 = vadd.f32 %v7786_v31, %v7717_v19  ;;  %v7788_v37 = vpop.f32.mrb[65].mxu0  ;;  %v2292_v19 = vrot.slane %v2278_v9, %v18194_v25  ;;  %v615_v23 = vld [vmem:[%s18170_s22 + $0x7f8] sm:$0xff]  ;;  %v17323_v31 = vpack.c.bf16 %v997_v18, %v613_v17 }
 0x25a   : > { %v7858_v38 = vpop.f32.mrb[65].mxu1  ;;  %v17327_v33 = vpack.c.bf16 %v999_v24, %v615_v23  ;;  %v614_v37 = vld [vmem:[%s18170_s22 + $0x7f0] sm:$0xff]  ;;  %v1007_v9 = vld [vmem:[%s18170_s22 + $0x1438] sm:$0x3] }
 0x25b   : > { %v7857_v44 = vadd.f32 %v7856_v32, %v7787_v36  ;;  %v2294_v32 = vcombine.high %v2292_v19, %v2292_v19  ;;  %v996_v36 = vld [vmem:[%s18170_s22 + $0x13e0] sm:$0x3]  ;;  %v998_v38 = vld [vmem:[%s18170_s22 + $0x13f0] sm:$0x3] }
 0x25c   : > { %v17329_v52 = vpack.c.bf16 %v998_v38, %v614_v37 }
 0x25d   : > { %11565 = vmatmul.mubr.f32.vlgmr.msra.gmra.mrb[118].mxu0 %v2234_v5  ;;  %v2276_v5 = vcombine.high %v2268_v54, %v2268_v54 }
 0x25e   : > { %11635 = vmatmul.mubr.f32.vlgmr.msra.gmra.mrb[118].mxu1 %v2241_v10  ;;  %17302 = vmatpush1.bf16.xpose.msra.mxu0 %v17301_v42  ;;  %v608_v10 = vld [vmem:[%s18170_s22 + $0x7c0] sm:$0xff]  ;;  %v617_v42 = vld [vmem:[%s18170_s22 + $0x808] sm:$0xff] }
 0x25f   : > { %17306 = vmatpush1.bf16.xpose.msra.mxu1 %v17305_v43  ;;  %11704 = vmatprep.mubr.f32.mxu0 %v2259_v45  ;;  %v17317_v27 = vpack.c.bf16 %v992_v11, %v608_v10  ;;  %v1001_v43 = vld [vmem:[%s18170_s22 + $0x1408] sm:$0x3] }
 0x260   : > { %17308 = vmatprep.subr.bf16.mxu0 %v17307_v46  ;;  %v7926_v55 = vpop.f32.mrb[66].mxu0  ;;  %11774 = vmatprep.mubr.f32.mxu1 %v2260_v47  ;;  %v329_v10 = vld [vmem:[%s18163_s12 + $0x208] sm:$0xff] }
 0x261   : > { %v7996_v56 = vpop.f32.mrb[66].mxu1  ;;  %17312 = vmatprep.subr.bf16.mxu1 %v17311_v48  ;;  %v7927_v60 = vadd.f32 %v7926_v55, %v7857_v44  ;;  %v7928_v61 = vpop.f32.mrb[67].mxu0  ;;  %v2309_v44 = vrot.slane %v2295_v34, %v18194_v25  ;;  %v619_v48 = vld [vmem:[%s18170_s22 + $0x818] sm:$0xff]  ;;  %v17331_v55 = vpack.c.bf16 %v1001_v43, %v617_v42  ;;  %v2329_v18 = vcombine.high %v329_v10, %v329_v10 }
 0x262   : > { %v7998_v62 = vpop.f32.mrb[67].mxu1  ;;  %v17335_v57 = vpack.c.bf16 %v1003_v49, %v619_v48  ;;  %v618_v61 = vld [vmem:[%s18170_s22 + $0x810] sm:$0xff]  ;;  %v2336_v23 = vrot.slane %v329_v10, %v18194_v25  ;;  %v1011_v34 = vld [vmem:[%s18170_s22 + $0x1458] sm:$0x3] }
 0x263   : > { %v7997_v4 = vadd.f32 %v7996_v56, %v7927_v60  ;;  %v2311_v56 = vcombine.high %v2309_v44, %v2309_v44  ;;  %v1000_v60 = vld [vmem:[%s18170_s22 + $0x1400] sm:$0x3]  ;;  %v1002_v62 = vld [vmem:[%s18170_s22 + $0x1410] sm:$0x3] }
 0x264   : > { %v17337_v12 = vpack.c.bf16 %v1002_v62, %v618_v61 }
 0x265   : > { %11705 = vmatmul.mubr.f32.vlgmr.msra.gmra.mrb[120].mxu0 %v2251_v30  ;;  %v2293_v30 = vcombine.high %v2285_v14, %v2285_v14 }
 0x266   : > { %11775 = vmatmul.mubr.f32.vlgmr.msra.gmra.mrb[120].mxu1 %v2258_v35  ;;  %17310 = vmatpush1.bf16.xpose.msra.mxu0 %v17309_v2  ;;  %v612_v35 = vld [vmem:[%s18170_s22 + $0x7e0] sm:$0xff]  ;;  %v621_v2 = vld [vmem:[%s18170_s22 + $0x828] sm:$0xff] }
 0x267   : > { %17314 = vmatpush1.bf16.xpose.msra.mxu1 %v17313_v3  ;;  %11844 = vmatprep.mubr.f32.mxu0 %v2276_v5  ;;  %v17325_v51 = vpack.c.bf16 %v996_v36, %v612_v35  ;;  %v1005_v3 = vld [vmem:[%s18170_s22 + $0x1428] sm:$0x3]  ;;  %v330_v35 = vld [vmem:[%s18163_s12 + $0x210] sm:$0xff] }
 0x268   : > { %17316 = vmatprep.subr.bf16.mxu0 %v17315_v6  ;;  %v8066_v15 = vpop.f32.mrb[68].mxu0  ;;  %11914 = vmatprep.mubr.f32.mxu1 %v2277_v7  ;;  %v2346_v43 = vcombine.high %v330_v35, %v330_v35  ;;  %v2353_v48 = vrot.slane %v330_v35, %v18194_v25 }
 0x269   : > { %v8136_v16 = vpop.f32.mrb[68].mxu1  ;;  %17320 = vmatprep.subr.bf16.mxu1 %v17319_v8  ;;  %v8067_v20 = vadd.f32 %v8066_v15, %v7997_v4  ;;  %v8068_v21 = vpop.f32.mrb[69].mxu0  ;;  %v2326_v4 = vrot.slane %v2312_v58, %v18194_v25  ;;  %v623_v8 = vld [vmem:[%s18170_s22 + $0x838] sm:$0xff]  ;;  %v17339_v15 = vpack.c.bf16 %v1005_v3, %v621_v2 }
 0x26a   : > { %v8138_v22 = vpop.f32.mrb[69].mxu1  ;;  %v17343_v17 = vpack.c.bf16 %v1007_v9, %v623_v8  ;;  %v622_v21 = vld [vmem:[%s18170_s22 + $0x830] sm:$0xff]  ;;  %v1015_v58 = vld [vmem:[%s18170_s22 + $0x1478] sm:$0x3] }
 0x26b   : > { %v8137_v29 = vadd.f32 %v8136_v16, %v8067_v20  ;;  %v2328_v16 = vcombine.high %v2326_v4, %v2326_v4  ;;  %v1004_v20 = vld [vmem:[%s18170_s22 + $0x1420] sm:$0x3]  ;;  %v1006_v22 = vld [vmem:[%s18170_s22 + $0x1430] sm:$0x3] }
 0x26c   : > { %v17345_v37 = vpack.c.bf16 %v1006_v22, %v622_v21 }
 0x26d   : > { %11845 = vmatmul.mubr.f32.vlgmr.msra.gmra.mrb[122].mxu0 %v2268_v54  ;;  %v2310_v54 = vcombine.high %v2302_v39, %v2302_v39 }
 0x26e   : > { %11915 = vmatmul.mubr.f32.vlgmr.msra.gmra.mrb[122].mxu1 %v2275_v59  ;;  %17318 = vmatpush1.bf16.xpose.msra.mxu0 %v17317_v27  ;;  %v616_v59 = vld [vmem:[%s18170_s22 + $0x800] sm:$0xff]  ;;  %v625_v27 = vld [vmem:[%s18170_s22 + $0x848] sm:$0xff] }
 0x26f   : > { %17322 = vmatpush1.bf16.xpose.msra.mxu1 %v17321_v28  ;;  %11984 = vmatprep.mubr.f32.mxu0 %v2293_v30  ;;  %v17333_v11 = vpack.c.bf16 %v1000_v60, %v616_v59  ;;  %v1009_v28 = vld [vmem:[%s18170_s22 + $0x1448] sm:$0x3]  ;;  %v331_v59 = vld [vmem:[%s18163_s12 + $0x218] sm:$0xff] }
 0x270   : > { %17324 = vmatprep.subr.bf16.mxu0 %v17323_v31  ;;  %v8206_v40 = vpop.f32.mrb[70].mxu0  ;;  %12054 = vmatprep.mubr.f32.mxu1 %v2294_v32  ;;  %v2363_v3 = vcombine.high %v331_v59, %v331_v59  ;;  %v2370_v8 = vrot.slane %v331_v59, %v18194_v25 }
 0x271   : > { %v8276_v41 = vpop.f32.mrb[70].mxu1  ;;  %17328 = vmatprep.subr.bf16.mxu1 %v17327_v33  ;;  %v8207_v45 = vadd.f32 %v8206_v40, %v8137_v29  ;;  %v8208_v46 = vpop.f32.mrb[71].mxu0  ;;  %v2343_v29 = vrot.slane %v2329_v18, %v18194_v25  ;;  %v627_v33 = vld [vmem:[%s18170_s22 + $0x858] sm:$0xff]  ;;  %v17347_v40 = vpack.c.bf16 %v1009_v28, %v625_v27 }
 0x272   : > { %v8278_v47 = vpop.f32.mrb[71].mxu1  ;;  %v17351_v42 = vpack.c.bf16 %v1011_v34, %v627_v33  ;;  %v626_v46 = vld [vmem:[%s18170_s22 + $0x850] sm:$0xff]  ;;  %v1019_v18 = vld [vmem:[%s18170_s22 + $0x1498] sm:$0x3] }
 0x273   : > { %v8277_v53 = vadd.f32 %v8276_v41, %v8207_v45  ;;  %v2345_v41 = vcombine.high %v2343_v29, %v2343_v29  ;;  %v1008_v45 = vld [vmem:[%s18170_s22 + $0x1440] sm:$0x3]  ;;  %v1010_v47 = vld [vmem:[%s18170_s22 + $0x1450] sm:$0x3] }
 0x274   : > { %v17353_v61 = vpack.c.bf16 %v1010_v47, %v626_v46 }
 0x275   : > { %11985 = vmatmul.mubr.f32.vlgmr.msra.gmra.mrb[124].mxu0 %v2285_v14  ;;  %v2327_v14 = vcombine.high %v2319_v63, %v2319_v63 }
 0x276   : > { %12055 = vmatmul.mubr.f32.vlgmr.msra.gmra.mrb[124].mxu1 %v2292_v19  ;;  %17326 = vmatpush1.bf16.xpose.msra.mxu0 %v17325_v51  ;;  %v620_v19 = vld [vmem:[%s18170_s22 + $0x820] sm:$0xff]  ;;  %v629_v51 = vld [vmem:[%s18170_s22 + $0x868] sm:$0xff] }
 0x277   : > { %17330 = vmatpush1.bf16.xpose.msra.mxu1 %v17329_v52  ;;  %12124 = vmatprep.mubr.f32.mxu0 %v2310_v54  ;;  %v17341_v36 = vpack.c.bf16 %v1004_v20, %v620_v19  ;;  %v1013_v52 = vld [vmem:[%s18170_s22 + $0x1468] sm:$0x3]  ;;  %v332_v19 = vld [vmem:[%s18163_s12 + $0x220] sm:$0xff] }
 0x278   : > { %17332 = vmatprep.subr.bf16.mxu0 %v17331_v55  ;;  %v8346_v0 = vpop.f32.mrb[72].mxu0  ;;  %12194 = vmatprep.mubr.f32.mxu1 %v2311_v56  ;;  %v2380_v28 = vcombine.high %v332_v19, %v332_v19  ;;  %v2387_v33 = vrot.slane %v332_v19, %v18194_v25 }
 0x279   : > { %v8416_v1 = vpop.f32.mrb[72].mxu1  ;;  %17336 = vmatprep.subr.bf16.mxu1 %v17335_v57  ;;  %v8347_v5 = vadd.f32 %v8346_v0, %v8277_v53  ;;  %v8348_v6 = vpop.f32.mrb[73].mxu0  ;;  %v2360_v53 = vrot.slane %v2346_v43, %v18194_v25  ;;  %v631_v57 = vld [vmem:[%s18170_s22 + $0x878] sm:$0xff]  ;;  %v17355_v0 = vpack.c.bf16 %v1013_v52, %v629_v51 }
 0x27a   : > { %v8418_v7 = vpop.f32.mrb[73].mxu1  ;;  %v17359_v2 = vpack.c.bf16 %v1015_v58, %v631_v57  ;;  %v630_v6 = vld [vmem:[%s18170_s22 + $0x870] sm:$0xff]  ;;  %v1023_v43 = vld [vmem:[%s18170_s22 + $0x14b8] sm:$0x3] }
 0x27b   : > { %v8417_v13 = vadd.f32 %v8416_v1, %v8347_v5  ;;  %v2362_v1 = vcombine.high %v2360_v53, %v2360_v53  ;;  %v1012_v5 = vld [vmem:[%s18170_s22 + $0x1460] sm:$0x3]  ;;  %v1014_v7 = vld [vmem:[%s18170_s22 + $0x1470] sm:$0x3] }
 0x27c   : > { %v17361_v21 = vpack.c.bf16 %v1014_v7, %v630_v6 }
 0x27d   : > { %12125 = vmatmul.mubr.f32.vlgmr.msra.gmra.mrb[126].mxu0 %v2302_v39  ;;  %v2344_v39 = vcombine.high %v2336_v23, %v2336_v23 }
 0x27e   : > { %12195 = vmatmul.mubr.f32.vlgmr.msra.gmra.mrb[126].mxu1 %v2309_v44  ;;  %17334 = vmatpush1.bf16.xpose.msra.mxu0 %v17333_v11  ;;  %v624_v44 = vld [vmem:[%s18170_s22 + $0x840] sm:$0xff]  ;;  %v633_v11 = vld [vmem:[%s18170_s22 + $0x888] sm:$0xff] }
 0x27f   : > { %17338 = vmatpush1.bf16.xpose.msra.mxu1 %v17337_v12  ;;  %12264 = vmatprep.mubr.f32.mxu0 %v2327_v14  ;;  %v17349_v60 = vpack.c.bf16 %v1008_v45, %v624_v44  ;;  %v1017_v12 = vld [vmem:[%s18170_s22 + $0x1488] sm:$0x3] }
 0x280   : > { %17340 = vmatprep.subr.bf16.mxu0 %v17339_v15  ;;  %v8486_v24 = vpop.f32.mrb[74].mxu0  ;;  %12334 = vmatprep.mubr.f32.mxu1 %v2328_v16  ;;  %v333_v44 = vld [vmem:[%s18163_s12 + $0x228] sm:$0xff] }
 0x281   : > { %v8556_v26 = vpop.f32.mrb[74].mxu1  ;;  %17344 = vmatprep.subr.bf16.mxu1 %v17343_v17  ;;  %v8487_v30 = vadd.f32 %v8486_v24, %v8417_v13  ;;  %v8488_v31 = vpop.f32.mrb[75].mxu0  ;;  %v2377_v13 = vrot.slane %v2363_v3, %v18194_v25  ;;  %v635_v17 = vld [vmem:[%s18170_s22 + $0x898] sm:$0xff]  ;;  %v17363_v24 = vpack.c.bf16 %v1017_v12, %v633_v11  ;;  %v2397_v52 = vcombine.high %v333_v44, %v333_v44 }
 0x282   : > { %v8558_v32 = vpop.f32.mrb[75].mxu1  ;;  %v17367_v27 = vpack.c.bf16 %v1019_v18, %v635_v17  ;;  %v634_v31 = vld [vmem:[%s18170_s22 + $0x890] sm:$0xff]  ;;  %v2404_v57 = vrot.slane %v333_v44, %v18194_v25  ;;  %v1027_v3 = vld [vmem:[%s18170_s22 + $0x14d8] sm:$0x3] }
 0x283   : > { %v8557_v38 = vadd.f32 %v8556_v26, %v8487_v30  ;;  %v2379_v26 = vcombine.high %v2377_v13, %v2377_v13  ;;  %v1016_v30 = vld [vmem:[%s18170_s22 + $0x1480] sm:$0x3]  ;;  %v1018_v32 = vld [vmem:[%s18170_s22 + $0x1490] sm:$0x3] }
 0x284   : > { %v17369_v46 = vpack.c.bf16 %v1018_v32, %v634_v31 }
 0x285   : > { %12265 = vmatmul.mubr.f32.vlgmr.msra.gmra.mrb[128].mxu0 %v2319_v63  ;;  %v2361_v63 = vcombine.high %v2353_v48, %v2353_v48 }
 0x286   : > { %12335 = vmatmul.mubr.f32.vlgmr.msra.gmra.mrb[128].mxu1 %v2326_v4  ;;  %17342 = vmatpush1.bf16.xpose.msra.mxu0 %v17341_v36  ;;  %v628_v4 = vld [vmem:[%s18170_s22 + $0x860] sm:$0xff]  ;;  %v637_v36 = vld [vmem:[%s18170_s22 + $0x8a8] sm:$0xff] }
 0x287   : > { %17346 = vmatpush1.bf16.xpose.msra.mxu1 %v17345_v37  ;;  %12404 = vmatprep.mubr.f32.mxu0 %v2344_v39  ;;  %v17357_v20 = vpack.c.bf16 %v1012_v5, %v628_v4  ;;  %v1021_v37 = vld [vmem:[%s18170_s22 + $0x14a8] sm:$0x3]  ;;  %v334_v4 = vld [vmem:[%s18163_s12 + $0x230] sm:$0xff] }
 0x288   : > { %17348 = vmatprep.subr.bf16.mxu0 %v17347_v40  ;;  %v8626_v49 = vpop.f32.mrb[76].mxu0  ;;  %12474 = vmatprep.mubr.f32.mxu1 %v2345_v41  ;;  %v2414_v12 = vcombine.high %v334_v4, %v334_v4  ;;  %v2421_v17 = vrot.slane %v334_v4, %v18194_v25 }
 0x289   : > { %v8696_v50 = vpop.f32.mrb[76].mxu1  ;;  %17352 = vmatprep.subr.bf16.mxu1 %v17351_v42  ;;  %v8627_v54 = vadd.f32 %v8626_v49, %v8557_v38  ;;  %v8628_v55 = vpop.f32.mrb[77].mxu0  ;;  %v2394_v38 = vrot.slane %v2380_v28, %v18194_v25  ;;  %v639_v42 = vld [vmem:[%s18170_s22 + $0x8b8] sm:$0xff]  ;;  %v17371_v49 = vpack.c.bf16 %v1021_v37, %v637_v36 }
 0x28a   : > { %v8698_v56 = vpop.f32.mrb[77].mxu1  ;;  %v17375_v51 = vpack.c.bf16 %v1023_v43, %v639_v42  ;;  %v638_v55 = vld [vmem:[%s18170_s22 + $0x8b0] sm:$0xff]  ;;  %v1031_v28 = vld [vmem:[%s18170_s22 + $0x14f8] sm:$0x3] }
 0x28b   : > { %v8697_v62 = vadd.f32 %v8696_v50, %v8627_v54  ;;  %v2396_v50 = vcombine.high %v2394_v38, %v2394_v38  ;;  %v1020_v54 = vld [vmem:[%s18170_s22 + $0x14a0] sm:$0x3]  ;;  %v1022_v56 = vld [vmem:[%s18170_s22 + $0x14b0] sm:$0x3] }
 0x28c   : > { %v17377_v6 = vpack.c.bf16 %v1022_v56, %v638_v55 }
 0x28d   : > { %12405 = vmatmul.mubr.f32.vlgmr.msra.gmra.mrb[130].mxu0 %v2336_v23  ;;  %v2378_v23 = vcombine.high %v2370_v8, %v2370_v8 }
 0x28e   : > { %12475 = vmatmul.mubr.f32.vlgmr.msra.gmra.mrb[130].mxu1 %v2343_v29  ;;  %17350 = vmatpush1.bf16.xpose.msra.mxu0 %v17349_v60  ;;  %v632_v29 = vld [vmem:[%s18170_s22 + $0x880] sm:$0xff]  ;;  %v641_v60 = vld [vmem:[%s18170_s22 + $0x8c8] sm:$0xff] }
 0x28f   : > { %17354 = vmatpush1.bf16.xpose.msra.mxu1 %v17353_v61  ;;  %12544 = vmatprep.mubr.f32.mxu0 %v2361_v63  ;;  %v17365_v45 = vpack.c.bf16 %v1016_v30, %v632_v29  ;;  %v1025_v61 = vld [vmem:[%s18170_s22 + $0x14c8] sm:$0x3]  ;;  %v335_v29 = vld [vmem:[%s18163_s12 + $0x238] sm:$0xff] }
 0x290   : > { %17356 = vmatprep.subr.bf16.mxu0 %v17355_v0  ;;  %v8766_v9 = vpop.f32.mrb[78].mxu0  ;;  %12614 = vmatprep.mubr.f32.mxu1 %v2362_v1  ;;  %v2431_v37 = vcombine.high %v335_v29, %v335_v29  ;;  %v2438_v42 = vrot.slane %v335_v29, %v18194_v25 }
 0x291   : > { %v8836_v10 = vpop.f32.mrb[78].mxu1  ;;  %17360 = vmatprep.subr.bf16.mxu1 %v17359_v2  ;;  %v8767_v14 = vadd.f32 %v8766_v9, %v8697_v62  ;;  %v8768_v15 = vpop.f32.mrb[79].mxu0  ;;  %v2411_v62 = vrot.slane %v2397_v52, %v18194_v25  ;;  %v643_v2 = vld [vmem:[%s18170_s22 + $0x8d8] sm:$0xff]  ;;  %v17379_v9 = vpack.c.bf16 %v1025_v61, %v641_v60 }
 0x292   : > { %v8838_v16 = vpop.f32.mrb[79].mxu1  ;;  %v17383_v11 = vpack.c.bf16 %v1027_v3, %v643_v2  ;;  %v642_v15 = vld [vmem:[%s18170_s22 + $0x8d0] sm:$0xff]  ;;  %v1035_v52 = vld [vmem:[%s18170_s22 + $0x1518] sm:$0x3] }
 0x293   : > { %v8837_v22 = vadd.f32 %v8836_v10, %v8767_v14  ;;  %v2413_v10 = vcombine.high %v2411_v62, %v2411_v62  ;;  %v1024_v14 = vld [vmem:[%s18170_s22 + $0x14c0] sm:$0x3]  ;;  %v1026_v16 = vld [vmem:[%s18170_s22 + $0x14d0] sm:$0x3] }
 0x294   : > { %v17385_v31 = vpack.c.bf16 %v1026_v16, %v642_v15 }
 0x295   : > { %12545 = vmatmul.mubr.f32.vlgmr.msra.gmra.mrb[132].mxu0 %v2353_v48  ;;  %v2395_v48 = vcombine.high %v2387_v33, %v2387_v33 }
 0x296   : > { %12615 = vmatmul.mubr.f32.vlgmr.msra.gmra.mrb[132].mxu1 %v2360_v53  ;;  %17358 = vmatpush1.bf16.xpose.msra.mxu0 %v17357_v20  ;;  %v636_v53 = vld [vmem:[%s18170_s22 + $0x8a0] sm:$0xff]  ;;  %v645_v20 = vld [vmem:[%s18170_s22 + $0x8e8] sm:$0xff] }
 0x297   : > { %17362 = vmatpush1.bf16.xpose.msra.mxu1 %v17361_v21  ;;  %12684 = vmatprep.mubr.f32.mxu0 %v2378_v23  ;;  %v17373_v5 = vpack.c.bf16 %v1020_v54, %v636_v53  ;;  %v1029_v21 = vld [vmem:[%s18170_s22 + $0x14e8] sm:$0x3]  ;;  %v336_v53 = vld [vmem:[%s18163_s12 + $0x240] sm:$0xff] }
 0x298   : > { %17364 = vmatprep.subr.bf16.mxu0 %v17363_v24  ;;  %v8906_v34 = vpop.f32.mrb[80].mxu0  ;;  %12754 = vmatprep.mubr.f32.mxu1 %v2379_v26  ;;  %v2448_v61 = vcombine.high %v336_v53, %v336_v53  ;;  %v2455_v2 = vrot.slane %v336_v53, %v18194_v25 }
 0x299   : > { %v8976_v35 = vpop.f32.mrb[80].mxu1  ;;  %17368 = vmatprep.subr.bf16.mxu1 %v17367_v27  ;;  %v8907_v39 = vadd.f32 %v8906_v34, %v8837_v22  ;;  %v8908_v40 = vpop.f32.mrb[81].mxu0  ;;  %v2428_v22 = vrot.slane %v2414_v12, %v18194_v25  ;;  %v647_v27 = vld [vmem:[%s18170_s22 + $0x8f8] sm:$0xff]  ;;  %v17387_v34 = vpack.c.bf16 %v1029_v21, %v645_v20 }
 0x29a   : > { %v8978_v41 = vpop.f32.mrb[81].mxu1  ;;  %v17391_v36 = vpack.c.bf16 %v1031_v28, %v647_v27  ;;  %v646_v40 = vld [vmem:[%s18170_s22 + $0x8f0] sm:$0xff]  ;;  %v1039_v12 = vld [vmem:[%s18170_s22 + $0x1538] sm:$0x3] }
 0x29b   : > { %v8977_v47 = vadd.f32 %v8976_v35, %v8907_v39  ;;  %v2430_v35 = vcombine.high %v2428_v22, %v2428_v22  ;;  %v1028_v39 = vld [vmem:[%s18170_s22 + $0x14e0] sm:$0x3]  ;;  %v1030_v41 = vld [vmem:[%s18170_s22 + $0x14f0] sm:$0x3] }
 0x29c   : > { %v17393_v55 = vpack.c.bf16 %v1030_v41, %v646_v40 }
 0x29d   : > { %12685 = vmatmul.mubr.f32.vlgmr.msra.gmra.mrb[134].mxu0 %v2370_v8  ;;  %v2412_v8 = vcombine.high %v2404_v57, %v2404_v57 }
 0x29e   : > { %12755 = vmatmul.mubr.f32.vlgmr.msra.gmra.mrb[134].mxu1 %v2377_v13  ;;  %17366 = vmatpush1.bf16.xpose.msra.mxu0 %v17365_v45  ;;  %v640_v13 = vld [vmem:[%s18170_s22 + $0x8c0] sm:$0xff]  ;;  %v649_v45 = vld [vmem:[%s18170_s22 + $0x908] sm:$0xff] }
 0x29f   : > { %17370 = vmatpush1.bf16.xpose.msra.mxu1 %v17369_v46  ;;  %12824 = vmatprep.mubr.f32.mxu0 %v2395_v48  ;;  %v17381_v30 = vpack.c.bf16 %v1024_v14, %v640_v13  ;;  %v1033_v46 = vld [vmem:[%s18170_s22 + $0x1508] sm:$0x3] }
 0x2a0   : > { %17372 = vmatprep.subr.bf16.mxu0 %v17371_v49  ;;  %v9046_v58 = vpop.f32.mrb[82].mxu0  ;;  %12894 = vmatprep.mubr.f32.mxu1 %v2396_v50  ;;  %v337_v13 = vld [vmem:[%s18163_s12 + $0x248] sm:$0xff] }
 0x2a1   : > { %v9116_v59 = vpop.f32.mrb[82].mxu1  ;;  %17376 = vmatprep.subr.bf16.mxu1 %v17375_v51  ;;  %v9047_v63 = vadd.f32 %v9046_v58, %v8977_v47  ;;  %v9048_v0 = vpop.f32.mrb[83].mxu0  ;;  %v2445_v47 = vrot.slane %v2431_v37, %v18194_v25  ;;  %v651_v51 = vld [vmem:[%s18170_s22 + $0x918] sm:$0xff]  ;;  %v17395_v58 = vpack.c.bf16 %v1033_v46, %v649_v45  ;;  %v2465_v21 = vcombine.high %v337_v13, %v337_v13 }
 0x2a2   : > { %v9118_v1 = vpop.f32.mrb[83].mxu1  ;;  %v17399_v60 = vpack.c.bf16 %v1035_v52, %v651_v51  ;;  %v650_v0 = vld [vmem:[%s18170_s22 + $0x910] sm:$0xff]  ;;  %v2472_v27 = vrot.slane %v337_v13, %v18194_v25  ;;  %v1043_v37 = vld [vmem:[%s18170_s22 + $0x1558] sm:$0x3] }
 0x2a3   : > { %v9117_v7 = vadd.f32 %v9116_v59, %v9047_v63  ;;  %v2447_v59 = vcombine.high %v2445_v47, %v2445_v47  ;;  %v1032_v63 = vld [vmem:[%s18170_s22 + $0x1500] sm:$0x3]  ;;  %v1034_v1 = vld [vmem:[%s18170_s22 + $0x1510] sm:$0x3] }
 0x2a4   : > { %v17401_v15 = vpack.c.bf16 %v1034_v1, %v650_v0 }
 0x2a5   : > { %12825 = vmatmul.mubr.f32.vlgmr.msra.gmra.mrb[136].mxu0 %v2387_v33  ;;  %v2429_v33 = vcombine.high %v2421_v17, %v2421_v17 }
 0x2a6   : > { %12895 = vmatmul.mubr.f32.vlgmr.msra.gmra.mrb[136].mxu1 %v2394_v38  ;;  %17374 = vmatpush1.bf16.xpose.msra.mxu0 %v17373_v5  ;;  %v644_v38 = vld [vmem:[%s18170_s22 + $0x8e0] sm:$0xff]  ;;  %v653_v5 = vld [vmem:[%s18170_s22 + $0x928] sm:$0xff] }
 0x2a7   : > { %17378 = vmatpush1.bf16.xpose.msra.mxu1 %v17377_v6  ;;  %12964 = vmatprep.mubr.f32.mxu0 %v2412_v8  ;;  %v17389_v54 = vpack.c.bf16 %v1028_v39, %v644_v38  ;;  %v1037_v6 = vld [vmem:[%s18170_s22 + $0x1528] sm:$0x3]  ;;  %v338_v38 = vld [vmem:[%s18163_s12 + $0x250] sm:$0xff] }
 0x2a8   : > { %17380 = vmatprep.subr.bf16.mxu0 %v17379_v9  ;;  %v9186_v18 = vpop.f32.mrb[84].mxu0  ;;  %13034 = vmatprep.mubr.f32.mxu1 %v2413_v10  ;;  %v2482_v46 = vcombine.high %v338_v38, %v338_v38  ;;  %v2489_v51 = vrot.slane %v338_v38, %v18194_v25 }
 0x2a9   : > { %v9256_v19 = vpop.f32.mrb[84].mxu1  ;;  %17384 = vmatprep.subr.bf16.mxu1 %v17383_v11  ;;  %v9187_v23 = vadd.f32 %v9186_v18, %v9117_v7  ;;  %v9188_v24 = vpop.f32.mrb[85].mxu0  ;;  %v2462_v7 = vrot.slane %v2448_v61, %v18194_v25  ;;  %v655_v11 = vld [vmem:[%s18170_s22 + $0x938] sm:$0xff]  ;;  %v17403_v18 = vpack.c.bf16 %v1037_v6, %v653_v5 }
 0x2aa   : > { %v9258_v26 = vpop.f32.mrb[85].mxu1  ;;  %v17407_v20 = vpack.c.bf16 %v1039_v12, %v655_v11  ;;  %v654_v24 = vld [vmem:[%s18170_s22 + $0x930] sm:$0xff]  ;;  %v1047_v61 = vld [vmem:[%s18170_s22 + $0x1578] sm:$0x3] }
 0x2ab   : > { %v9257_v32 = vadd.f32 %v9256_v19, %v9187_v23  ;;  %v2464_v19 = vcombine.high %v2462_v7, %v2462_v7  ;;  %v1036_v23 = vld [vmem:[%s18170_s22 + $0x1520] sm:$0x3]  ;;  %v1038_v26 = vld [vmem:[%s18170_s22 + $0x1530] sm:$0x3] }
 0x2ac   : > { %v17409_v40 = vpack.c.bf16 %v1038_v26, %v654_v24 }
 0x2ad   : > { %12965 = vmatmul.mubr.f32.vlgmr.msra.gmra.mrb[138].mxu0 %v2404_v57  ;;  %v2446_v57 = vcombine.high %v2438_v42, %v2438_v42 }
 0x2ae   : > { %13035 = vmatmul.mubr.f32.vlgmr.msra.gmra.mrb[138].mxu1 %v2411_v62  ;;  %17382 = vmatpush1.bf16.xpose.msra.mxu0 %v17381_v30  ;;  %v648_v62 = vld [vmem:[%s18170_s22 + $0x900] sm:$0xff]  ;;  %v657_v30 = vld [vmem:[%s18170_s22 + $0x948] sm:$0xff] }
 0x2af   : > { %17386 = vmatpush1.bf16.xpose.msra.mxu1 %v17385_v31  ;;  %13104 = vmatprep.mubr.f32.mxu0 %v2429_v33  ;;  %v17397_v14 = vpack.c.bf16 %v1032_v63, %v648_v62  ;;  %v1041_v31 = vld [vmem:[%s18170_s22 + $0x1548] sm:$0x3]  ;;  %v339_v62 = vld [vmem:[%s18163_s12 + $0x258] sm:$0xff] }
 0x2b0   : > { %17388 = vmatprep.subr.bf16.mxu0 %v17387_v34  ;;  %v9326_v43 = vpop.f32.mrb[86].mxu0  ;;  %13174 = vmatprep.mubr.f32.mxu1 %v2430_v35  ;;  %v2499_v6 = vcombine.high %v339_v62, %v339_v62  ;;  %v2506_v11 = vrot.slane %v339_v62, %v18194_v25 }
 0x2b1   : > { %v9396_v44 = vpop.f32.mrb[86].mxu1  ;;  %17392 = vmatprep.subr.bf16.mxu1 %v17391_v36  ;;  %v9327_v48 = vadd.f32 %v9326_v43, %v9257_v32  ;;  %v9328_v49 = vpop.f32.mrb[87].mxu0  ;;  %v2479_v32 = vrot.slane %v2465_v21, %v18194_v25  ;;  %v659_v36 = vld [vmem:[%s18170_s22 + $0x958] sm:$0xff]  ;;  %v17411_v43 = vpack.c.bf16 %v1041_v31, %v657_v30 }
 0x2b2   : > { %v9398_v50 = vpop.f32.mrb[87].mxu1  ;;  %v17415_v45 = vpack.c.bf16 %v1043_v37, %v659_v36  ;;  %v658_v49 = vld [vmem:[%s18170_s22 + $0x950] sm:$0xff]  ;;  %v1051_v21 = vld [vmem:[%s18170_s22 + $0x1598] sm:$0x3] }
 0x2b3   : > { %v9397_v56 = vadd.f32 %v9396_v44, %v9327_v48  ;;  %v2481_v44 = vcombine.high %v2479_v32, %v2479_v32  ;;  %v1040_v48 = vld [vmem:[%s18170_s22 + $0x1540] sm:$0x3]  ;;  %v1042_v50 = vld [vmem:[%s18170_s22 + $0x1550] sm:$0x3] }
 0x2b4   : > { %v17417_v0 = vpack.c.bf16 %v1042_v50, %v658_v49 }
 0x2b5   : > { %13105 = vmatmul.mubr.f32.vlgmr.msra.gmra.mrb[140].mxu0 %v2421_v17  ;;  %v2463_v17 = vcombine.high %v2455_v2, %v2455_v2 }
 0x2b6   : > { %13175 = vmatmul.mubr.f32.vlgmr.msra.gmra.mrb[140].mxu1 %v2428_v22  ;;  %17390 = vmatpush1.bf16.xpose.msra.mxu0 %v17389_v54  ;;  %v652_v22 = vld [vmem:[%s18170_s22 + $0x920] sm:$0xff]  ;;  %v661_v54 = vld [vmem:[%s18170_s22 + $0x968] sm:$0xff] }
 0x2b7   : > { %17394 = vmatpush1.bf16.xpose.msra.mxu1 %v17393_v55  ;;  %13244 = vmatprep.mubr.f32.mxu0 %v2446_v57  ;;  %v17405_v39 = vpack.c.bf16 %v1036_v23, %v652_v22  ;;  %v1045_v55 = vld [vmem:[%s18170_s22 + $0x1568] sm:$0x3]  ;;  %v340_v22 = vld [vmem:[%s18163_s12 + $0x260] sm:$0xff] }
 0x2b8   : > { %17396 = vmatprep.subr.bf16.mxu0 %v17395_v58  ;;  %v9466_v3 = vpop.f32.mrb[88].mxu0  ;;  %13314 = vmatprep.mubr.f32.mxu1 %v2447_v59  ;;  %v2516_v31 = vcombine.high %v340_v22, %v340_v22  ;;  %v2523_v36 = vrot.slane %v340_v22, %v18194_v25 }
 0x2b9   : > { %v9536_v4 = vpop.f32.mrb[88].mxu1  ;;  %17400 = vmatprep.subr.bf16.mxu1 %v17399_v60  ;;  %v9467_v8 = vadd.f32 %v9466_v3, %v9397_v56  ;;  %v9468_v9 = vpop.f32.mrb[89].mxu0  ;;  %v2496_v56 = vrot.slane %v2482_v46, %v18194_v25  ;;  %v663_v60 = vld [vmem:[%s18170_s22 + $0x978] sm:$0xff]  ;;  %v17419_v3 = vpack.c.bf16 %v1045_v55, %v661_v54 }
 0x2ba   : > { %v9538_v10 = vpop.f32.mrb[89].mxu1  ;;  %v17423_v5 = vpack.c.bf16 %v1047_v61, %v663_v60  ;;  %v662_v9 = vld [vmem:[%s18170_s22 + $0x970] sm:$0xff]  ;;  %v1055_v46 = vld [vmem:[%s18170_s22 + $0x15b8] sm:$0x3] }
 0x2bb   : > { %v9537_v16 = vadd.f32 %v9536_v4, %v9467_v8  ;;  %v2498_v4 = vcombine.high %v2496_v56, %v2496_v56  ;;  %v1044_v8 = vld [vmem:[%s18170_s22 + $0x1560] sm:$0x3]  ;;  %v1046_v10 = vld [vmem:[%s18170_s22 + $0x1570] sm:$0x3] }
 0x2bc   : > { %v17425_v24 = vpack.c.bf16 %v1046_v10, %v662_v9 }
 0x2bd   : > { %13245 = vmatmul.mubr.f32.vlgmr.msra.gmra.mrb[142].mxu0 %v2438_v42  ;;  %v2480_v42 = vcombine.high %v2472_v27, %v2472_v27 }
 0x2be   : > { %13315 = vmatmul.mubr.f32.vlgmr.msra.gmra.mrb[142].mxu1 %v2445_v47  ;;  %17398 = vmatpush1.bf16.xpose.msra.mxu0 %v17397_v14  ;;  %v656_v47 = vld [vmem:[%s18170_s22 + $0x940] sm:$0xff]  ;;  %v665_v14 = vld [vmem:[%s18170_s22 + $0x988] sm:$0xff] }
 0x2bf   : > { %17402 = vmatpush1.bf16.xpose.msra.mxu1 %v17401_v15  ;;  %13384 = vmatprep.mubr.f32.mxu0 %v2463_v17  ;;  %v17413_v63 = vpack.c.bf16 %v1040_v48, %v656_v47  ;;  %v1049_v15 = vld [vmem:[%s18170_s22 + $0x1588] sm:$0x3] }
 0x2c0   : > { %17404 = vmatprep.subr.bf16.mxu0 %v17403_v18  ;;  %v9606_v28 = vpop.f32.mrb[90].mxu0  ;;  %13454 = vmatprep.mubr.f32.mxu1 %v2464_v19  ;;  %v341_v47 = vld [vmem:[%s18163_s12 + $0x268] sm:$0xff] }
 0x2c1   : > { %v9676_v29 = vpop.f32.mrb[90].mxu1  ;;  %17408 = vmatprep.subr.bf16.mxu1 %v17407_v20  ;;  %v9607_v33 = vadd.f32 %v9606_v28, %v9537_v16  ;;  %v9608_v34 = vpop.f32.mrb[91].mxu0  ;;  %v2513_v16 = vrot.slane %v2499_v6, %v18194_v25  ;;  %v667_v20 = vld [vmem:[%s18170_s22 + $0x998] sm:$0xff]  ;;  %v17427_v28 = vpack.c.bf16 %v1049_v15, %v665_v14  ;;  %v2533_v55 = vcombine.high %v341_v47, %v341_v47 }
 0x2c2   : > { %v9678_v35 = vpop.f32.mrb[91].mxu1  ;;  %v17431_v30 = vpack.c.bf16 %v1051_v21, %v667_v20  ;;  %v666_v34 = vld [vmem:[%s18170_s22 + $0x990] sm:$0xff]  ;;  %v2540_v60 = vrot.slane %v341_v47, %v18194_v25  ;;  %v1059_v6 = vld [vmem:[%s18170_s22 + $0x15d8] sm:$0x3] }
 0x2c3   : > { %v9677_v41 = vadd.f32 %v9676_v29, %v9607_v33  ;;  %v2515_v29 = vcombine.high %v2513_v16, %v2513_v16  ;;  %v1048_v33 = vld [vmem:[%s18170_s22 + $0x1580] sm:$0x3]  ;;  %v1050_v35 = vld [vmem:[%s18170_s22 + $0x1590] sm:$0x3] }
 0x2c4   : > { %v17433_v49 = vpack.c.bf16 %v1050_v35, %v666_v34 }
 0x2c5   : > { %13385 = vmatmul.mubr.f32.vlgmr.msra.gmra.mrb[144].mxu0 %v2455_v2  ;;  %v2497_v2 = vcombine.high %v2489_v51, %v2489_v51 }
 0x2c6   : > { %13455 = vmatmul.mubr.f32.vlgmr.msra.gmra.mrb[144].mxu1 %v2462_v7  ;;  %17406 = vmatpush1.bf16.xpose.msra.mxu0 %v17405_v39  ;;  %v660_v7 = vld [vmem:[%s18170_s22 + $0x960] sm:$0xff]  ;;  %v669_v39 = vld [vmem:[%s18170_s22 + $0x9a8] sm:$0xff] }
 0x2c7   : > { %17410 = vmatpush1.bf16.xpose.msra.mxu1 %v17409_v40  ;;  %13524 = vmatprep.mubr.f32.mxu0 %v2480_v42  ;;  %v17421_v23 = vpack.c.bf16 %v1044_v8, %v660_v7  ;;  %v1053_v40 = vld [vmem:[%s18170_s22 + $0x15a8] sm:$0x3]  ;;  %v342_v7 = vld [vmem:[%s18163_s12 + $0x270] sm:$0xff] }
 0x2c8   : > { %17412 = vmatprep.subr.bf16.mxu0 %v17411_v43  ;;  %v9746_v52 = vpop.f32.mrb[92].mxu0  ;;  %13594 = vmatprep.mubr.f32.mxu1 %v2481_v44  ;;  %v2550_v15 = vcombine.high %v342_v7, %v342_v7  ;;  %v2557_v20 = vrot.slane %v342_v7, %v18194_v25 }
 0x2c9   : > { %v9816_v53 = vpop.f32.mrb[92].mxu1  ;;  %17416 = vmatprep.subr.bf16.mxu1 %v17415_v45  ;;  %v9747_v57 = vadd.f32 %v9746_v52, %v9677_v41  ;;  %v9748_v58 = vpop.f32.mrb[93].mxu0  ;;  %v2530_v41 = vrot.slane %v2516_v31, %v18194_v25  ;;  %v671_v45 = vld [vmem:[%s18170_s22 + $0x9b8] sm:$0xff]  ;;  %v17435_v52 = vpack.c.bf16 %v1053_v40, %v669_v39 }
 0x2ca   : > { %v9818_v59 = vpop.f32.mrb[93].mxu1  ;;  %v17439_v54 = vpack.c.bf16 %v1055_v46, %v671_v45  ;;  %v670_v58 = vld [vmem:[%s18170_s22 + $0x9b0] sm:$0xff]  ;;  %v1063_v31 = vld [vmem:[%s18170_s22 + $0x15f8] sm:$0x3] }
 0x2cb   : > { %v9817_v1 = vadd.f32 %v9816_v53, %v9747_v57  ;;  %v2532_v53 = vcombine.high %v2530_v41, %v2530_v41  ;;  %v1052_v57 = vld [vmem:[%s18170_s22 + $0x15a0] sm:$0x3]  ;;  %v1054_v59 = vld [vmem:[%s18170_s22 + $0x15b0] sm:$0x3] }
 0x2cc   : > { %v17441_v9 = vpack.c.bf16 %v1054_v59, %v670_v58 }
 0x2cd   : > { %13525 = vmatmul.mubr.f32.vlgmr.msra.gmra.mrb[146].mxu0 %v2472_v27  ;;  %v2514_v27 = vcombine.high %v2506_v11, %v2506_v11 }
 0x2ce   : > { %13595 = vmatmul.mubr.f32.vlgmr.msra.gmra.mrb[146].mxu1 %v2479_v32  ;;  %17414 = vmatpush1.bf16.xpose.msra.mxu0 %v17413_v63  ;;  %v664_v32 = vld [vmem:[%s18170_s22 + $0x980] sm:$0xff]  ;;  %v673_v63 = vld [vmem:[%s18170_s22 + $0x9c8] sm:$0xff] }
 0x2cf   : > { %17418 = vmatpush1.bf16.xpose.msra.mxu1 %v17417_v0  ;;  %13664 = vmatprep.mubr.f32.mxu0 %v2497_v2  ;;  %v17429_v48 = vpack.c.bf16 %v1048_v33, %v664_v32  ;;  %v1057_v0 = vld [vmem:[%s18170_s22 + $0x15c8] sm:$0x3]  ;;  %v343_v32 = vld [vmem:[%s18163_s12 + $0x278] sm:$0xff] }
 0x2d0   : > { %17420 = vmatprep.subr.bf16.mxu0 %v17419_v3  ;;  %v9886_v12 = vpop.f32.mrb[94].mxu0  ;;  %13734 = vmatprep.mubr.f32.mxu1 %v2498_v4  ;;  %v2567_v40 = vcombine.high %v343_v32, %v343_v32  ;;  %v2574_v45 = vrot.slane %v343_v32, %v18194_v25 }
 0x2d1   : > { %v9956_v13 = vpop.f32.mrb[94].mxu1  ;;  %17424 = vmatprep.subr.bf16.mxu1 %v17423_v5  ;;  %v9887_v17 = vadd.f32 %v9886_v12, %v9817_v1  ;;  %v9888_v18 = vpop.f32.mrb[95].mxu0  ;;  %v2547_v1 = vrot.slane %v2533_v55, %v18194_v25  ;;  %v675_v5 = vld [vmem:[%s18170_s22 + $0x9d8] sm:$0xff]  ;;  %v17443_v12 = vpack.c.bf16 %v1057_v0, %v673_v63 }
 0x2d2   : > { %v9958_v19 = vpop.f32.mrb[95].mxu1  ;;  %v17447_v14 = vpack.c.bf16 %v1059_v6, %v675_v5  ;;  %v674_v18 = vld [vmem:[%s18170_s22 + $0x9d0] sm:$0xff]  ;;  %v1067_v55 = vld [vmem:[%s18170_s22 + $0x1618] sm:$0x3] }
 0x2d3   : > { %v9957_v26 = vadd.f32 %v9956_v13, %v9887_v17  ;;  %v2549_v13 = vcombine.high %v2547_v1, %v2547_v1  ;;  %v1056_v17 = vld [vmem:[%s18170_s22 + $0x15c0] sm:$0x3]  ;;  %v1058_v19 = vld [vmem:[%s18170_s22 + $0x15d0] sm:$0x3] }
 0x2d4   : > { %v17449_v34 = vpack.c.bf16 %v1058_v19, %v674_v18 }
 0x2d5   : > { %13665 = vmatmul.mubr.f32.vlgmr.msra.gmra.mrb[148].mxu0 %v2489_v51  ;;  %v2531_v51 = vcombine.high %v2523_v36, %v2523_v36 }
 0x2d6   : > { %13735 = vmatmul.mubr.f32.vlgmr.msra.gmra.mrb[148].mxu1 %v2496_v56  ;;  %17422 = vmatpush1.bf16.xpose.msra.mxu0 %v17421_v23  ;;  %v668_v56 = vld [vmem:[%s18170_s22 + $0x9a0] sm:$0xff]  ;;  %v677_v23 = vld [vmem:[%s18170_s22 + $0x9e8] sm:$0xff] }
 0x2d7   : > { %17426 = vmatpush1.bf16.xpose.msra.mxu1 %v17425_v24  ;;  %13804 = vmatprep.mubr.f32.mxu0 %v2514_v27  ;;  %v17437_v8 = vpack.c.bf16 %v1052_v57, %v668_v56  ;;  %v1061_v24 = vld [vmem:[%s18170_s22 + $0x15e8] sm:$0x3]  ;;  %v344_v56 = vld [vmem:[%s18163_s12 + $0x280] sm:$0xff] }
 0x2d8   : > { %17428 = vmatprep.subr.bf16.mxu0 %v17427_v28  ;;  %v10026_v37 = vpop.f32.mrb[96].mxu0  ;;  %13874 = vmatprep.mubr.f32.mxu1 %v2515_v29  ;;  %v2584_v0 = vcombine.high %v344_v56, %v344_v56  ;;  %v2591_v5 = vrot.slane %v344_v56, %v18194_v25 }
 0x2d9   : > { %v10096_v38 = vpop.f32.mrb[96].mxu1  ;;  %17432 = vmatprep.subr.bf16.mxu1 %v17431_v30  ;;  %v10027_v42 = vadd.f32 %v10026_v37, %v9957_v26  ;;  %v10028_v43 = vpop.f32.mrb[97].mxu0  ;;  %v2564_v26 = vrot.slane %v2550_v15, %v18194_v25  ;;  %v679_v30 = vld [vmem:[%s18170_s22 + $0x9f8] sm:$0xff]  ;;  %v17451_v37 = vpack.c.bf16 %v1061_v24, %v677_v23 }
 0x2da   : > { %v10098_v44 = vpop.f32.mrb[97].mxu1  ;;  %v17455_v39 = vpack.c.bf16 %v1063_v31, %v679_v30  ;;  %v678_v43 = vld [vmem:[%s18170_s22 + $0x9f0] sm:$0xff]  ;;  %v1071_v15 = vld [vmem:[%s18170_s22 + $0x1638] sm:$0x3] }
 0x2db   : > { %v10097_v50 = vadd.f32 %v10096_v38, %v10027_v42  ;;  %v2566_v38 = vcombine.high %v2564_v26, %v2564_v26  ;;  %v1060_v42 = vld [vmem:[%s18170_s22 + $0x15e0] sm:$0x3]  ;;  %v1062_v44 = vld [vmem:[%s18170_s22 + $0x15f0] sm:$0x3] }
 0x2dc   : > { %v17457_v58 = vpack.c.bf16 %v1062_v44, %v678_v43 }
 0x2dd   : > { %13805 = vmatmul.mubr.f32.vlgmr.msra.gmra.mrb[150].mxu0 %v2506_v11  ;;  %v2548_v11 = vcombine.high %v2540_v60, %v2540_v60 }
 0x2de   : > { %13875 = vmatmul.mubr.f32.vlgmr.msra.gmra.mrb[150].mxu1 %v2513_v16  ;;  %17430 = vmatpush1.bf16.xpose.msra.mxu0 %v17429_v48  ;;  %v672_v16 = vld [vmem:[%s18170_s22 + $0x9c0] sm:$0xff]  ;;  %v681_v48 = vld [vmem:[%s18170_s22 + $0xa08] sm:$0xff] }
 0x2df   : > { %17434 = vmatpush1.bf16.xpose.msra.mxu1 %v17433_v49  ;;  %13944 = vmatprep.mubr.f32.mxu0 %v2531_v51  ;;  %v17445_v33 = vpack.c.bf16 %v1056_v17, %v672_v16  ;;  %v1065_v49 = vld [vmem:[%s18170_s22 + $0x1608] sm:$0x3] }
 0x2e0   : > { %17436 = vmatprep.subr.bf16.mxu0 %v17435_v52  ;;  %v10166_v61 = vpop.f32.mrb[98].mxu0  ;;  %14014 = vmatprep.mubr.f32.mxu1 %v2532_v53  ;;  %v345_v16 = vld [vmem:[%s18163_s12 + $0x288] sm:$0xff] }
 0x2e1   : > { %v10236_v62 = vpop.f32.mrb[98].mxu1  ;;  %17440 = vmatprep.subr.bf16.mxu1 %v17439_v54  ;;  %v10167_v2 = vadd.f32 %v10166_v61, %v10097_v50  ;;  %v10168_v3 = vpop.f32.mrb[99].mxu0  ;;  %v2581_v50 = vrot.slane %v2567_v40, %v18194_v25  ;;  %v683_v54 = vld [vmem:[%s18170_s22 + $0xa18] sm:$0xff]  ;;  %v17459_v61 = vpack.c.bf16 %v1065_v49, %v681_v48  ;;  %v2601_v24 = vcombine.high %v345_v16, %v345_v16 }
 0x2e2   : > { %v10238_v4 = vpop.f32.mrb[99].mxu1  ;;  %v17463_v63 = vpack.c.bf16 %v1067_v55, %v683_v54  ;;  %v682_v3 = vld [vmem:[%s18170_s22 + $0xa10] sm:$0xff]  ;;  %v2608_v30 = vrot.slane %v345_v16, %v18194_v25  ;;  %v1075_v40 = vld [vmem:[%s18170_s22 + $0x1658] sm:$0x3] }
 0x2e3   : > { %v10237_v10 = vadd.f32 %v10236_v62, %v10167_v2  ;;  %v2583_v62 = vcombine.high %v2581_v50, %v2581_v50  ;;  %v1064_v2 = vld [vmem:[%s18170_s22 + $0x1600] sm:$0x3]  ;;  %v1066_v4 = vld [vmem:[%s18170_s22 + $0x1610] sm:$0x3] }
 0x2e4   : > { %v17465_v18 = vpack.c.bf16 %v1066_v4, %v682_v3 }
 0x2e5   : > { %13945 = vmatmul.mubr.f32.vlgmr.msra.gmra.mrb[152].mxu0 %v2523_v36  ;;  %v2565_v36 = vcombine.high %v2557_v20, %v2557_v20 }
 0x2e6   : > { %14015 = vmatmul.mubr.f32.vlgmr.msra.gmra.mrb[152].mxu1 %v2530_v41  ;;  %17438 = vmatpush1.bf16.xpose.msra.mxu0 %v17437_v8  ;;  %v676_v41 = vld [vmem:[%s18170_s22 + $0x9e0] sm:$0xff]  ;;  %v685_v8 = vld [vmem:[%s18170_s22 + $0xa28] sm:$0xff] }
 0x2e7   : > { %17442 = vmatpush1.bf16.xpose.msra.mxu1 %v17441_v9  ;;  %14084 = vmatprep.mubr.f32.mxu0 %v2548_v11  ;;  %v17453_v57 = vpack.c.bf16 %v1060_v42, %v676_v41  ;;  %v1069_v9 = vld [vmem:[%s18170_s22 + $0x1628] sm:$0x3]  ;;  %v346_v41 = vld [vmem:[%s18163_s12 + $0x290] sm:$0xff] }
 0x2e8   : > { %17444 = vmatprep.subr.bf16.mxu0 %v17443_v12  ;;  %v10306_v21 = vpop.f32.mrb[100].mxu0  ;;  %14154 = vmatprep.mubr.f32.mxu1 %v2549_v13  ;;  %v2618_v49 = vcombine.high %v346_v41, %v346_v41  ;;  %v2625_v54 = vrot.slane %v346_v41, %v18194_v25 }
 0x2e9   : > { %v10376_v22 = vpop.f32.mrb[100].mxu1  ;;  %17448 = vmatprep.subr.bf16.mxu1 %v17447_v14  ;;  %v10307_v27 = vadd.f32 %v10306_v21, %v10237_v10  ;;  %v10308_v28 = vpop.f32.mrb[101].mxu0  ;;  %v2598_v10 = vrot.slane %v2584_v0, %v18194_v25  ;;  %v687_v14 = vld [vmem:[%s18170_s22 + $0xa38] sm:$0xff]  ;;  %v17467_v21 = vpack.c.bf16 %v1069_v9, %v685_v8 }
 0x2ea   : > { %v10378_v29 = vpop.f32.mrb[101].mxu1  ;;  %v17471_v23 = vpack.c.bf16 %v1071_v15, %v687_v14  ;;  %v686_v28 = vld [vmem:[%s18170_s22 + $0xa30] sm:$0xff]  ;;  %v1079_v0 = vld [vmem:[%s18170_s22 + $0x1678] sm:$0x3] }
 0x2eb   : > { %v10377_v35 = vadd.f32 %v10376_v22, %v10307_v27  ;;  %v2600_v22 = vcombine.high %v2598_v10, %v2598_v10  ;;  %v1068_v27 = vld [vmem:[%s18170_s22 + $0x1620] sm:$0x3]  ;;  %v1070_v29 = vld [vmem:[%s18170_s22 + $0x1630] sm:$0x3] }
 0x2ec   : > { %v17473_v43 = vpack.c.bf16 %v1070_v29, %v686_v28 }
 0x2ed   : > { %14085 = vmatmul.mubr.f32.vlgmr.msra.gmra.mrb[154].mxu0 %v2540_v60  ;;  %v2582_v60 = vcombine.high %v2574_v45, %v2574_v45 }
 0x2ee   : > { %14155 = vmatmul.mubr.f32.vlgmr.msra.gmra.mrb[154].mxu1 %v2547_v1  ;;  %17446 = vmatpush1.bf16.xpose.msra.mxu0 %v17445_v33  ;;  %v680_v1 = vld [vmem:[%s18170_s22 + $0xa00] sm:$0xff]  ;;  %v689_v33 = vld [vmem:[%s18170_s22 + $0xa48] sm:$0xff] }
 0x2ef   : > { %17450 = vmatpush1.bf16.xpose.msra.mxu1 %v17449_v34  ;;  %14224 = vmatprep.mubr.f32.mxu0 %v2565_v36  ;;  %v17461_v17 = vpack.c.bf16 %v1064_v2, %v680_v1  ;;  %v1073_v34 = vld [vmem:[%s18170_s22 + $0x1648] sm:$0x3]  ;;  %v347_v1 = vld [vmem:[%s18163_s12 + $0x298] sm:$0xff] }
 0x2f0   : > { %17452 = vmatprep.subr.bf16.mxu0 %v17451_v37  ;;  %v10446_v46 = vpop.f32.mrb[102].mxu0  ;;  %14294 = vmatprep.mubr.f32.mxu1 %v2566_v38  ;;  %v2635_v9 = vcombine.high %v347_v1, %v347_v1  ;;  %v2642_v14 = vrot.slane %v347_v1, %v18194_v25 }
 0x2f1   : > { %v10516_v47 = vpop.f32.mrb[102].mxu1  ;;  %17456 = vmatprep.subr.bf16.mxu1 %v17455_v39  ;;  %v10447_v51 = vadd.f32 %v10446_v46, %v10377_v35  ;;  %v10448_v52 = vpop.f32.mrb[103].mxu0  ;;  %v2615_v35 = vrot.slane %v2601_v24, %v18194_v25  ;;  %v691_v39 = vld [vmem:[%s18170_s22 + $0xa58] sm:$0xff]  ;;  %v17475_v46 = vpack.c.bf16 %v1073_v34, %v689_v33 }
 0x2f2   : > { %v10518_v53 = vpop.f32.mrb[103].mxu1  ;;  %v17479_v48 = vpack.c.bf16 %v1075_v40, %v691_v39  ;;  %v690_v52 = vld [vmem:[%s18170_s22 + $0xa50] sm:$0xff]  ;;  %v1083_v24 = vld [vmem:[%s18170_s22 + $0x1698] sm:$0x3] }
 0x2f3   : > { %v10517_v59 = vadd.f32 %v10516_v47, %v10447_v51  ;;  %v2617_v47 = vcombine.high %v2615_v35, %v2615_v35  ;;  %v1072_v51 = vld [vmem:[%s18170_s22 + $0x1640] sm:$0x3]  ;;  %v1074_v53 = vld [vmem:[%s18170_s22 + $0x1650] sm:$0x3] }
 0x2f4   : > { %v17481_v3 = vpack.c.bf16 %v1074_v53, %v690_v52 }
 0x2f5   : > { %14225 = vmatmul.mubr.f32.vlgmr.msra.gmra.mrb[156].mxu0 %v2557_v20  ;;  %v2599_v20 = vcombine.high %v2591_v5, %v2591_v5 }
 0x2f6   : > { %14295 = vmatmul.mubr.f32.vlgmr.msra.gmra.mrb[156].mxu1 %v2564_v26  ;;  %17454 = vmatpush1.bf16.xpose.msra.mxu0 %v17453_v57  ;;  %v684_v26 = vld [vmem:[%s18170_s22 + $0xa20] sm:$0xff]  ;;  %v693_v57 = vld [vmem:[%s18170_s22 + $0xa68] sm:$0xff] }
 0x2f7   : > { %17458 = vmatpush1.bf16.xpose.msra.mxu1 %v17457_v58  ;;  %14364 = vmatprep.mubr.f32.mxu0 %v2582_v60  ;;  %v17469_v42 = vpack.c.bf16 %v1068_v27, %v684_v26  ;;  %v1077_v58 = vld [vmem:[%s18170_s22 + $0x1668] sm:$0x3]  ;;  %v348_v26 = vld [vmem:[%s18163_s12 + $0x2a0] sm:$0xff] }
 0x2f8   : > { %17460 = vmatprep.subr.bf16.mxu0 %v17459_v61  ;;  %v10586_v6 = vpop.f32.mrb[104].mxu0  ;;  %14434 = vmatprep.mubr.f32.mxu1 %v2583_v62  ;;  %v2652_v34 = vcombine.high %v348_v26, %v348_v26  ;;  %v2659_v39 = vrot.slane %v348_v26, %v18194_v25 }
 0x2f9   : > { %v10656_v7 = vpop.f32.mrb[104].mxu1  ;;  %17464 = vmatprep.subr.bf16.mxu1 %v17463_v63  ;;  %v10587_v11 = vadd.f32 %v10586_v6, %v10517_v59  ;;  %v10588_v12 = vpop.f32.mrb[105].mxu0  ;;  %v2632_v59 = vrot.slane %v2618_v49, %v18194_v25  ;;  %v695_v63 = vld [vmem:[%s18170_s22 + $0xa78] sm:$0xff]  ;;  %v17483_v6 = vpack.c.bf16 %v1077_v58, %v693_v57 }
 0x2fa   : > { %v10658_v13 = vpop.f32.mrb[105].mxu1  ;;  %v17487_v8 = vpack.c.bf16 %v1079_v0, %v695_v63  ;;  %v694_v12 = vld [vmem:[%s18170_s22 + $0xa70] sm:$0xff]  ;;  %v1087_v49 = vld [vmem:[%s18170_s22 + $0x16b8] sm:$0x3] }
 0x2fb   : > { %v10657_v19 = vadd.f32 %v10656_v7, %v10587_v11  ;;  %v2634_v7 = vcombine.high %v2632_v59, %v2632_v59  ;;  %v1076_v11 = vld [vmem:[%s18170_s22 + $0x1660] sm:$0x3]  ;;  %v1078_v13 = vld [vmem:[%s18170_s22 + $0x1670] sm:$0x3] }
 0x2fc   : > { %v17489_v28 = vpack.c.bf16 %v1078_v13, %v694_v12 }
 0x2fd   : > { %14365 = vmatmul.mubr.f32.vlgmr.msra.gmra.mrb[158].mxu0 %v2574_v45  ;;  %v2616_v45 = vcombine.high %v2608_v30, %v2608_v30 }
 0x2fe   : > { %14435 = vmatmul.mubr.f32.vlgmr.msra.gmra.mrb[158].mxu1 %v2581_v50  ;;  %17462 = vmatpush1.bf16.xpose.msra.mxu0 %v17461_v17  ;;  %v688_v50 = vld [vmem:[%s18170_s22 + $0xa40] sm:$0xff]  ;;  %v697_v17 = vld [vmem:[%s18170_s22 + $0xa88] sm:$0xff] }
 0x2ff   : > { %17466 = vmatpush1.bf16.xpose.msra.mxu1 %v17465_v18  ;;  %14504 = vmatprep.mubr.f32.mxu0 %v2599_v20  ;;  %v17477_v2 = vpack.c.bf16 %v1072_v51, %v688_v50  ;;  %v1081_v18 = vld [vmem:[%s18170_s22 + $0x1688] sm:$0x3] }
 0x300   : > { %17468 = vmatprep.subr.bf16.mxu0 %v17467_v21  ;;  %v10726_v31 = vpop.f32.mrb[106].mxu0  ;;  %14574 = vmatprep.mubr.f32.mxu1 %v2600_v22  ;;  %v349_v50 = vld [vmem:[%s18163_s12 + $0x2a8] sm:$0xff] }
 0x301   : > { %v10796_v32 = vpop.f32.mrb[106].mxu1  ;;  %17472 = vmatprep.subr.bf16.mxu1 %v17471_v23  ;;  %v10727_v36 = vadd.f32 %v10726_v31, %v10657_v19  ;;  %v10728_v37 = vpop.f32.mrb[107].mxu0  ;;  %v2649_v19 = vrot.slane %v2635_v9, %v18194_v25  ;;  %v699_v23 = vld [vmem:[%s18170_s22 + $0xa98] sm:$0xff]  ;;  %v17491_v31 = vpack.c.bf16 %v1081_v18, %v697_v17  ;;  %v2669_v58 = vcombine.high %v349_v50, %v349_v50 }
 0x302   : > { %v10798_v38 = vpop.f32.mrb[107].mxu1  ;;  %v17495_v33 = vpack.c.bf16 %v1083_v24, %v699_v23  ;;  %v698_v37 = vld [vmem:[%s18170_s22 + $0xa90] sm:$0xff]  ;;  %v2676_v63 = vrot.slane %v349_v50, %v18194_v25  ;;  %v1091_v9 = vld [vmem:[%s18170_s22 + $0x16d8] sm:$0x3] }
 0x303   : > { %v10797_v44 = vadd.f32 %v10796_v32, %v10727_v36  ;;  %v2651_v32 = vcombine.high %v2649_v19, %v2649_v19  ;;  %v1080_v36 = vld [vmem:[%s18170_s22 + $0x1680] sm:$0x3]  ;;  %v1082_v38 = vld [vmem:[%s18170_s22 + $0x1690] sm:$0x3] }
 0x304   : > { %v17497_v52 = vpack.c.bf16 %v1082_v38, %v698_v37 }
 0x305   : > { %14505 = vmatmul.mubr.f32.vlgmr.msra.gmra.mrb[160].mxu0 %v2591_v5  ;;  %v2633_v5 = vcombine.high %v2625_v54, %v2625_v54 }
 0x306   : > { %14575 = vmatmul.mubr.f32.vlgmr.msra.gmra.mrb[160].mxu1 %v2598_v10  ;;  %17470 = vmatpush1.bf16.xpose.msra.mxu0 %v17469_v42  ;;  %v692_v10 = vld [vmem:[%s18170_s22 + $0xa60] sm:$0xff]  ;;  %v701_v42 = vld [vmem:[%s18170_s22 + $0xaa8] sm:$0xff] }
 0x307   : > { %17474 = vmatpush1.bf16.xpose.msra.mxu1 %v17473_v43  ;;  %14644 = vmatprep.mubr.f32.mxu0 %v2616_v45  ;;  %v17485_v27 = vpack.c.bf16 %v1076_v11, %v692_v10  ;;  %v1085_v43 = vld [vmem:[%s18170_s22 + $0x16a8] sm:$0x3]  ;;  %v350_v10 = vld [vmem:[%s18163_s12 + $0x2b0] sm:$0xff] }
 0x308   : > { %17476 = vmatprep.subr.bf16.mxu0 %v17475_v46  ;;  %v10866_v55 = vpop.f32.mrb[108].mxu0  ;;  %14714 = vmatprep.mubr.f32.mxu1 %v2617_v47  ;;  %v2686_v18 = vcombine.high %v350_v10, %v350_v10  ;;  %v2693_v23 = vrot.slane %v350_v10, %v18194_v25 }
 0x309   : > { %v10936_v56 = vpop.f32.mrb[108].mxu1  ;;  %17480 = vmatprep.subr.bf16.mxu1 %v17479_v48  ;;  %v10867_v60 = vadd.f32 %v10866_v55, %v10797_v44  ;;  %v10868_v61 = vpop.f32.mrb[109].mxu0  ;;  %v2666_v44 = vrot.slane %v2652_v34, %v18194_v25  ;;  %v703_v48 = vld [vmem:[%s18170_s22 + $0xab8] sm:$0xff]  ;;  %v17499_v55 = vpack.c.bf16 %v1085_v43, %v701_v42 }
 0x30a   : > { %v10938_v62 = vpop.f32.mrb[109].mxu1  ;;  %v17503_v57 = vpack.c.bf16 %v1087_v49, %v703_v48  ;;  %v702_v61 = vld [vmem:[%s18170_s22 + $0xab0] sm:$0xff]  ;;  %v1095_v34 = vld [vmem:[%s18170_s22 + $0x16f8] sm:$0x3] }
 0x30b   : > { %v10937_v4 = vadd.f32 %v10936_v56, %v10867_v60  ;;  %v2668_v56 = vcombine.high %v2666_v44, %v2666_v44  ;;  %v1084_v60 = vld [vmem:[%s18170_s22 + $0x16a0] sm:$0x3]  ;;  %v1086_v62 = vld [vmem:[%s18170_s22 + $0x16b0] sm:$0x3] }
 0x30c   : > { %v17505_v12 = vpack.c.bf16 %v1086_v62, %v702_v61 }
 0x30d   : > { %14645 = vmatmul.mubr.f32.vlgmr.msra.gmra.mrb[162].mxu0 %v2608_v30  ;;  %v2650_v30 = vcombine.high %v2642_v14, %v2642_v14 }
 0x30e   : > { %14715 = vmatmul.mubr.f32.vlgmr.msra.gmra.mrb[162].mxu1 %v2615_v35  ;;  %17478 = vmatpush1.bf16.xpose.msra.mxu0 %v17477_v2  ;;  %v696_v35 = vld [vmem:[%s18170_s22 + $0xa80] sm:$0xff]  ;;  %v705_v2 = vld [vmem:[%s18170_s22 + $0xac8] sm:$0xff] }
 0x30f   : > { %17482 = vmatpush1.bf16.xpose.msra.mxu1 %v17481_v3  ;;  %14784 = vmatprep.mubr.f32.mxu0 %v2633_v5  ;;  %v17493_v51 = vpack.c.bf16 %v1080_v36, %v696_v35  ;;  %v1089_v3 = vld [vmem:[%s18170_s22 + $0x16c8] sm:$0x3]  ;;  %v351_v35 = vld [vmem:[%s18163_s12 + $0x2b8] sm:$0xff] }
 0x310   : > { %17484 = vmatprep.subr.bf16.mxu0 %v17483_v6  ;;  %v11006_v15 = vpop.f32.mrb[110].mxu0  ;;  %14854 = vmatprep.mubr.f32.mxu1 %v2634_v7  ;;  %v2703_v43 = vcombine.high %v351_v35, %v351_v35  ;;  %v2710_v48 = vrot.slane %v351_v35, %v18194_v25 }
 0x311   : > { %v11076_v16 = vpop.f32.mrb[110].mxu1  ;;  %17488 = vmatprep.subr.bf16.mxu1 %v17487_v8  ;;  %v11007_v20 = vadd.f32 %v11006_v15, %v10937_v4  ;;  %v11008_v21 = vpop.f32.mrb[111].mxu0  ;;  %v2683_v4 = vrot.slane %v2669_v58, %v18194_v25  ;;  %v707_v8 = vld [vmem:[%s18170_s22 + $0xad8] sm:$0xff]  ;;  %v17507_v15 = vpack.c.bf16 %v1089_v3, %v705_v2 }
 0x312   : > { %v11078_v22 = vpop.f32.mrb[111].mxu1  ;;  %v17511_v17 = vpack.c.bf16 %v1091_v9, %v707_v8  ;;  %v706_v21 = vld [vmem:[%s18170_s22 + $0xad0] sm:$0xff]  ;;  %v1099_v58 = vld [vmem:[%s18170_s22 + $0x1718] sm:$0x3] }
 0x313   : > { %v11077_v29 = vadd.f32 %v11076_v16, %v11007_v20  ;;  %v2685_v16 = vcombine.high %v2683_v4, %v2683_v4  ;;  %v1088_v20 = vld [vmem:[%s18170_s22 + $0x16c0] sm:$0x3]  ;;  %v1090_v22 = vld [vmem:[%s18170_s22 + $0x16d0] sm:$0x3] }
 0x314   : > { %v17513_v37 = vpack.c.bf16 %v1090_v22, %v706_v21 }
 0x315   : > { %14785 = vmatmul.mubr.f32.vlgmr.msra.gmra.mrb[164].mxu0 %v2625_v54  ;;  %v2667_v54 = vcombine.high %v2659_v39, %v2659_v39 }
 0x316   : > { %14855 = vmatmul.mubr.f32.vlgmr.msra.gmra.mrb[164].mxu1 %v2632_v59  ;;  %17486 = vmatpush1.bf16.xpose.msra.mxu0 %v17485_v27  ;;  %v700_v59 = vld [vmem:[%s18170_s22 + $0xaa0] sm:$0xff]  ;;  %v709_v27 = vld [vmem:[%s18170_s22 + $0xae8] sm:$0xff] }
 0x317   : > { %17490 = vmatpush1.bf16.xpose.msra.mxu1 %v17489_v28  ;;  %14924 = vmatprep.mubr.f32.mxu0 %v2650_v30  ;;  %v17501_v11 = vpack.c.bf16 %v1084_v60, %v700_v59  ;;  %v1093_v28 = vld [vmem:[%s18170_s22 + $0x16e8] sm:$0x3]  ;;  %v352_v59 = vld [vmem:[%s18163_s12 + $0x2c0] sm:$0xff] }
 0x318   : > { %17492 = vmatprep.subr.bf16.mxu0 %v17491_v31  ;;  %v11146_v40 = vpop.f32.mrb[112].mxu0  ;;  %14994 = vmatprep.mubr.f32.mxu1 %v2651_v32  ;;  %v2720_v3 = vcombine.high %v352_v59, %v352_v59  ;;  %v2727_v8 = vrot.slane %v352_v59, %v18194_v25 }
 0x319   : > { %v11216_v41 = vpop.f32.mrb[112].mxu1  ;;  %17496 = vmatprep.subr.bf16.mxu1 %v17495_v33  ;;  %v11147_v45 = vadd.f32 %v11146_v40, %v11077_v29  ;;  %v11148_v46 = vpop.f32.mrb[113].mxu0  ;;  %v2700_v29 = vrot.slane %v2686_v18, %v18194_v25  ;;  %v711_v33 = vld [vmem:[%s18170_s22 + $0xaf8] sm:$0xff]  ;;  %v17515_v40 = vpack.c.bf16 %v1093_v28, %v709_v27 }
 0x31a   : > { %v11218_v47 = vpop.f32.mrb[113].mxu1  ;;  %v17519_v42 = vpack.c.bf16 %v1095_v34, %v711_v33  ;;  %v710_v46 = vld [vmem:[%s18170_s22 + $0xaf0] sm:$0xff]  ;;  %v1103_v18 = vld [vmem:[%s18170_s22 + $0x1738] sm:$0x3] }
 0x31b   : > { %v11217_v53 = vadd.f32 %v11216_v41, %v11147_v45  ;;  %v2702_v41 = vcombine.high %v2700_v29, %v2700_v29  ;;  %v1092_v45 = vld [vmem:[%s18170_s22 + $0x16e0] sm:$0x3]  ;;  %v1094_v47 = vld [vmem:[%s18170_s22 + $0x16f0] sm:$0x3] }
 0x31c   : > { %v17521_v61 = vpack.c.bf16 %v1094_v47, %v710_v46 }
 0x31d   : > { %14925 = vmatmul.mubr.f32.vlgmr.msra.gmra.mrb[166].mxu0 %v2642_v14  ;;  %v2684_v14 = vcombine.high %v2676_v63, %v2676_v63 }
 0x31e   : > { %14995 = vmatmul.mubr.f32.vlgmr.msra.gmra.mrb[166].mxu1 %v2649_v19  ;;  %17494 = vmatpush1.bf16.xpose.msra.mxu0 %v17493_v51  ;;  %v704_v19 = vld [vmem:[%s18170_s22 + $0xac0] sm:$0xff]  ;;  %v713_v51 = vld [vmem:[%s18170_s22 + $0xb08] sm:$0xff] }
 0x31f   : > { %17498 = vmatpush1.bf16.xpose.msra.mxu1 %v17497_v52  ;;  %15064 = vmatprep.mubr.f32.mxu0 %v2667_v54  ;;  %v17509_v36 = vpack.c.bf16 %v1088_v20, %v704_v19  ;;  %v1097_v52 = vld [vmem:[%s18170_s22 + $0x1708] sm:$0x3] }
 0x320   : > { %17500 = vmatprep.subr.bf16.mxu0 %v17499_v55  ;;  %v11286_v0 = vpop.f32.mrb[114].mxu0  ;;  %15134 = vmatprep.mubr.f32.mxu1 %v2668_v56  ;;  %v353_v19 = vld [vmem:[%s18163_s12 + $0x2c8] sm:$0xff] }
 0x321   : > { %v11356_v1 = vpop.f32.mrb[114].mxu1  ;;  %17504 = vmatprep.subr.bf16.mxu1 %v17503_v57  ;;  %v11287_v5 = vadd.f32 %v11286_v0, %v11217_v53  ;;  %v11288_v6 = vpop.f32.mrb[115].mxu0  ;;  %v2717_v53 = vrot.slane %v2703_v43, %v18194_v25  ;;  %v715_v57 = vld [vmem:[%s18170_s22 + $0xb18] sm:$0xff]  ;;  %v17523_v0 = vpack.c.bf16 %v1097_v52, %v713_v51  ;;  %v2737_v28 = vcombine.high %v353_v19, %v353_v19 }
 0x322   : > { %v11358_v7 = vpop.f32.mrb[115].mxu1  ;;  %v17527_v2 = vpack.c.bf16 %v1099_v58, %v715_v57  ;;  %v714_v6 = vld [vmem:[%s18170_s22 + $0xb10] sm:$0xff]  ;;  %v2744_v33 = vrot.slane %v353_v19, %v18194_v25  ;;  %v1107_v43 = vld [vmem:[%s18170_s22 + $0x1758] sm:$0x3] }
 0x323   : > { %v11357_v13 = vadd.f32 %v11356_v1, %v11287_v5  ;;  %v2719_v1 = vcombine.high %v2717_v53, %v2717_v53  ;;  %v1096_v5 = vld [vmem:[%s18170_s22 + $0x1700] sm:$0x3]  ;;  %v1098_v7 = vld [vmem:[%s18170_s22 + $0x1710] sm:$0x3] }
 0x324   : > { %v17529_v21 = vpack.c.bf16 %v1098_v7, %v714_v6 }
 0x325   : > { %15065 = vmatmul.mubr.f32.vlgmr.msra.gmra.mrb[168].mxu0 %v2659_v39  ;;  %v2701_v39 = vcombine.high %v2693_v23, %v2693_v23 }
 0x326   : > { %15135 = vmatmul.mubr.f32.vlgmr.msra.gmra.mrb[168].mxu1 %v2666_v44  ;;  %17502 = vmatpush1.bf16.xpose.msra.mxu0 %v17501_v11  ;;  %v708_v44 = vld [vmem:[%s18170_s22 + $0xae0] sm:$0xff]  ;;  %v717_v11 = vld [vmem:[%s18170_s22 + $0xb28] sm:$0xff] }
 0x327   : > { %17506 = vmatpush1.bf16.xpose.msra.mxu1 %v17505_v12  ;;  %15204 = vmatprep.mubr.f32.mxu0 %v2684_v14  ;;  %v17517_v60 = vpack.c.bf16 %v1092_v45, %v708_v44  ;;  %v1101_v12 = vld [vmem:[%s18170_s22 + $0x1728] sm:$0x3]  ;;  %v354_v44 = vld [vmem:[%s18163_s12 + $0x2d0] sm:$0xff] }
 0x328   : > { %17508 = vmatprep.subr.bf16.mxu0 %v17507_v15  ;;  %v11426_v24 = vpop.f32.mrb[116].mxu0  ;;  %15274 = vmatprep.mubr.f32.mxu1 %v2685_v16  ;;  %v2754_v52 = vcombine.high %v354_v44, %v354_v44  ;;  %v2761_v57 = vrot.slane %v354_v44, %v18194_v25 }
 0x329   : > { %v11496_v26 = vpop.f32.mrb[116].mxu1  ;;  %17512 = vmatprep.subr.bf16.mxu1 %v17511_v17  ;;  %v11427_v30 = vadd.f32 %v11426_v24, %v11357_v13  ;;  %v11428_v31 = vpop.f32.mrb[117].mxu0  ;;  %v2734_v13 = vrot.slane %v2720_v3, %v18194_v25  ;;  %v719_v17 = vld [vmem:[%s18170_s22 + $0xb38] sm:$0xff]  ;;  %v17531_v24 = vpack.c.bf16 %v1101_v12, %v717_v11 }
 0x32a   : > { %v11498_v32 = vpop.f32.mrb[117].mxu1  ;;  %v17535_v27 = vpack.c.bf16 %v1103_v18, %v719_v17  ;;  %v718_v31 = vld [vmem:[%s18170_s22 + $0xb30] sm:$0xff]  ;;  %v1111_v3 = vld [vmem:[%s18170_s22 + $0x1778] sm:$0x3] }
 0x32b   : > { %v11497_v38 = vadd.f32 %v11496_v26, %v11427_v30  ;;  %v2736_v26 = vcombine.high %v2734_v13, %v2734_v13  ;;  %v1100_v30 = vld [vmem:[%s18170_s22 + $0x1720] sm:$0x3]  ;;  %v1102_v32 = vld [vmem:[%s18170_s22 + $0x1730] sm:$0x3] }
 0x32c   : > { %v17537_v46 = vpack.c.bf16 %v1102_v32, %v718_v31 }
 0x32d   : > { %15205 = vmatmul.mubr.f32.vlgmr.msra.gmra.mrb[170].mxu0 %v2676_v63  ;;  %v2718_v63 = vcombine.high %v2710_v48, %v2710_v48 }
 0x32e   : > { %15275 = vmatmul.mubr.f32.vlgmr.msra.gmra.mrb[170].mxu1 %v2683_v4  ;;  %17510 = vmatpush1.bf16.xpose.msra.mxu0 %v17509_v36  ;;  %v712_v4 = vld [vmem:[%s18170_s22 + $0xb00] sm:$0xff]  ;;  %v721_v36 = vld [vmem:[%s18170_s22 + $0xb48] sm:$0xff] }
 0x32f   : > { %17514 = vmatpush1.bf16.xpose.msra.mxu1 %v17513_v37  ;;  %15344 = vmatprep.mubr.f32.mxu0 %v2701_v39  ;;  %v17525_v20 = vpack.c.bf16 %v1096_v5, %v712_v4  ;;  %v1105_v37 = vld [vmem:[%s18170_s22 + $0x1748] sm:$0x3]  ;;  %v355_v4 = vld [vmem:[%s18163_s12 + $0x2d8] sm:$0xff] }
 0x330   : > { %17516 = vmatprep.subr.bf16.mxu0 %v17515_v40  ;;  %v11566_v49 = vpop.f32.mrb[118].mxu0  ;;  %15414 = vmatprep.mubr.f32.mxu1 %v2702_v41  ;;  %v2771_v12 = vcombine.high %v355_v4, %v355_v4  ;;  %v2778_v17 = vrot.slane %v355_v4, %v18194_v25 }
 0x331   : > { %v11636_v50 = vpop.f32.mrb[118].mxu1  ;;  %17520 = vmatprep.subr.bf16.mxu1 %v17519_v42  ;;  %v11567_v54 = vadd.f32 %v11566_v49, %v11497_v38  ;;  %v11568_v55 = vpop.f32.mrb[119].mxu0  ;;  %v2751_v38 = vrot.slane %v2737_v28, %v18194_v25  ;;  %v723_v42 = vld [vmem:[%s18170_s22 + $0xb58] sm:$0xff]  ;;  %v17539_v49 = vpack.c.bf16 %v1105_v37, %v721_v36 }
 0x332   : > { %v11638_v56 = vpop.f32.mrb[119].mxu1  ;;  %v17543_v51 = vpack.c.bf16 %v1107_v43, %v723_v42  ;;  %v722_v55 = vld [vmem:[%s18170_s22 + $0xb50] sm:$0xff]  ;;  %v1115_v28 = vld [vmem:[%s18170_s22 + $0x1798] sm:$0x3] }
 0x333   : > { %v11637_v62 = vadd.f32 %v11636_v50, %v11567_v54  ;;  %v2753_v50 = vcombine.high %v2751_v38, %v2751_v38  ;;  %v1104_v54 = vld [vmem:[%s18170_s22 + $0x1740] sm:$0x3]  ;;  %v1106_v56 = vld [vmem:[%s18170_s22 + $0x1750] sm:$0x3] }
 0x334   : > { %v17545_v6 = vpack.c.bf16 %v1106_v56, %v722_v55 }
 0x335   : > { %15345 = vmatmul.mubr.f32.vlgmr.msra.gmra.mrb[172].mxu0 %v2693_v23  ;;  %v2735_v23 = vcombine.high %v2727_v8, %v2727_v8 }
 0x336   : > { %15415 = vmatmul.mubr.f32.vlgmr.msra.gmra.mrb[172].mxu1 %v2700_v29  ;;  %17518 = vmatpush1.bf16.xpose.msra.mxu0 %v17517_v60  ;;  %v716_v29 = vld [vmem:[%s18170_s22 + $0xb20] sm:$0xff]  ;;  %v725_v60 = vld [vmem:[%s18170_s22 + $0xb68] sm:$0xff] }
 0x337   : > { %17522 = vmatpush1.bf16.xpose.msra.mxu1 %v17521_v61  ;;  %15484 = vmatprep.mubr.f32.mxu0 %v2718_v63  ;;  %v17533_v45 = vpack.c.bf16 %v1100_v30, %v716_v29  ;;  %v1109_v61 = vld [vmem:[%s18170_s22 + $0x1768] sm:$0x3]  ;;  %v356_v29 = vld [vmem:[%s18163_s12 + $0x2e0] sm:$0xff] }
 0x338   : > { %17524 = vmatprep.subr.bf16.mxu0 %v17523_v0  ;;  %v11706_v9 = vpop.f32.mrb[120].mxu0  ;;  %15554 = vmatprep.mubr.f32.mxu1 %v2719_v1  ;;  %v2788_v37 = vcombine.high %v356_v29, %v356_v29  ;;  %v2795_v42 = vrot.slane %v356_v29, %v18194_v25 }
 0x339   : > { %v11776_v10 = vpop.f32.mrb[120].mxu1  ;;  %17528 = vmatprep.subr.bf16.mxu1 %v17527_v2  ;;  %v11707_v14 = vadd.f32 %v11706_v9, %v11637_v62  ;;  %v11708_v15 = vpop.f32.mrb[121].mxu0  ;;  %v2768_v62 = vrot.slane %v2754_v52, %v18194_v25  ;;  %v727_v2 = vld [vmem:[%s18170_s22 + $0xb78] sm:$0xff]  ;;  %v17547_v9 = vpack.c.bf16 %v1109_v61, %v725_v60 }
 0x33a   : > { %v11778_v16 = vpop.f32.mrb[121].mxu1  ;;  %v17551_v11 = vpack.c.bf16 %v1111_v3, %v727_v2  ;;  %v726_v15 = vld [vmem:[%s18170_s22 + $0xb70] sm:$0xff]  ;;  %v1119_v52 = vld [vmem:[%s18170_s22 + $0x17b8] sm:$0x3] }
 0x33b   : > { %v11777_v22 = vadd.f32 %v11776_v10, %v11707_v14  ;;  %v2770_v10 = vcombine.high %v2768_v62, %v2768_v62  ;;  %v1108_v14 = vld [vmem:[%s18170_s22 + $0x1760] sm:$0x3]  ;;  %v1110_v16 = vld [vmem:[%s18170_s22 + $0x1770] sm:$0x3] }
 0x33c   : > { %v17553_v31 = vpack.c.bf16 %v1110_v16, %v726_v15 }
 0x33d   : > { %15485 = vmatmul.mubr.f32.vlgmr.msra.gmra.mrb[174].mxu0 %v2710_v48  ;;  %v2752_v48 = vcombine.high %v2744_v33, %v2744_v33 }
 0x33e   : > { %15555 = vmatmul.mubr.f32.vlgmr.msra.gmra.mrb[174].mxu1 %v2717_v53  ;;  %17526 = vmatpush1.bf16.xpose.msra.mxu0 %v17525_v20  ;;  %v720_v53 = vld [vmem:[%s18170_s22 + $0xb40] sm:$0xff]  ;;  %v729_v20 = vld [vmem:[%s18170_s22 + $0xb88] sm:$0xff] }
 0x33f   : > { %17530 = vmatpush1.bf16.xpose.msra.mxu1 %v17529_v21  ;;  %15624 = vmatprep.mubr.f32.mxu0 %v2735_v23  ;;  %v17541_v5 = vpack.c.bf16 %v1104_v54, %v720_v53  ;;  %v1113_v21 = vld [vmem:[%s18170_s22 + $0x1788] sm:$0x3] }
 0x340   : > { %17532 = vmatprep.subr.bf16.mxu0 %v17531_v24  ;;  %v11846_v34 = vpop.f32.mrb[122].mxu0  ;;  %15694 = vmatprep.mubr.f32.mxu1 %v2736_v26  ;;  %v357_v53 = vld [vmem:[%s18163_s12 + $0x2e8] sm:$0xff] }
 0x341   : > { %v11916_v35 = vpop.f32.mrb[122].mxu1  ;;  %17536 = vmatprep.subr.bf16.mxu1 %v17535_v27  ;;  %v11847_v39 = vadd.f32 %v11846_v34, %v11777_v22  ;;  %v11848_v40 = vpop.f32.mrb[123].mxu0  ;;  %v2785_v22 = vrot.slane %v2771_v12, %v18194_v25  ;;  %v731_v27 = vld [vmem:[%s18170_s22 + $0xb98] sm:$0xff]  ;;  %v17555_v34 = vpack.c.bf16 %v1113_v21, %v729_v20  ;;  %v2805_v61 = vcombine.high %v357_v53, %v357_v53 }
 0x342   : > { %v11918_v41 = vpop.f32.mrb[123].mxu1  ;;  %v17559_v36 = vpack.c.bf16 %v1115_v28, %v731_v27  ;;  %v730_v40 = vld [vmem:[%s18170_s22 + $0xb90] sm:$0xff]  ;;  %v2812_v2 = vrot.slane %v357_v53, %v18194_v25  ;;  %v1123_v12 = vld [vmem:[%s18170_s22 + $0x17d8] sm:$0x3] }
 0x343   : > { %v11917_v47 = vadd.f32 %v11916_v35, %v11847_v39  ;;  %v2787_v35 = vcombine.high %v2785_v22, %v2785_v22  ;;  %v1112_v39 = vld [vmem:[%s18170_s22 + $0x1780] sm:$0x3]  ;;  %v1114_v41 = vld [vmem:[%s18170_s22 + $0x1790] sm:$0x3] }
 0x344   : > { %v17561_v55 = vpack.c.bf16 %v1114_v41, %v730_v40 }
 0x345   : > { %15625 = vmatmul.mubr.f32.vlgmr.msra.gmra.mrb[176].mxu0 %v2727_v8  ;;  %v2769_v8 = vcombine.high %v2761_v57, %v2761_v57 }
 0x346   : > { %15695 = vmatmul.mubr.f32.vlgmr.msra.gmra.mrb[176].mxu1 %v2734_v13  ;;  %17534 = vmatpush1.bf16.xpose.msra.mxu0 %v17533_v45  ;;  %v724_v13 = vld [vmem:[%s18170_s22 + $0xb60] sm:$0xff]  ;;  %v733_v45 = vld [vmem:[%s18170_s22 + $0xba8] sm:$0xff] }
 0x347   : > { %17538 = vmatpush1.bf16.xpose.msra.mxu1 %v17537_v46  ;;  %15764 = vmatprep.mubr.f32.mxu0 %v2752_v48  ;;  %v17549_v30 = vpack.c.bf16 %v1108_v14, %v724_v13  ;;  %v1117_v46 = vld [vmem:[%s18170_s22 + $0x17a8] sm:$0x3]  ;;  %v358_v13 = vld [vmem:[%s18163_s12 + $0x2f0] sm:$0xff] }
 0x348   : > { %17540 = vmatprep.subr.bf16.mxu0 %v17539_v49  ;;  %v11986_v58 = vpop.f32.mrb[124].mxu0  ;;  %15834 = vmatprep.mubr.f32.mxu1 %v2753_v50  ;;  %v2822_v21 = vcombine.high %v358_v13, %v358_v13  ;;  %v2829_v27 = vrot.slane %v358_v13, %v18194_v25 }
 0x349   : > { %v12056_v59 = vpop.f32.mrb[124].mxu1  ;;  %17544 = vmatprep.subr.bf16.mxu1 %v17543_v51  ;;  %v11987_v63 = vadd.f32 %v11986_v58, %v11917_v47  ;;  %v11988_v0 = vpop.f32.mrb[125].mxu0  ;;  %v2802_v47 = vrot.slane %v2788_v37, %v18194_v25  ;;  %v735_v51 = vld [vmem:[%s18170_s22 + $0xbb8] sm:$0xff]  ;;  %v17563_v58 = vpack.c.bf16 %v1117_v46, %v733_v45 }
 0x34a   : > { %v12058_v1 = vpop.f32.mrb[125].mxu1  ;;  %v17567_v60 = vpack.c.bf16 %v1119_v52, %v735_v51  ;;  %v734_v0 = vld [vmem:[%s18170_s22 + $0xbb0] sm:$0xff]  ;;  %v743_v37 = vld [vmem:[%s18170_s22 + $0xbf8] sm:$0xff] }
 0x34b   : > { %v12057_v7 = vadd.f32 %v12056_v59, %v11987_v63  ;;  %v2804_v59 = vcombine.high %v2802_v47, %v2802_v47  ;;  %v1116_v63 = vld [vmem:[%s18170_s22 + $0x17a0] sm:$0x3]  ;;  %v1118_v1 = vld [vmem:[%s18170_s22 + $0x17b0] sm:$0x3] }
 0x34c   : > { %v17569_v15 = vpack.c.bf16 %v1118_v1, %v734_v0 }
 0x34d   : > { %15765 = vmatmul.mubr.f32.vlgmr.msra.gmra.mrb[178].mxu0 %v2744_v33  ;;  %v2786_v33 = vcombine.high %v2778_v17, %v2778_v17 }
 0x34e   : > { %15835 = vmatmul.mubr.f32.vlgmr.msra.gmra.mrb[178].mxu1 %v2751_v38  ;;  %17542 = vmatpush1.bf16.xpose.msra.mxu0 %v17541_v5  ;;  %v728_v38 = vld [vmem:[%s18170_s22 + $0xb80] sm:$0xff]  ;;  %v737_v5 = vld [vmem:[%s18170_s22 + $0xbc8] sm:$0xff] }
 0x34f   : > { %17546 = vmatpush1.bf16.xpose.msra.mxu1 %v17545_v6  ;;  %15904 = vmatprep.mubr.f32.mxu0 %v2769_v8  ;;  %v17557_v54 = vpack.c.bf16 %v1112_v39, %v728_v38  ;;  %v1121_v6 = vld [vmem:[%s18170_s22 + $0x17c8] sm:$0x3]  ;;  %v1127_v38 = vld [vmem:[%s18170_s22 + $0x17f8] sm:$0x3] }
 0x350   : > { %17548 = vmatprep.subr.bf16.mxu0 %v17547_v9  ;;  %v12126_v18 = vpop.f32.mrb[126].mxu0  ;;  %15974 = vmatprep.mubr.f32.mxu1 %v2770_v10  ;;  %v17583_v46 = vpack.c.bf16 %v1127_v38, %v743_v37 }
 0x351   : > { %v12196_v19 = vpop.f32.mrb[126].mxu1  ;;  %17552 = vmatprep.subr.bf16.mxu1 %v17551_v11  ;;  %v12127_v23 = vadd.f32 %v12126_v18, %v12057_v7  ;;  %v12128_v24 = vpop.f32.mrb[127].mxu0  ;;  %v2819_v7 = vrot.slane %v2805_v61, %v18194_v25  ;;  %v739_v11 = vld [vmem:[%s18170_s22 + $0xbd8] sm:$0xff]  ;;  %v17571_v18 = vpack.c.bf16 %v1121_v6, %v737_v5 }
 0x352   : > { %v12198_v26 = vpop.f32.mrb[127].mxu1  ;;  %v17575_v20 = vpack.c.bf16 %v1123_v12, %v739_v11  ;;  %v738_v24 = vld [vmem:[%s18170_s22 + $0xbd0] sm:$0xff] }
 0x353   : > { %v12197_v32 = vadd.f32 %v12196_v19, %v12127_v23  ;;  %v2821_v19 = vcombine.high %v2819_v7, %v2819_v7  ;;  %v1120_v23 = vld [vmem:[%s18170_s22 + $0x17c0] sm:$0x3]  ;;  %v1122_v26 = vld [vmem:[%s18170_s22 + $0x17d0] sm:$0x3] }
 0x354   : > { %v17577_v40 = vpack.c.bf16 %v1122_v26, %v738_v24 }
 0x355   : > { %15905 = vmatmul.mubr.f32.vlgmr.msra.gmra.mrb[180].mxu0 %v2761_v57  ;;  %v2803_v57 = vcombine.high %v2795_v42, %v2795_v42 }
 0x356   : > { %15975 = vmatmul.mubr.f32.vlgmr.msra.gmra.mrb[180].mxu1 %v2768_v62  ;;  %17550 = vmatpush1.bf16.xpose.msra.mxu0 %v17549_v30  ;;  %v732_v62 = vld [vmem:[%s18170_s22 + $0xba0] sm:$0xff]  ;;  %v741_v30 = vld [vmem:[%s18170_s22 + $0xbe8] sm:$0xff] }
 0x357   : > { %17554 = vmatpush1.bf16.xpose.msra.mxu1 %v17553_v31  ;;  %16044 = vmatprep.mubr.f32.mxu0 %v2786_v33  ;;  %v17565_v14 = vpack.c.bf16 %v1116_v63, %v732_v62  ;;  %v1125_v31 = vld [vmem:[%s18170_s22 + $0x17e8] sm:$0x3]  ;;  %v359_v33 = vld [vmem:[%s18163_s12 + $0x2f8] sm:$0xff] }
 0x358   : > { %17556 = vmatprep.subr.bf16.mxu0 %v17555_v34  ;;  %v12266_v43 = vpop.f32.mrb[128].mxu0  ;;  %16114 = vmatprep.mubr.f32.mxu1 %v2787_v35  ;;  %v2846_v51 = vrot.slane %v359_v33, %v18194_v25 }
 0x359   : > { %v12336_v44 = vpop.f32.mrb[128].mxu1  ;;  %17560 = vmatprep.subr.bf16.mxu1 %v17559_v36  ;;  %v12267_v48 = vadd.f32 %v12266_v43, %v12197_v32  ;;  %v12268_v49 = vpop.f32.mrb[129].mxu0  ;;  %v2836_v32 = vrot.slane %v2822_v21, %v18194_v25  ;;  %v17579_v43 = vpack.c.bf16 %v1125_v31, %v741_v30 }
 0x35a   : > { %v12338_v50 = vpop.f32.mrb[129].mxu1  ;;  %v742_v49 = vld [vmem:[%s18170_s22 + $0xbf0] sm:$0xff]  ;;  %v2854_v61 = vcombine.high %v2846_v51, %v2846_v51 }
 0x35b   : > { %v12337_v56 = vadd.f32 %v12336_v44, %v12267_v48  ;;  %v2839_v44 = vcombine.high %v359_v33, %v359_v33  ;;  %v2838_v45 = vcombine.high %v2836_v32, %v2836_v32  ;;  %v1124_v48 = vld [vmem:[%s18170_s22 + $0x17e0] sm:$0x3]  ;;  %v1126_v50 = vld [vmem:[%s18170_s22 + $0x17f0] sm:$0x3] }
 0x35d   : > { %16045 = vmatmul.mubr.f32.vlgmr.msra.gmra.mrb[182].mxu0 %v2778_v17  ;;  %v2820_v17 = vcombine.high %v2812_v2, %v2812_v2  ;;  %v2853_v52 = vrot.slane %v2839_v44, %v18194_v25 }
 0x35e   : > { %16115 = vmatmul.mubr.f32.vlgmr.msra.gmra.mrb[182].mxu1 %v2785_v22  ;;  %17558 = vmatpush1.bf16.xpose.msra.mxu0 %v17557_v54  ;;  %v736_v22 = vld [vmem:[%s18170_s22 + $0xbc0] sm:$0xff] }
 0x35f   : > { %17562 = vmatpush1.bf16.xpose.msra.mxu1 %v17561_v55  ;;  %16184 = vmatprep.mubr.f32.mxu0 %v2803_v57  ;;  %v17573_v39 = vpack.c.bf16 %v1120_v23, %v736_v22  ;;  %v2855_v62 = vcombine.high %v2853_v52, %v2853_v52 }
 0x360   : > { %17564 = vmatprep.subr.bf16.mxu0 %v17563_v58  ;;  %v12406_v3 = vpop.f32.mrb[130].mxu0  ;;  %16254 = vmatprep.mubr.f32.mxu1 %v2804_v59  ;;  %v17585_v59 = vpack.c.bf16 %v1126_v50, %v742_v49 }
 0x361   : > { %v12476_v4 = vpop.f32.mrb[130].mxu1  ;;  %17568 = vmatprep.subr.bf16.mxu1 %v17567_v60  ;;  %v12407_v8 = vadd.f32 %v12406_v3, %v12337_v56  ;;  %v12408_v9 = vpop.f32.mrb[131].mxu0 }
 0x362   : > { %v12478_v10 = vpop.f32.mrb[131].mxu1 }
 0x363   : > { %v12477_v16 = vadd.f32 %v12476_v4, %v12407_v8 }
 0x365   : > { %16185 = vmatmul.mubr.f32.vlgmr.msra.gmra.mrb[184].mxu0 %v2795_v42  ;;  %v2837_v42 = vcombine.high %v2829_v27, %v2829_v27 }
 0x366   : > { %16255 = vmatmul.mubr.f32.vlgmr.msra.gmra.mrb[184].mxu1 %v2802_v47  ;;  %17566 = vmatpush1.bf16.xpose.msra.mxu0 %v17565_v14  ;;  %v740_v47 = vld [vmem:[%s18170_s22 + $0xbe0] sm:$0xff] }
 0x367   : > { %17570 = vmatpush1.bf16.xpose.msra.mxu1 %v17569_v15  ;;  %16324 = vmatprep.mubr.f32.mxu0 %v2820_v17  ;;  %v17581_v58 = vpack.c.bf16 %v1124_v48, %v740_v47 }
 0x368   : > { %17572 = vmatprep.subr.bf16.mxu0 %v17571_v18  ;;  %v12546_v28 = vpop.f32.mrb[132].mxu0  ;;  %16394 = vmatprep.mubr.f32.mxu1 %v2821_v19 }
 0x369   : > { %v12616_v29 = vpop.f32.mrb[132].mxu1  ;;  %17576 = vmatprep.subr.bf16.mxu1 %v17575_v20  ;;  %v12547_v34 = vadd.f32 %v12546_v28, %v12477_v16  ;;  %v12548_v35 = vpop.f32.mrb[133].mxu0 }
 0x36a   : > { %v12618_v36 = vpop.f32.mrb[133].mxu1 }
 0x36b   : > { %v12617_v41 = vadd.f32 %v12616_v29, %v12547_v34 }
 0x36d   : > { %16325 = vmatmul.mubr.f32.vlgmr.msra.gmra.mrb[186].mxu0 %v2812_v2 }
 0x36e   : > { %16395 = vmatmul.mubr.f32.vlgmr.msra.gmra.mrb[186].mxu1 %v2819_v7  ;;  %17574 = vmatpush1.bf16.xpose.msra.mxu0 %v17573_v39 }
 0x36f   : > { %17578 = vmatpush1.bf16.xpose.msra.mxu1 %v17577_v40  ;;  %16464 = vmatprep.mubr.f32.mxu0 %v2837_v42 }
 0x370   : > { %17580 = vmatprep.subr.bf16.mxu0 %v17579_v43  ;;  %v12686_v53 = vpop.f32.mrb[134].mxu0  ;;  %16534 = vmatprep.mubr.f32.mxu1 %v2838_v45 }
 0x371   : > { %v12756_v54 = vpop.f32.mrb[134].mxu1  ;;  %17584 = vmatprep.subr.bf16.mxu1 %v17583_v46  ;;  %v12687_v55 = vadd.f32 %v12686_v53, %v12617_v41  ;;  %v12688_v56 = vpop.f32.mrb[135].mxu0 }
 0x372   : > { %v12758_v57 = vpop.f32.mrb[135].mxu1 }
 0x373   : > { %v12757_v60 = vadd.f32 %v12756_v54, %v12687_v55 }
 0x375   : > { %16465 = vmatmul.mubr.f32.vlgmr.msra.gmra.mrb[188].mxu0 %v2829_v27 }
 0x376   : > { %16535 = vmatmul.mubr.f32.vlgmr.msra.gmra.mrb[188].mxu1 %v2836_v32  ;;  %17582 = vmatpush1.bf16.xpose.msra.mxu0 %v17581_v58 }
 0x377   : > { %17586 = vmatpush1.bf16.xpose.msra.mxu1 %v17585_v59  ;;  %16604 = vmatprep.mubr.f32.mxu0 %v2854_v61 }
 0x378   : > { %16674 = vmatprep.mubr.f32.mxu1 %v2855_v62  ;;  %v12826_v63 = vpop.f32.mrb[136].mxu0 }
 0x379   : > { %v12896_v25 = vpop.f32.mrb[136].mxu1  ;;  %v12827_v0 = vadd.f32 %v12826_v63, %v12757_v60  ;;  %v12828_v1 = vpop.f32.mrb[137].mxu0 }
 0x37a   : > { %v12898_v2 = vpop.f32.mrb[137].mxu1 }
 0x37b   : > { %v12897_v3 = vadd.f32 %v12896_v25, %v12827_v0 }
 0x37d   : > { %16605 = vmatmul.mubr.f32.vlgmr.msra.gmra.mrb[190].mxu0 %v2846_v51 }
 0x37e   : > { %16675 = vmatmul.mubr.f32.vlgmr.msra.gmra.mrb[190].mxu1 %v2853_v52 }
 0x380   : > { %v12966_v4 = vpop.f32.mrb[138].mxu0 }
 0x381   : > { %v13036_v5 = vpop.f32.mrb[138].mxu1  ;;  %v12967_v6 = vadd.f32 %v12966_v4, %v12897_v3  ;;  %v12968_v7 = vpop.f32.mrb[139].mxu0 }
 0x382   : > { %v13038_v8 = vpop.f32.mrb[139].mxu1 }
 0x383   : > { %v13037_v9 = vadd.f32 %v13036_v5, %v12967_v6 }
 0x388   : > { %v13106_v10 = vpop.f32.mrb[140].mxu0 }
 0x389   : > { %v13176_v11 = vpop.f32.mrb[140].mxu1  ;;  %v13107_v12 = vadd.f32 %v13106_v10, %v13037_v9  ;;  %v13108_v13 = vpop.f32.mrb[141].mxu0 }
 0x38a   : > { %v13178_v14 = vpop.f32.mrb[141].mxu1 }
 0x38b   : > { %v13177_v15 = vadd.f32 %v13176_v11, %v13107_v12 }
 0x390   : > { %v13246_v16 = vpop.f32.mrb[142].mxu0 }
 0x391   : > { %v13316_v17 = vpop.f32.mrb[142].mxu1  ;;  %v13247_v18 = vadd.f32 %v13246_v16, %v13177_v15  ;;  %v13248_v19 = vpop.f32.mrb[143].mxu0 }
 0x392   : > { %v13318_v20 = vpop.f32.mrb[143].mxu1 }
 0x393   : > { %v13317_v21 = vadd.f32 %v13316_v17, %v13247_v18 }
 0x398   : > { %v13386_v22 = vpop.f32.mrb[144].mxu0 }
 0x399   : > { %v13456_v23 = vpop.f32.mrb[144].mxu1  ;;  %v13387_v24 = vadd.f32 %v13386_v22, %v13317_v21  ;;  %v13388_v26 = vpop.f32.mrb[145].mxu0 }
 0x39a   : > { %v13458_v27 = vpop.f32.mrb[145].mxu1 }
 0x39b   : > { %v13457_v28 = vadd.f32 %v13456_v23, %v13387_v24 }
 0x3a0   : > { %v13526_v29 = vpop.f32.mrb[146].mxu0 }
 0x3a1   : > { %v13596_v30 = vpop.f32.mrb[146].mxu1  ;;  %v13527_v31 = vadd.f32 %v13526_v29, %v13457_v28  ;;  %v13528_v32 = vpop.f32.mrb[147].mxu0 }
 0x3a2   : > { %v13598_v33 = vpop.f32.mrb[147].mxu1 }
 0x3a3   : > { %v13597_v34 = vadd.f32 %v13596_v30, %v13527_v31 }
 0x3a8   : > { %v13666_v35 = vpop.f32.mrb[148].mxu0 }
 0x3a9   : > { %v13736_v36 = vpop.f32.mrb[148].mxu1  ;;  %v13667_v37 = vadd.f32 %v13666_v35, %v13597_v34  ;;  %v13668_v38 = vpop.f32.mrb[149].mxu0 }
 0x3aa   : > { %v13738_v39 = vpop.f32.mrb[149].mxu1 }
 0x3ab   : > { %v13737_v40 = vadd.f32 %v13736_v36, %v13667_v37 }
 0x3b0   : > { %v13806_v41 = vpop.f32.mrb[150].mxu0 }
 0x3b1   : > { %v13876_v42 = vpop.f32.mrb[150].mxu1  ;;  %v13807_v43 = vadd.f32 %v13806_v41, %v13737_v40  ;;  %v13808_v44 = vpop.f32.mrb[151].mxu0 }
 0x3b2   : > { %v13878_v45 = vpop.f32.mrb[151].mxu1 }
 0x3b3   : > { %v13877_v46 = vadd.f32 %v13876_v42, %v13807_v43 }
 0x3b8   : > { %v13946_v47 = vpop.f32.mrb[152].mxu0 }
 0x3b9   : > { %v14016_v48 = vpop.f32.mrb[152].mxu1  ;;  %v13947_v49 = vadd.f32 %v13946_v47, %v13877_v46  ;;  %v13948_v50 = vpop.f32.mrb[153].mxu0 }
 0x3ba   : > { %v14018_v51 = vpop.f32.mrb[153].mxu1 }
 0x3bb   : > { %v14017_v52 = vadd.f32 %v14016_v48, %v13947_v49 }
 0x3c0   : > { %v14086_v53 = vpop.f32.mrb[154].mxu0 }
 0x3c1   : > { %v14156_v54 = vpop.f32.mrb[154].mxu1  ;;  %v14087_v55 = vadd.f32 %v14086_v53, %v14017_v52  ;;  %v14088_v56 = vpop.f32.mrb[155].mxu0 }
 0x3c2   : > { %v14158_v57 = vpop.f32.mrb[155].mxu1 }
 0x3c3   : > { %v14157_v58 = vadd.f32 %v14156_v54, %v14087_v55 }
 0x3c8   : > { %v14226_v59 = vpop.f32.mrb[156].mxu0 }
 0x3c9   : > { %v14296_v60 = vpop.f32.mrb[156].mxu1  ;;  %v14227_v61 = vadd.f32 %v14226_v59, %v14157_v58  ;;  %v14228_v62 = vpop.f32.mrb[157].mxu0 }
 0x3ca   : > { %v14298_v63 = vpop.f32.mrb[157].mxu1 }
 0x3cb   : > { %v14297_v25 = vadd.f32 %v14296_v60, %v14227_v61 }
 0x3d0   : > { %v14366_v0 = vpop.f32.mrb[158].mxu0 }
 0x3d1   : > { %v14436_v1 = vpop.f32.mrb[158].mxu1  ;;  %v14367_v2 = vadd.f32 %v14366_v0, %v14297_v25  ;;  %v14368_v3 = vpop.f32.mrb[159].mxu0 }
 0x3d2   : > { %v14438_v4 = vpop.f32.mrb[159].mxu1 }
 0x3d3   : > { %v14437_v5 = vadd.f32 %v14436_v1, %v14367_v2 }
 0x3d8   : > { %v14506_v6 = vpop.f32.mrb[160].mxu0 }
 0x3d9   : > { %v14576_v7 = vpop.f32.mrb[160].mxu1  ;;  %v14507_v8 = vadd.f32 %v14506_v6, %v14437_v5  ;;  %v14508_v9 = vpop.f32.mrb[161].mxu0 }
 0x3da   : > { %v14578_v10 = vpop.f32.mrb[161].mxu1 }
 0x3db   : > { %v14577_v11 = vadd.f32 %v14576_v7, %v14507_v8 }
 0x3e0   : > { %v14646_v12 = vpop.f32.mrb[162].mxu0 }
 0x3e1   : > { %v14716_v13 = vpop.f32.mrb[162].mxu1  ;;  %v14647_v14 = vadd.f32 %v14646_v12, %v14577_v11  ;;  %v14648_v15 = vpop.f32.mrb[163].mxu0 }
 0x3e2   : > { %v14718_v16 = vpop.f32.mrb[163].mxu1 }
 0x3e3   : > { %v14717_v17 = vadd.f32 %v14716_v13, %v14647_v14 }
 0x3e8   : > { %v14786_v18 = vpop.f32.mrb[164].mxu0 }
 0x3e9   : > { %v14856_v19 = vpop.f32.mrb[164].mxu1  ;;  %v14787_v20 = vadd.f32 %v14786_v18, %v14717_v17  ;;  %v14788_v21 = vpop.f32.mrb[165].mxu0 }
 0x3ea   : > { %v14858_v22 = vpop.f32.mrb[165].mxu1 }
 0x3eb   : > { %v14857_v23 = vadd.f32 %v14856_v19, %v14787_v20 }
 0x3f0   : > { %v14926_v24 = vpop.f32.mrb[166].mxu0 }
 0x3f1   : > { %v14996_v26 = vpop.f32.mrb[166].mxu1  ;;  %v14927_v27 = vadd.f32 %v14926_v24, %v14857_v23  ;;  %v14928_v28 = vpop.f32.mrb[167].mxu0 }
 0x3f2   : > { %v14998_v29 = vpop.f32.mrb[167].mxu1 }
 0x3f3   : > { %v14997_v30 = vadd.f32 %v14996_v26, %v14927_v27 }
 0x3f8   : > { %v15066_v31 = vpop.f32.mrb[168].mxu0 }
 0x3f9   : > { %v15136_v32 = vpop.f32.mrb[168].mxu1  ;;  %v15067_v33 = vadd.f32 %v15066_v31, %v14997_v30  ;;  %v15068_v34 = vpop.f32.mrb[169].mxu0 }
 0x3fa   : > { %v15138_v35 = vpop.f32.mrb[169].mxu1 }
 0x3fb   : > { %v15137_v36 = vadd.f32 %v15136_v32, %v15067_v33 }
 0x400   : > { %v15206_v37 = vpop.f32.mrb[170].mxu0 }
 0x401   : > { %v15276_v38 = vpop.f32.mrb[170].mxu1  ;;  %v15207_v39 = vadd.f32 %v15206_v37, %v15137_v36  ;;  %v15208_v40 = vpop.f32.mrb[171].mxu0 }
 0x402   : > { %v15278_v41 = vpop.f32.mrb[171].mxu1 }
 0x403   : > { %v15277_v42 = vadd.f32 %v15276_v38, %v15207_v39  ;;  %v263_v38 = vld [vmem:[#allocation8] sm:$0x3] }
 0x408   : > { %v15346_v43 = vpop.f32.mrb[172].mxu0 }
 0x409   : > { %v15416_v44 = vpop.f32.mrb[172].mxu1  ;;  %v15347_v45 = vadd.f32 %v15346_v43, %v15277_v42  ;;  %v15348_v46 = vpop.f32.mrb[173].mxu0  ;;  %v16811_v42 = vld [vmem:[#allocation7] ss:$0 sm:$0xff] (%p16683_p9) }
 0x40a   : > { %v15418_v47 = vpop.f32.mrb[173].mxu1 }
 0x40b   : > { %v15417_v48 = vadd.f32 %v15416_v44, %v15347_v45 }
 0x410   : > { %v15486_v49 = vpop.f32.mrb[174].mxu0 }
 0x411   : > { %v15556_v50 = vpop.f32.mrb[174].mxu1  ;;  %v15487_v51 = vadd.f32 %v15486_v49, %v15417_v48  ;;  %v15488_v52 = vpop.f32.mrb[175].mxu0 }
 0x412   : > { %v15558_v53 = vpop.f32.mrb[175].mxu1 }
 0x413   : > { %v15557_v54 = vadd.f32 %v15556_v50, %v15487_v51 }
 0x418   : > { %v15626_v55 = vpop.f32.mrb[176].mxu0 }
 0x419   : > { %v15696_v56 = vpop.f32.mrb[176].mxu1  ;;  %v15627_v57 = vadd.f32 %v15626_v55, %v15557_v54  ;;  %v15628_v58 = vpop.f32.mrb[177].mxu0 }
 0x41a   : > { %v15698_v59 = vpop.f32.mrb[177].mxu1 }
 0x41b   : > { %v15697_v60 = vadd.f32 %v15696_v56, %v15627_v57 }
 0x420   : > { %v15766_v61 = vpop.f32.mrb[178].mxu0 }
 0x421   : > { %v15836_v62 = vpop.f32.mrb[178].mxu1  ;;  %v15767_v63 = vadd.f32 %v15766_v61, %v15697_v60  ;;  %v15768_v25 = vpop.f32.mrb[179].mxu0 }
 0x422   : > { %v15838_v0 = vpop.f32.mrb[179].mxu1 }
 0x423   : > { %v15837_v1 = vadd.f32 %v15836_v62, %v15767_v63 }
 0x428   : > { %v15906_v2 = vpop.f32.mrb[180].mxu0 }
 0x429   : > { %v15976_v3 = vpop.f32.mrb[180].mxu1  ;;  %v15907_v4 = vadd.f32 %v15906_v2, %v15837_v1  ;;  %v15908_v5 = vpop.f32.mrb[181].mxu0 }
 0x42a   : > { %v15978_v6 = vpop.f32.mrb[181].mxu1 }
 0x42b   : > { %v15977_v7 = vadd.f32 %v15976_v3, %v15907_v4 }
 0x430   : > { %v16046_v8 = vpop.f32.mrb[182].mxu0 }
 0x431   : > { %v16116_v9 = vpop.f32.mrb[182].mxu1  ;;  %v16047_v10 = vadd.f32 %v16046_v8, %v15977_v7  ;;  %v16048_v11 = vpop.f32.mrb[183].mxu0 }
 0x432   : > { %v16118_v12 = vpop.f32.mrb[183].mxu1 }
 0x433   : > { %v16117_v13 = vadd.f32 %v16116_v9, %v16047_v10 }
 0x438   : > { %v16186_v14 = vpop.f32.mrb[184].mxu0 }
 0x439   : > { %v16256_v15 = vpop.f32.mrb[184].mxu1  ;;  %v16187_v16 = vadd.f32 %v16186_v14, %v16117_v13  ;;  %v16188_v17 = vpop.f32.mrb[185].mxu0 }
 0x43a   : > { %v16258_v18 = vpop.f32.mrb[185].mxu1 }
 0x43b   : > { %v16257_v19 = vadd.f32 %v16256_v15, %v16187_v16 }
 0x440   : > { %v16326_v20 = vpop.f32.mrb[186].mxu0 }
 0x441   : > { %v16396_v21 = vpop.f32.mrb[186].mxu1  ;;  %v16327_v22 = vadd.f32 %v16326_v20, %v16257_v19  ;;  %v16328_v23 = vpop.f32.mrb[187].mxu0 }
 0x442   : > { %v16398_v24 = vpop.f32.mrb[187].mxu1 }
 0x443   : > { %v16397_v26 = vadd.f32 %v16396_v21, %v16327_v22 }
 0x448   : > { %v16466_v27 = vpop.f32.mrb[188].mxu0 }
 0x449   : > { %v16536_v28 = vpop.f32.mrb[188].mxu1  ;;  %v16467_v29 = vadd.f32 %v16466_v27, %v16397_v26  ;;  %v16468_v30 = vpop.f32.mrb[189].mxu0 }
 0x44a   : > { %v16538_v31 = vpop.f32.mrb[189].mxu1 }
 0x44b   : > { %v16537_v32 = vadd.f32 %v16536_v28, %v16467_v29 }
 0x450   : > { %v16606_v33 = vpop.f32.mrb[190].mxu0 }
 0x451   : > { %v16676_v34 = vpop.f32.mrb[190].mxu1  ;;  %v16607_v35 = vadd.f32 %v16606_v33, %v16537_v32  ;;  %v16608_v36 = vpop.f32.mrb[191].mxu0  ;;  %16688 = sbr.rel (!%p16683_p9) target bundleno = 1122 (0x462), region = 52 }
 0x452   : > { %v16678_v37 = vpop.f32.mrb[191].mxu1 }
 0x453   : > { %v16677_v39 = vadd.f32 %v16676_v34, %v16607_v35 }
 0x455   : > { %v16680_v40 = vadd.f32 %v16677_v39, %v263_v38 }
 0x457   : > { %16682 = vst.msk [vmem:[#allocation8] sm:$0x3] %vm16681_vm1, %v16680_v40 }
 0x45e   : > { %v16689_v41 = vld [vmem:[#allocation8] sm:$0x3] }
 0x45f   : > { %v16697_v43 = vadd.f32 %v16811_v42, %v16689_v41 }
 0x461   : > { %16698 = vst.msk [vmem:[#allocation8] sm:$0x3] %vm16681_vm1, %v16697_v43 }
 0x462 PF: > { %p17617_p11 = scmp.eq.s32.totalorder %s18006_s18, 3  ;;  %s17956_s20 = smov [#allocation8]  }
 0x463   : > { %s16706_s21 = sshll.u32 %s17956_s20, 4  ;;  %s16707_s21 = int_to_ptr.vmem [resolvable:$true] %s16706_s21 }
 0x464   : > { %s17858_s28 = scalar_lea.vmem %s16707_s21, 32  ;;  %p17865_p1 = scmp.lt.s32.totalorder %s16707_s21, %s16707_s21 }
 0x465   : > { %p17859_p13 = scmp.ne.s32.totalorder %s16707_s21, %s17858_s28  ;;  %p17866_p0 = scmp.lt.s32.totalorder %s17858_s28, %s17858_s28 }
 0x467   : > { %p17860_p3 = pnand %p17859_p13, %p17617_p11  ;;  %p17867_p8 = por %p17866_p0, %p17865_p1 }
 0x469   : > { %p17861_p4 = pneg %p17860_p3 }
 0x46b   : > { %p17868_p2 = pnand %p17867_p8, %p17861_p4 }
 0x46d   : > { %17871 = shalt.err (!%p17868_p2)
}
 0x46e   : > { %s17872_s7 = scalar_lea.hbm %s19286_s3, 32 }
 0x46f   : > { %p17873_p12 = scmp.ne.s32.totalorder %s19286_s3, %s17872_s7  ;;  %p17878_p5 = scmp.lt.u32.totalorder %s17872_s7, %s19286_s3 }
 0x471   : > { %p17874_p7 = pnand %p17873_p12, %p17617_p11 }
 0x473   : > { %p17875_p10 = pneg %p17874_p7 }
 0x475   : > { %p17880_p6 = pnand %p17878_p5, %p17875_p10 }
 0x477   : > { %17883 = shalt.err (!%p17880_p6)
}
 0x478   : > { %17600 = dma.vmem_to_hbm [thread:$0]  (%p17617_p11), %s16707_s21, 32, %s19286_s3, [#allocation4]  }
 0x479   : > { %17921 = dma.done.wait (%p17617_p11), [#allocation4], 32  }
 0x47a   : > { %17923 = vsyncadd (%p17617_p11), [#allocation4], 4294967264 }
 0x47b PF: > { %s20_s17 = sadd.s32 1, %s17946_s17   ;;  %s19303_s12 = smov %s17930_s13 }
 0x47c   : > { %p17_p9 = scmp.ge.s32.totalorder %s20_s17, 6   ;;  %s19304_s13 = smov %s17934_s14 }
 0x47d   : > { %s19305_s14 = smov %s18090_s26  ;;  %s19306_s15 = smov %s17942_s16 }
 0x47e   : > { %s19307_s16 = smov %s19309_s25  ;;  %19 = sbr.rel (!%p17_p9) target bundleno = 7 (0x7), region = 94 }
 0x485   :  { %16719 = vsyncpa [#allocation3], 1 }
 0x486   :  { %16721 = vsyncpa [#allocation3 + $0x1], 1 }
 0x487   :  { %16722 = vsyncpa [#allocation6], 1 }
 0x488   :  { %16724 = vsyncpa [#allocation6 + $0x1], 1 }
 0x489   :  { %16725 = vsyncpa [#allocation4], 1 }
 0x48a   :  { %16727 = vsyncpa [#allocation4 + $0x1], 1 }

</bundles_post_ra>
